<compile_context>
chip_gen: v6e
topology: v6e:2x2x1
jax: 0.10.0
libtpu: 0.0.40
codegen_flags: <defaults>
</compile_context>

<pallas_src>
import functools
import math

import jax
import jax.numpy as jnp
from jax import lax
from jax.experimental import pallas as pl
from jax.experimental.pallas import tpu as pltpu


def _layernorm(v, g, b, eps=1e-5):
    v = v.astype(jnp.float32)
    mu = jnp.mean(v, axis=-1, keepdims=True)
    var = jnp.mean(jnp.square(v - mu), axis=-1, keepdims=True)
    return (v - mu) * lax.rsqrt(var + eps) * g + b


def transformer_block_kernel(
    x_ref, mask_ref,
    ln1g_ref, ln1b_ref,
    wq_ref, bq_ref, wk_ref, bk_ref, wv_ref, bv_ref,
    wo_ref, bo_ref,
    ln2g_ref, ln2b_ref,
    w1_ref, b1_ref, w2_ref, b2_ref,
    o_ref,
    k_sc, v_sc,
    *, heads, head_dim, q_tile,
):
    f32 = jnp.float32
    bf16 = jnp.bfloat16
    H, Dh, TQ = heads, head_dim, q_tile
    qi = pl.program_id(1)

    # ---- K/V for the whole sequence: computed once per batch row, cached ----
    @pl.when(qi == 0)
    def _():
        x_kv = x_ref[0].astype(f32)                                       # (S, E)
        nkv = _layernorm(x_kv, ln1g_ref[...], ln1b_ref[...]).astype(bf16)
        k = jnp.dot(nkv, wk_ref[...], preferred_element_type=f32) + bk_ref[...]
        k_sc[...] = k.astype(bf16)
        v = jnp.dot(nkv, wv_ref[...], preferred_element_type=f32) + bv_ref[...]
        v_sc[...] = v.astype(bf16)

    # ---- query tile (sliced from the already-resident (1, S, E) block) ----
    q_start = pl.multiple_of(qi * TQ, TQ)
    x_q = x_ref[0, pl.ds(q_start, TQ), :].astype(f32)                     # (TQ, E)
    nq = _layernorm(x_q, ln1g_ref[...], ln1b_ref[...]).astype(bf16)
    q = jnp.dot(nq, wq_ref[...], preferred_element_type=f32) + bq_ref[...]
    q = q.astype(bf16)                                                    # scale folded into wq/bq

    mask = mask_ref[...].astype(f32)                                      # (TQ, S)

    # ---- attention, head by head (one (TQ, S) score matrix live at a time) ----
    ctx_parts = []
    for h in range(H):
        lo, hi = h * Dh, (h + 1) * Dh
        qh = q[:, lo:hi]                                                  # (TQ, Dh) bf16
        kh = k_sc[:, lo:hi]                                               # (S, Dh) bf16
        s = lax.dot_general(qh, kh, (((1,), (1,)), ((), ())),
                            preferred_element_type=f32)                   # (TQ, S)
        s = s + mask
        m = jnp.max(s, axis=-1, keepdims=True)
        p = jnp.exp(s - m)
        l = jnp.sum(p, axis=-1, keepdims=True)
        vh = v_sc[:, lo:hi]                                               # (S, Dh) bf16
        ctx_h = jnp.dot(p.astype(bf16), vh, preferred_element_type=f32)   # (TQ, Dh)
        ctx_h = ctx_h * pl.reciprocal(l, approx=True)                     # normalize AFTER P@V
        ctx_parts.append(ctx_h.astype(bf16))
    ctx = jnp.concatenate(ctx_parts, axis=-1)                             # (TQ, E) bf16

    # ---- output projection: single lane-dense (TQ,E) @ (E,E) pass ----
    attn_out = jnp.dot(ctx, wo_ref[...], preferred_element_type=f32) + bo_ref[...]
    x1 = attn_out + x_q                    # residual (dropout = identity in eval)

    # ---- norm2 + feed-forward ----
    n2 = _layernorm(x1, ln2g_ref[...], ln2b_ref[...]).astype(bf16)
    h1 = jnp.dot(n2, w1_ref[...], preferred_element_type=f32) + b1_ref[...]
    h1 = jnp.maximum(h1, 0.0).astype(bf16)                                # ReLU
    ff = jnp.dot(h1, w2_ref[...], preferred_element_type=f32) + b2_ref[...]

    o_ref[0] = (ff + x1).astype(o_ref.dtype)


def prepare_params(params, heads, compute_dtype=jnp.bfloat16):
    """Split QKV into lane-dense (E,E) slabs; fold 1/sqrt(Dh) into Wq/bq."""
    (ln1g, ln1b, wqkv, bqkv, wo, bo, ln2g, ln2b, w1, b1, w2, b2) = params
    E = wo.shape[0]
    Dh = E // heads
    scale = 1.0 / math.sqrt(Dh)
    f32 = jnp.float32

    wq = (wqkv[:, 0 * E:1 * E] * scale).astype(compute_dtype)   # (E, E), scaled
    wk = wqkv[:, 1 * E:2 * E].astype(compute_dtype)             # (E, E)
    wv = wqkv[:, 2 * E:3 * E].astype(compute_dtype)             # (E, E)
    bq = (bqkv[:, 0 * E:1 * E] * scale).astype(f32)             # (1, E), scaled
    bk = bqkv[:, 1 * E:2 * E].astype(f32)
    bv = bqkv[:, 2 * E:3 * E].astype(f32)

    return (ln1g.astype(f32), ln1b.astype(f32),
            wq, bq, wk, bk, wv, bv,
            wo.astype(compute_dtype), bo.astype(f32),
            ln2g.astype(f32), ln2b.astype(f32),
            w1.astype(compute_dtype), b1.astype(f32),
            w2.astype(compute_dtype), b2.astype(f32))


def transformer_block(x, mask, params, *, heads, q_tile=None):
    B, S, E = x.shape
    assert E % heads == 0
    head_dim = E // heads

    if q_tile is None:
        q_tile = S if S <= 256 else 256
    assert S % q_tile == 0, "q_tile must divide S"
    assert q_tile == S or q_tile % 8 == 0, "q_tile must be a multiple of 8"
    n_q = S // q_tile

    (ln1g, ln1b, wq, bq, wk, bk, wv, bv, wo_c, bo,
     ln2g, ln2b, w1, b1, w2, b2) = prepare_params(params, heads)

    kernel = functools.partial(transformer_block_kernel,
                               heads=heads, head_dim=head_dim, q_tile=q_tile)

    def const(a):
        n = a.ndim
        return pl.BlockSpec(a.shape, lambda b, q, _n=n: (0,) * _n)

    return pl.pallas_call(
        kernel,
        out_shape=jax.ShapeDtypeStruct((B, S, E), x.dtype),
        grid_spec=pltpu.PrefetchScalarGridSpec(
            num_scalar_prefetch=0,
            grid=(B, n_q),
            in_specs=[
                pl.BlockSpec((1, S, E), lambda b, q: (b, 0, 0)),    # x (full row; query tile sliced in-kernel)
                pl.BlockSpec((q_tile, S), lambda b, q: (q, 0)),     # mask rows
                const(ln1g), const(ln1b),
                const(wq), const(bq), const(wk), const(bk), const(wv), const(bv),
                const(wo_c), const(bo),
                const(ln2g), const(ln2b),
                const(w1), const(b1), const(w2), const(b2),
            ],
            out_specs=pl.BlockSpec((1, q_tile, E), lambda b, q: (b, q, 0)),
            scratch_shapes=[
                pltpu.VMEM((S, E), jnp.bfloat16),    # K cache (per batch row)
                pltpu.VMEM((S, E), jnp.bfloat16),    # V cache (per batch row)
            ],
        ),
        compiler_params=pltpu.CompilerParams(
            dimension_semantics=("parallel", "arbitrary"),
            vmem_limit_bytes=48 * 1024 * 1024,
        ),
    )(x, mask, ln1g, ln1b, wq, bq, wk, bk, wv, bv, wo_c, bo, ln2g, ln2b, w1, b1, w2, b2)


def reference_block(x, mask, params, *, heads):
    """Pure-JAX f32 reference mirroring the PyTorch forward (eval mode)."""
    (ln1g, ln1b, wqkv, bqkv, wo, bo, ln2g, ln2b, w1, b1, w2, b2) = params
    B, S, E = x.shape
    hd = E // heads
    nx = _layernorm(x, ln1g, ln1b)
    qkv = nx @ wqkv + bqkv
    q, k, v = qkv[..., :E], qkv[..., E:2 * E], qkv[..., 2 * E:]
    q = q.reshape(B, S, heads, hd).transpose(0, 2, 1, 3)
    k = k.reshape(B, S, heads, hd).transpose(0, 2, 1, 3)
    v = v.reshape(B, S, heads, hd).transpose(0, 2, 1, 3)
    s = jnp.einsum("bhqd,bhkd->bhqk", q, k) / math.sqrt(hd) + mask[None, None]
    p = jax.nn.softmax(s, axis=-1)
    ctx = jnp.einsum("bhqk,bhkd->bhqd", p, v).transpose(0, 2, 1, 3).reshape(B, S, E)
    attn_out = ctx @ wo + bo
    x1 = attn_out + x
    n2 = _layernorm(x1, ln2g, ln2b)
    ff = jnp.maximum(n2 @ w1 + b1, 0.0) @ w2 + b2
    return ff + x1


def make_params(key, embed_size):
    E = embed_size
    ks = jax.random.split(key, 8)
    scl = 0.02
    ln1g = jnp.ones((1, E), jnp.float32)
    ln1b = jnp.zeros((1, E), jnp.float32)
    ln2g = jnp.ones((1, E), jnp.float32)
    ln2b = jnp.zeros((1, E), jnp.float32)
    # nn.MultiheadAttention: in_proj (3E, E), out_proj (E, E); pre-transposed to (in, out)
    wqkv = scl * jax.random.normal(ks[0], (E, 3 * E), jnp.float32)
    bqkv = scl * jax.random.normal(ks[1], (1, 3 * E), jnp.float32)
    wo = scl * jax.random.normal(ks[2], (E, E), jnp.float32)
    bo = scl * jax.random.normal(ks[3], (1, E), jnp.float32)
    # feed_forward: Linear(E, 4E) -> ReLU -> Linear(4E, E); pre-transposed to (in, out)
    w1 = scl * jax.random.normal(ks[4], (E, 4 * E), jnp.float32)
    b1 = scl * jax.random.normal(ks[5], (1, 4 * E), jnp.float32)
    w2 = scl * jax.random.normal(ks[6], (4 * E, E), jnp.float32)
    b2 = scl * jax.random.normal(ks[7], (1, E), jnp.float32)
    return (ln1g, ln1b, wqkv, bqkv, wo, bo, ln2g, ln2b, w1, b1, w2, b2)


if __name__ == "__main__":
    # Small but lane-dense shapes: E multiple of 128; q_tile < S so the
    # per-batch-row K/V scratch cache is actually exercised across q tiles.
    B, S, E, H = 2, 128, 128, 4
    key = jax.random.PRNGKey(0)
    kx, kp = jax.random.split(key, 2)

    x = jax.random.normal(kx, (B, S, E), jnp.float32)
    # additive float attn_mask (S, S): upper triangle masked with -1e9 (causal-like)
    mask = jnp.where(jnp.triu(jnp.ones((S, S), jnp.bool_), k=1), -1e9, 0.0).astype(jnp.float32)
    params = make_params(kp, E)

    out = transformer_block(x, mask, params, heads=H, q_tile=64)
    out = jax.block_until_ready(out)

    ref = reference_block(x, mask, params, heads=H)
    assert out.shape == (B, S, E)
    max_err = float(jnp.max(jnp.abs(out - ref)))
    # bf16 MXU operands + approx reciprocal => slightly looser tolerance than pure f32
    assert jnp.allclose(out, ref, atol=2e-2, rtol=2e-2), f"mismatch vs reference (max err {max_err})"

    print("KERNEL_OK")
</pallas_src>

<mosaic_0001>
module attributes {stable_mosaic.version = 11 : i64} {
  func.func @transformer_block_kernel(%arg0: i32, %arg1: i32, %arg2: memref<1x128x128xf32, #tpu.memory_space<vmem>>, %arg3: memref<64x128xf32, #tpu.memory_space<vmem>>, %arg4: memref<1x128xf32, #tpu.memory_space<vmem>>, %arg5: memref<1x128xf32, #tpu.memory_space<vmem>>, %arg6: memref<128x128xbf16, #tpu.memory_space<vmem>>, %arg7: memref<1x128xf32, #tpu.memory_space<vmem>>, %arg8: memref<128x128xbf16, #tpu.memory_space<vmem>>, %arg9: memref<1x128xf32, #tpu.memory_space<vmem>>, %arg10: memref<128x128xbf16, #tpu.memory_space<vmem>>, %arg11: memref<1x128xf32, #tpu.memory_space<vmem>>, %arg12: memref<128x128xbf16, #tpu.memory_space<vmem>>, %arg13: memref<1x128xf32, #tpu.memory_space<vmem>>, %arg14: memref<1x128xf32, #tpu.memory_space<vmem>>, %arg15: memref<1x128xf32, #tpu.memory_space<vmem>>, %arg16: memref<128x512xbf16, #tpu.memory_space<vmem>>, %arg17: memref<1x512xf32, #tpu.memory_space<vmem>>, %arg18: memref<512x128xbf16, #tpu.memory_space<vmem>>, %arg19: memref<1x128xf32, #tpu.memory_space<vmem>>, %arg20: memref<1x64x128xf32, #tpu.memory_space<vmem>>, %arg21: memref<128x128xbf16, #tpu.memory_space<vmem>>, %arg22: memref<128x128xbf16, #tpu.memory_space<vmem>>) attributes {dimension_semantics = [#tpu.dimension_semantics<parallel>, #tpu.dimension_semantics<arbitrary>], iteration_bounds = array<i64: 2, 2>, scalar_prefetch = 0 : i64, scratch_operands = 2 : i64, tpu.core_type = #tpu.core_type<tc>, window_params = [{transform_indices = @transform_0, window_bounds = array<i64: 1, 128, 128>}, {transform_indices = @transform_1, window_bounds = array<i64: 64, 128>}, {pipeline_mode = #tpu.pipeline_mode<synchronous>, transform_indices = @transform_2, window_bounds = array<i64: 1, 128>}, {pipeline_mode = #tpu.pipeline_mode<synchronous>, transform_indices = @transform_3, window_bounds = array<i64: 1, 128>}, {pipeline_mode = #tpu.pipeline_mode<synchronous>, transform_indices = @transform_4, window_bounds = array<i64: 128, 128>}, {pipeline_mode = #tpu.pipeline_mode<synchronous>, transform_indices = @transform_5, window_bounds = array<i64: 1, 128>}, {pipeline_mode = #tpu.pipeline_mode<synchronous>, transform_indices = @transform_6, window_bounds = array<i64: 128, 128>}, {pipeline_mode = #tpu.pipeline_mode<synchronous>, transform_indices = @transform_7, window_bounds = array<i64: 1, 128>}, {pipeline_mode = #tpu.pipeline_mode<synchronous>, transform_indices = @transform_8, window_bounds = array<i64: 128, 128>}, {pipeline_mode = #tpu.pipeline_mode<synchronous>, transform_indices = @transform_9, window_bounds = array<i64: 1, 128>}, {pipeline_mode = #tpu.pipeline_mode<synchronous>, transform_indices = @transform_10, window_bounds = array<i64: 128, 128>}, {pipeline_mode = #tpu.pipeline_mode<synchronous>, transform_indices = @transform_11, window_bounds = array<i64: 1, 128>}, {pipeline_mode = #tpu.pipeline_mode<synchronous>, transform_indices = @transform_12, window_bounds = array<i64: 1, 128>}, {pipeline_mode = #tpu.pipeline_mode<synchronous>, transform_indices = @transform_13, window_bounds = array<i64: 1, 128>}, {pipeline_mode = #tpu.pipeline_mode<synchronous>, transform_indices = @transform_14, window_bounds = array<i64: 128, 512>}, {pipeline_mode = #tpu.pipeline_mode<synchronous>, transform_indices = @transform_15, window_bounds = array<i64: 1, 512>}, {pipeline_mode = #tpu.pipeline_mode<synchronous>, transform_indices = @transform_16, window_bounds = array<i64: 512, 128>}, {pipeline_mode = #tpu.pipeline_mode<synchronous>, transform_indices = @transform_17, window_bounds = array<i64: 1, 128>}, {transform_indices = @transform_18, window_bounds = array<i64: 1, 64, 128>}]} {
    %c0_i32 = arith.constant 0 : i32
    %0 = arith.cmpi eq, %arg1, %c0_i32 : i32
    %1 = arith.extui %0 : i1 to i32
    %c0_i32_0 = arith.constant 0 : i32
    %2 = arith.cmpi ne, %1, %c0_i32_0 : i32
    scf.if %2 {
      %c0_74 = arith.constant 0 : index
      %c0_75 = arith.constant 0 : index
      %c0_76 = arith.constant 0 : index
      %161 = vector.load %arg2[%c0_74, %c0_75, %c0_76] : memref<1x128x128xf32, #tpu.memory_space<vmem>>, vector<1x128x128xf32>
      %162 = vector.shape_cast %161 : vector<1x128x128xf32> to vector<128x128xf32>
      %c0_77 = arith.constant 0 : index
      %c0_78 = arith.constant 0 : index
      %163 = vector.load %arg4[%c0_77, %c0_78] : memref<1x128xf32, #tpu.memory_space<vmem>>, vector<1x128xf32>
      %c0_79 = arith.constant 0 : index
      %c0_80 = arith.constant 0 : index
      %164 = vector.load %arg5[%c0_79, %c0_80] : memref<1x128xf32, #tpu.memory_space<vmem>>, vector<1x128xf32>
      %cst_81 = arith.constant dense<0.000000e+00> : vector<128xf32>
      %165 = vector.multi_reduction <add>, %162, %cst_81 [1] : vector<128x128xf32> to vector<128xf32>
      %166 = vector.shape_cast %165 : vector<128xf32> to vector<128x1xf32>
      %cst_82 = arith.constant 1.280000e+02 : f32
      %167 = vector.broadcast %cst_82 : f32 to vector<128x1xf32>
      %168 = arith.divf %166, %167 : vector<128x1xf32>
      %169 = vector.broadcast %168 : vector<128x1xf32> to vector<128x128xf32>
      %170 = arith.subf %162, %169 : vector<128x128xf32>
      %171 = arith.mulf %170, %170 : vector<128x128xf32>
      %cst_83 = arith.constant dense<0.000000e+00> : vector<128xf32>
      %172 = vector.multi_reduction <add>, %171, %cst_83 [1] : vector<128x128xf32> to vector<128xf32>
      %173 = vector.shape_cast %172 : vector<128xf32> to vector<128x1xf32>
      %cst_84 = arith.constant 1.280000e+02 : f32
      %174 = vector.broadcast %cst_84 : f32 to vector<128x1xf32>
      %175 = arith.divf %173, %174 : vector<128x1xf32>
      %176 = vector.broadcast %168 : vector<128x1xf32> to vector<128x128xf32>
      %177 = arith.subf %162, %176 : vector<128x128xf32>
      %cst_85 = arith.constant 9.99999974E-6 : f32
      %178 = vector.broadcast %cst_85 : f32 to vector<128x1xf32>
      %179 = arith.addf %175, %178 : vector<128x1xf32>
      %180 = math.rsqrt %179 : vector<128x1xf32>
      %181 = vector.broadcast %180 : vector<128x1xf32> to vector<128x128xf32>
      %182 = arith.mulf %177, %181 : vector<128x128xf32>
      %183 = vector.broadcast %163 : vector<1x128xf32> to vector<128x128xf32>
      %184 = arith.mulf %182, %183 : vector<128x128xf32>
      %185 = vector.broadcast %164 : vector<1x128xf32> to vector<128x128xf32>
      %186 = arith.addf %184, %185 : vector<128x128xf32>
      %187 = arith.truncf %186 : vector<128x128xf32> to vector<128x128xbf16>
      %c0_86 = arith.constant 0 : index
      %c0_87 = arith.constant 0 : index
      %188 = vector.load %arg8[%c0_86, %c0_87] : memref<128x128xbf16, #tpu.memory_space<vmem>>, vector<128x128xbf16>
      %cst_88 = arith.constant dense<0.000000e+00> : vector<128x128xf32>
      %189 = tpu.matmul %187, %188, %cst_88 {dimension_numbers = #tpu.dot_dimension_numbers<[1], [0], [0], [1], [0, 0, 1, 1], [], []>} : vector<128x128xbf16>, vector<128x128xbf16>, vector<128x128xf32> -> vector<128x128xf32>
      %c0_89 = arith.constant 0 : index
      %c0_90 = arith.constant 0 : index
      %190 = vector.load %arg9[%c0_89, %c0_90] : memref<1x128xf32, #tpu.memory_space<vmem>>, vector<1x128xf32>
      %191 = vector.broadcast %190 : vector<1x128xf32> to vector<128x128xf32>
      %192 = arith.addf %189, %191 : vector<128x128xf32>
      %193 = arith.truncf %192 : vector<128x128xf32> to vector<128x128xbf16>
      %c0_91 = arith.constant 0 : index
      %c0_92 = arith.constant 0 : index
      %194 = vector.load %arg21[%c0_91, %c0_92] : memref<128x128xbf16, #tpu.memory_space<vmem>>, vector<128x128xbf16>
      tpu.vector_store %arg21[%c0_91, %c0_92], %193 {strides = array<i32>} : memref<128x128xbf16, #tpu.memory_space<vmem>>, vector<128x128xbf16>,
      %c0_93 = arith.constant 0 : index
      %c0_94 = arith.constant 0 : index
      %195 = vector.load %arg10[%c0_93, %c0_94] : memref<128x128xbf16, #tpu.memory_space<vmem>>, vector<128x128xbf16>
      %cst_95 = arith.constant dense<0.000000e+00> : vector<128x128xf32>
      %196 = tpu.matmul %187, %195, %cst_95 {dimension_numbers = #tpu.dot_dimension_numbers<[1], [0], [0], [1], [0, 0, 1, 1], [], []>} : vector<128x128xbf16>, vector<128x128xbf16>, vector<128x128xf32> -> vector<128x128xf32>
      %c0_96 = arith.constant 0 : index
      %c0_97 = arith.constant 0 : index
      %197 = vector.load %arg11[%c0_96, %c0_97] : memref<1x128xf32, #tpu.memory_space<vmem>>, vector<1x128xf32>
      %198 = vector.broadcast %197 : vector<1x128xf32> to vector<128x128xf32>
      %199 = arith.addf %196, %198 : vector<128x128xf32>
      %200 = arith.truncf %199 : vector<128x128xf32> to vector<128x128xbf16>
      %c0_98 = arith.constant 0 : index
      %c0_99 = arith.constant 0 : index
      %201 = vector.load %arg22[%c0_98, %c0_99] : memref<128x128xbf16, #tpu.memory_space<vmem>>, vector<128x128xbf16>
      tpu.vector_store %arg22[%c0_98, %c0_99], %200 {strides = array<i32>} : memref<128x128xbf16, #tpu.memory_space<vmem>>, vector<128x128xbf16>,
    } else {
    }
    %c64_i32 = arith.constant 64 : i32
    %3 = arith.muli %arg1, %c64_i32 : i32
    %4 = tpu.assume_multiple %3, 64 : i32
    %c0 = arith.constant 0 : index
    %5 = arith.index_cast %4 : i32 to index
    %c0_1 = arith.constant 0 : index
    %6 = vector.load %arg2[%c0, %5, %c0_1] : memref<1x128x128xf32, #tpu.memory_space<vmem>>, vector<1x64x128xf32>
    %7 = vector.shape_cast %6 : vector<1x64x128xf32> to vector<64x128xf32>
    %c0_2 = arith.constant 0 : index
    %c0_3 = arith.constant 0 : index
    %8 = vector.load %arg4[%c0_2, %c0_3] : memref<1x128xf32, #tpu.memory_space<vmem>>, vector<1x128xf32>
    %c0_4 = arith.constant 0 : index
    %c0_5 = arith.constant 0 : index
    %9 = vector.load %arg5[%c0_4, %c0_5] : memref<1x128xf32, #tpu.memory_space<vmem>>, vector<1x128xf32>
    %cst = arith.constant dense<0.000000e+00> : vector<64xf32>
    %10 = vector.multi_reduction <add>, %7, %cst [1] : vector<64x128xf32> to vector<64xf32>
    %11 = vector.shape_cast %10 : vector<64xf32> to vector<64x1xf32>
    %cst_6 = arith.constant 1.280000e+02 : f32
    %12 = vector.broadcast %cst_6 : f32 to vector<64x1xf32>
    %13 = arith.divf %11, %12 : vector<64x1xf32>
    %14 = vector.broadcast %13 : vector<64x1xf32> to vector<64x128xf32>
    %15 = arith.subf %7, %14 : vector<64x128xf32>
    %16 = arith.mulf %15, %15 : vector<64x128xf32>
    %cst_7 = arith.constant dense<0.000000e+00> : vector<64xf32>
    %17 = vector.multi_reduction <add>, %16, %cst_7 [1] : vector<64x128xf32> to vector<64xf32>
    %18 = vector.shape_cast %17 : vector<64xf32> to vector<64x1xf32>
    %cst_8 = arith.constant 1.280000e+02 : f32
    %19 = vector.broadcast %cst_8 : f32 to vector<64x1xf32>
    %20 = arith.divf %18, %19 : vector<64x1xf32>
    %21 = vector.broadcast %13 : vector<64x1xf32> to vector<64x128xf32>
    %22 = arith.subf %7, %21 : vector<64x128xf32>
    %cst_9 = arith.constant 9.99999974E-6 : f32
    %23 = vector.broadcast %cst_9 : f32 to vector<64x1xf32>
    %24 = arith.addf %20, %23 : vector<64x1xf32>
    %25 = math.rsqrt %24 : vector<64x1xf32>
    %26 = vector.broadcast %25 : vector<64x1xf32> to vector<64x128xf32>
    %27 = arith.mulf %22, %26 : vector<64x128xf32>
    %28 = vector.broadcast %8 : vector<1x128xf32> to vector<64x128xf32>
    %29 = arith.mulf %27, %28 : vector<64x128xf32>
    %30 = vector.broadcast %9 : vector<1x128xf32> to vector<64x128xf32>
    %31 = arith.addf %29, %30 : vector<64x128xf32>
    %32 = arith.truncf %31 : vector<64x128xf32> to vector<64x128xbf16>
    %c0_10 = arith.constant 0 : index
    %c0_11 = arith.constant 0 : index
    %33 = vector.load %arg6[%c0_10, %c0_11] : memref<128x128xbf16, #tpu.memory_space<vmem>>, vector<128x128xbf16>
    %cst_12 = arith.constant dense<0.000000e+00> : vector<64x128xf32>
    %34 = tpu.matmul %32, %33, %cst_12 {dimension_numbers = #tpu.dot_dimension_numbers<[1], [0], [0], [1], [0, 0, 1, 1], [], []>} : vector<64x128xbf16>, vector<128x128xbf16>, vector<64x128xf32> -> vector<64x128xf32>
    %c0_13 = arith.constant 0 : index
    %c0_14 = arith.constant 0 : index
    %35 = vector.load %arg7[%c0_13, %c0_14] : memref<1x128xf32, #tpu.memory_space<vmem>>, vector<1x128xf32>
    %36 = vector.broadcast %35 : vector<1x128xf32> to vector<64x128xf32>
    %37 = arith.addf %34, %36 : vector<64x128xf32>
    %38 = arith.truncf %37 : vector<64x128xf32> to vector<64x128xbf16>
    %c0_15 = arith.constant 0 : index
    %c0_16 = arith.constant 0 : index
    %39 = vector.load %arg3[%c0_15, %c0_16] : memref<64x128xf32, #tpu.memory_space<vmem>>, vector<64x128xf32>
    %40 = vector.extract_strided_slice %38 {offsets = [0, 0], sizes = [64, 32], strides = [1, 1]} : vector<64x128xbf16> to vector<64x32xbf16>
    %c0_17 = arith.constant 0 : index
    %c0_18 = arith.constant 0 : index
    %41 = vector.load %arg21[%c0_17, %c0_18] : memref<128x128xbf16, #tpu.memory_space<vmem>>, vector<128x32xbf16>
    %cst_19 = arith.constant dense<0.000000e+00> : vector<64x128xf32>
    %42 = tpu.matmul %40, %41, %cst_19 {dimension_numbers = #tpu.dot_dimension_numbers<[1], [1], [0], [0], [0, 0, 1, 0], [], []>} : vector<64x32xbf16>, vector<128x32xbf16>, vector<64x128xf32> -> vector<64x128xf32>
    %43 = arith.addf %42, %39 : vector<64x128xf32>
    %cst_20 = arith.constant dense<0xFF800000> : vector<64xf32>
    %44 = vector.multi_reduction <maximumf>, %43, %cst_20 [1] : vector<64x128xf32> to vector<64xf32>
    %45 = vector.shape_cast %44 : vector<64xf32> to vector<64x1xf32>
    %46 = vector.broadcast %45 : vector<64x1xf32> to vector<64x128xf32>
    %47 = arith.subf %43, %46 : vector<64x128xf32>
    %48 = math.exp %47 : vector<64x128xf32>
    %cst_21 = arith.constant dense<0.000000e+00> : vector<64xf32>
    %49 = vector.multi_reduction <add>, %48, %cst_21 [1] : vector<64x128xf32> to vector<64xf32>
    %50 = vector.shape_cast %49 : vector<64xf32> to vector<64x1xf32>
    %c0_22 = arith.constant 0 : index
    %c0_23 = arith.constant 0 : index
    %51 = vector.load %arg22[%c0_22, %c0_23] : memref<128x128xbf16, #tpu.memory_space<vmem>>, vector<128x32xbf16>
    %52 = arith.truncf %48 : vector<64x128xf32> to vector<64x128xbf16>
    %cst_24 = arith.constant dense<0.000000e+00> : vector<64x32xf32>
    %53 = tpu.matmul %52, %51, %cst_24 {dimension_numbers = #tpu.dot_dimension_numbers<[1], [0], [0], [1], [0, 0, 1, 1], [], []>} : vector<64x128xbf16>, vector<128x32xbf16>, vector<64x32xf32> -> vector<64x32xf32>
    %54 = tpu.reciprocal %50 {approx = true} : vector<64x1xf32> -> vector<64x1xf32>
    %55 = vector.broadcast %54 : vector<64x1xf32> to vector<64x32xf32>
    %56 = arith.mulf %53, %55 : vector<64x32xf32>
    %57 = arith.truncf %56 : vector<64x32xf32> to vector<64x32xbf16>
    %58 = vector.extract_strided_slice %38 {offsets = [0, 32], sizes = [64, 32], strides = [1, 1]} : vector<64x128xbf16> to vector<64x32xbf16>
    %c0_25 = arith.constant 0 : index
    %c32 = arith.constant 32 : index
    %59 = vector.load %arg21[%c0_25, %c32] : memref<128x128xbf16, #tpu.memory_space<vmem>>, vector<128x32xbf16>
    %cst_26 = arith.constant dense<0.000000e+00> : vector<64x128xf32>
    %60 = tpu.matmul %58, %59, %cst_26 {dimension_numbers = #tpu.dot_dimension_numbers<[1], [1], [0], [0], [0, 0, 1, 0], [], []>} : vector<64x32xbf16>, vector<128x32xbf16>, vector<64x128xf32> -> vector<64x128xf32>
    %61 = arith.addf %60, %39 : vector<64x128xf32>
    %cst_27 = arith.constant dense<0xFF800000> : vector<64xf32>
    %62 = vector.multi_reduction <maximumf>, %61, %cst_27 [1] : vector<64x128xf32> to vector<64xf32>
    %63 = vector.shape_cast %62 : vector<64xf32> to vector<64x1xf32>
    %64 = vector.broadcast %63 : vector<64x1xf32> to vector<64x128xf32>
    %65 = arith.subf %61, %64 : vector<64x128xf32>
    %66 = math.exp %65 : vector<64x128xf32>
    %cst_28 = arith.constant dense<0.000000e+00> : vector<64xf32>
    %67 = vector.multi_reduction <add>, %66, %cst_28 [1] : vector<64x128xf32> to vector<64xf32>
    %68 = vector.shape_cast %67 : vector<64xf32> to vector<64x1xf32>
    %c0_29 = arith.constant 0 : index
    %c32_30 = arith.constant 32 : index
    %69 = vector.load %arg22[%c0_29, %c32_30] : memref<128x128xbf16, #tpu.memory_space<vmem>>, vector<128x32xbf16>
    %70 = arith.truncf %66 : vector<64x128xf32> to vector<64x128xbf16>
    %cst_31 = arith.constant dense<0.000000e+00> : vector<64x32xf32>
    %71 = tpu.matmul %70, %69, %cst_31 {dimension_numbers = #tpu.dot_dimension_numbers<[1], [0], [0], [1], [0, 0, 1, 1], [], []>} : vector<64x128xbf16>, vector<128x32xbf16>, vector<64x32xf32> -> vector<64x32xf32>
    %72 = tpu.reciprocal %68 {approx = true} : vector<64x1xf32> -> vector<64x1xf32>
    %73 = vector.broadcast %72 : vector<64x1xf32> to vector<64x32xf32>
    %74 = arith.mulf %71, %73 : vector<64x32xf32>
    %75 = arith.truncf %74 : vector<64x32xf32> to vector<64x32xbf16>
    %76 = vector.extract_strided_slice %38 {offsets = [0, 64], sizes = [64, 32], strides = [1, 1]} : vector<64x128xbf16> to vector<64x32xbf16>
    %c0_32 = arith.constant 0 : index
    %c64 = arith.constant 64 : index
    %77 = vector.load %arg21[%c0_32, %c64] : memref<128x128xbf16, #tpu.memory_space<vmem>>, vector<128x32xbf16>
    %cst_33 = arith.constant dense<0.000000e+00> : vector<64x128xf32>
    %78 = tpu.matmul %76, %77, %cst_33 {dimension_numbers = #tpu.dot_dimension_numbers<[1], [1], [0], [0], [0, 0, 1, 0], [], []>} : vector<64x32xbf16>, vector<128x32xbf16>, vector<64x128xf32> -> vector<64x128xf32>
    %79 = arith.addf %78, %39 : vector<64x128xf32>
    %cst_34 = arith.constant dense<0xFF800000> : vector<64xf32>
    %80 = vector.multi_reduction <maximumf>, %79, %cst_34 [1] : vector<64x128xf32> to vector<64xf32>
    %81 = vector.shape_cast %80 : vector<64xf32> to vector<64x1xf32>
    %82 = vector.broadcast %81 : vector<64x1xf32> to vector<64x128xf32>
    %83 = arith.subf %79, %82 : vector<64x128xf32>
    %84 = math.exp %83 : vector<64x128xf32>
    %cst_35 = arith.constant dense<0.000000e+00> : vector<64xf32>
    %85 = vector.multi_reduction <add>, %84, %cst_35 [1] : vector<64x128xf32> to vector<64xf32>
    %86 = vector.shape_cast %85 : vector<64xf32> to vector<64x1xf32>
    %c0_36 = arith.constant 0 : index
    %c64_37 = arith.constant 64 : index
    %87 = vector.load %arg22[%c0_36, %c64_37] : memref<128x128xbf16, #tpu.memory_space<vmem>>, vector<128x32xbf16>
    %88 = arith.truncf %84 : vector<64x128xf32> to vector<64x128xbf16>
    %cst_38 = arith.constant dense<0.000000e+00> : vector<64x32xf32>
    %89 = tpu.matmul %88, %87, %cst_38 {dimension_numbers = #tpu.dot_dimension_numbers<[1], [0], [0], [1], [0, 0, 1, 1], [], []>} : vector<64x128xbf16>, vector<128x32xbf16>, vector<64x32xf32> -> vector<64x32xf32>
    %90 = tpu.reciprocal %86 {approx = true} : vector<64x1xf32> -> vector<64x1xf32>
    %91 = vector.broadcast %90 : vector<64x1xf32> to vector<64x32xf32>
    %92 = arith.mulf %89, %91 : vector<64x32xf32>
    %93 = arith.truncf %92 : vector<64x32xf32> to vector<64x32xbf16>
    %94 = vector.extract_strided_slice %38 {offsets = [0, 96], sizes = [64, 32], strides = [1, 1]} : vector<64x128xbf16> to vector<64x32xbf16>
    %c0_39 = arith.constant 0 : index
    %c96 = arith.constant 96 : index
    %95 = vector.load %arg21[%c0_39, %c96] : memref<128x128xbf16, #tpu.memory_space<vmem>>, vector<128x32xbf16>
    %cst_40 = arith.constant dense<0.000000e+00> : vector<64x128xf32>
    %96 = tpu.matmul %94, %95, %cst_40 {dimension_numbers = #tpu.dot_dimension_numbers<[1], [1], [0], [0], [0, 0, 1, 0], [], []>} : vector<64x32xbf16>, vector<128x32xbf16>, vector<64x128xf32> -> vector<64x128xf32>
    %97 = arith.addf %96, %39 : vector<64x128xf32>
    %cst_41 = arith.constant dense<0xFF800000> : vector<64xf32>
    %98 = vector.multi_reduction <maximumf>, %97, %cst_41 [1] : vector<64x128xf32> to vector<64xf32>
    %99 = vector.shape_cast %98 : vector<64xf32> to vector<64x1xf32>
    %100 = vector.broadcast %99 : vector<64x1xf32> to vector<64x128xf32>
    %101 = arith.subf %97, %100 : vector<64x128xf32>
    %102 = math.exp %101 : vector<64x128xf32>
    %cst_42 = arith.constant dense<0.000000e+00> : vector<64xf32>
    %103 = vector.multi_reduction <add>, %102, %cst_42 [1] : vector<64x128xf32> to vector<64xf32>
    %104 = vector.shape_cast %103 : vector<64xf32> to vector<64x1xf32>
    %c0_43 = arith.constant 0 : index
    %c96_44 = arith.constant 96 : index
    %105 = vector.load %arg22[%c0_43, %c96_44] : memref<128x128xbf16, #tpu.memory_space<vmem>>, vector<128x32xbf16>
    %106 = arith.truncf %102 : vector<64x128xf32> to vector<64x128xbf16>
    %cst_45 = arith.constant dense<0.000000e+00> : vector<64x32xf32>
    %107 = tpu.matmul %106, %105, %cst_45 {dimension_numbers = #tpu.dot_dimension_numbers<[1], [0], [0], [1], [0, 0, 1, 1], [], []>} : vector<64x128xbf16>, vector<128x32xbf16>, vector<64x32xf32> -> vector<64x32xf32>
    %108 = tpu.reciprocal %104 {approx = true} : vector<64x1xf32> -> vector<64x1xf32>
    %109 = vector.broadcast %108 : vector<64x1xf32> to vector<64x32xf32>
    %110 = arith.mulf %107, %109 : vector<64x32xf32>
    %111 = arith.truncf %110 : vector<64x32xf32> to vector<64x32xbf16>
    %112 = tpu.concatenate %57, %75, %93, %111 in 1 : vector<64x32xbf16>, vector<64x32xbf16>, vector<64x32xbf16>, vector<64x32xbf16> -> vector<64x128xbf16>
    %c0_46 = arith.constant 0 : index
    %c0_47 = arith.constant 0 : index
    %113 = vector.load %arg12[%c0_46, %c0_47] : memref<128x128xbf16, #tpu.memory_space<vmem>>, vector<128x128xbf16>
    %cst_48 = arith.constant dense<0.000000e+00> : vector<64x128xf32>
    %114 = tpu.matmul %112, %113, %cst_48 {dimension_numbers = #tpu.dot_dimension_numbers<[1], [0], [0], [1], [0, 0, 1, 1], [], []>} : vector<64x128xbf16>, vector<128x128xbf16>, vector<64x128xf32> -> vector<64x128xf32>
    %c0_49 = arith.constant 0 : index
    %c0_50 = arith.constant 0 : index
    %115 = vector.load %arg13[%c0_49, %c0_50] : memref<1x128xf32, #tpu.memory_space<vmem>>, vector<1x128xf32>
    %116 = vector.broadcast %115 : vector<1x128xf32> to vector<64x128xf32>
    %117 = arith.addf %114, %116 : vector<64x128xf32>
    %118 = arith.addf %117, %7 : vector<64x128xf32>
    %c0_51 = arith.constant 0 : index
    %c0_52 = arith.constant 0 : index
    %119 = vector.load %arg14[%c0_51, %c0_52] : memref<1x128xf32, #tpu.memory_space<vmem>>, vector<1x128xf32>
    %c0_53 = arith.constant 0 : index
    %c0_54 = arith.constant 0 : index
    %120 = vector.load %arg15[%c0_53, %c0_54] : memref<1x128xf32, #tpu.memory_space<vmem>>, vector<1x128xf32>
    %cst_55 = arith.constant dense<0.000000e+00> : vector<64xf32>
    %121 = vector.multi_reduction <add>, %118, %cst_55 [1] : vector<64x128xf32> to vector<64xf32>
    %122 = vector.shape_cast %121 : vector<64xf32> to vector<64x1xf32>
    %cst_56 = arith.constant 1.280000e+02 : f32
    %123 = vector.broadcast %cst_56 : f32 to vector<64x1xf32>
    %124 = arith.divf %122, %123 : vector<64x1xf32>
    %125 = vector.broadcast %124 : vector<64x1xf32> to vector<64x128xf32>
    %126 = arith.subf %118, %125 : vector<64x128xf32>
    %127 = arith.mulf %126, %126 : vector<64x128xf32>
    %cst_57 = arith.constant dense<0.000000e+00> : vector<64xf32>
    %128 = vector.multi_reduction <add>, %127, %cst_57 [1] : vector<64x128xf32> to vector<64xf32>
    %129 = vector.shape_cast %128 : vector<64xf32> to vector<64x1xf32>
    %cst_58 = arith.constant 1.280000e+02 : f32
    %130 = vector.broadcast %cst_58 : f32 to vector<64x1xf32>
    %131 = arith.divf %129, %130 : vector<64x1xf32>
    %132 = vector.broadcast %124 : vector<64x1xf32> to vector<64x128xf32>
    %133 = arith.subf %118, %132 : vector<64x128xf32>
    %cst_59 = arith.constant 9.99999974E-6 : f32
    %134 = vector.broadcast %cst_59 : f32 to vector<64x1xf32>
    %135 = arith.addf %131, %134 : vector<64x1xf32>
    %136 = math.rsqrt %135 : vector<64x1xf32>
    %137 = vector.broadcast %136 : vector<64x1xf32> to vector<64x128xf32>
    %138 = arith.mulf %133, %137 : vector<64x128xf32>
    %139 = vector.broadcast %119 : vector<1x128xf32> to vector<64x128xf32>
    %140 = arith.mulf %138, %139 : vector<64x128xf32>
    %141 = vector.broadcast %120 : vector<1x128xf32> to vector<64x128xf32>
    %142 = arith.addf %140, %141 : vector<64x128xf32>
    %143 = arith.truncf %142 : vector<64x128xf32> to vector<64x128xbf16>
    %c0_60 = arith.constant 0 : index
    %c0_61 = arith.constant 0 : index
    %144 = vector.load %arg16[%c0_60, %c0_61] : memref<128x512xbf16, #tpu.memory_space<vmem>>, vector<128x512xbf16>
    %cst_62 = arith.constant dense<0.000000e+00> : vector<64x512xf32>
    %145 = tpu.matmul %143, %144, %cst_62 {dimension_numbers = #tpu.dot_dimension_numbers<[1], [0], [0], [1], [0, 0, 1, 1], [], []>} : vector<64x128xbf16>, vector<128x512xbf16>, vector<64x512xf32> -> vector<64x512xf32>
    %c0_63 = arith.constant 0 : index
    %c0_64 = arith.constant 0 : index
    %146 = vector.load %arg17[%c0_63, %c0_64] : memref<1x512xf32, #tpu.memory_space<vmem>>, vector<1x512xf32>
    %147 = vector.broadcast %146 : vector<1x512xf32> to vector<64x512xf32>
    %148 = arith.addf %145, %147 : vector<64x512xf32>
    %cst_65 = arith.constant 0.000000e+00 : f32
    %149 = vector.broadcast %cst_65 : f32 to vector<64x512xf32>
    %150 = arith.maximumf %148, %149 : vector<64x512xf32>
    %151 = arith.truncf %150 : vector<64x512xf32> to vector<64x512xbf16>
    %c0_66 = arith.constant 0 : index
    %c0_67 = arith.constant 0 : index
    %152 = vector.load %arg18[%c0_66, %c0_67] : memref<512x128xbf16, #tpu.memory_space<vmem>>, vector<512x128xbf16>
    %cst_68 = arith.constant dense<0.000000e+00> : vector<64x128xf32>
    %153 = tpu.matmul %151, %152, %cst_68 {dimension_numbers = #tpu.dot_dimension_numbers<[1], [0], [0], [1], [0, 0, 1, 1], [], []>} : vector<64x512xbf16>, vector<512x128xbf16>, vector<64x128xf32> -> vector<64x128xf32>
    %c0_69 = arith.constant 0 : index
    %c0_70 = arith.constant 0 : index
    %154 = vector.load %arg19[%c0_69, %c0_70] : memref<1x128xf32, #tpu.memory_space<vmem>>, vector<1x128xf32>
    %155 = vector.broadcast %154 : vector<1x128xf32> to vector<64x128xf32>
    %156 = arith.addf %153, %155 : vector<64x128xf32>
    %157 = arith.addf %156, %118 : vector<64x128xf32>
    %c0_71 = arith.constant 0 : index
    %c0_72 = arith.constant 0 : index
    %c0_73 = arith.constant 0 : index
    %158 = vector.load %arg20[%c0_71, %c0_72, %c0_73] : memref<1x64x128xf32, #tpu.memory_space<vmem>>, vector<1x64x128xf32>
    %159 = vector.shape_cast %158 : vector<1x64x128xf32> to vector<64x128xf32>
    %160 = vector.shape_cast %157 : vector<64x128xf32> to vector<1x64x128xf32>
    tpu.vector_store %arg20[%c0_71, %c0_72, %c0_73], %160 {strides = array<i32>} : memref<1x64x128xf32, #tpu.memory_space<vmem>>, vector<1x64x128xf32>,
    return
  }
  func.func @transform_0(%arg0: i32, %arg1: i32) -> (i32, i32, i32) {
    %c0_i32 = arith.constant 0 : i32
    %c0_i32_0 = arith.constant 0 : i32
    %c0_i32_1 = arith.constant 0 : i32
    return %arg0, %c0_i32, %c0_i32_0 : i32, i32, i32
  }
  func.func @transform_1(%arg0: i32, %arg1: i32) -> (i32, i32) {
    %c0_i32 = arith.constant 0 : i32
    %c0_i32_0 = arith.constant 0 : i32
    return %arg1, %c0_i32 : i32, i32
  }
  func.func @transform_2(%arg0: i32, %arg1: i32) -> (i32, i32) {
    %c0_i32 = arith.constant 0 : i32
    %c0_i32_0 = arith.constant 0 : i32
    %c0_i32_1 = arith.constant 0 : i32
    return %c0_i32, %c0_i32_0 : i32, i32
  }
  func.func @transform_3(%arg0: i32, %arg1: i32) -> (i32, i32) {
    %c0_i32 = arith.constant 0 : i32
    %c0_i32_0 = arith.constant 0 : i32
    %c0_i32_1 = arith.constant 0 : i32
    return %c0_i32, %c0_i32_0 : i32, i32
  }
  func.func @transform_4(%arg0: i32, %arg1: i32) -> (i32, i32) {
    %c0_i32 = arith.constant 0 : i32
    %c0_i32_0 = arith.constant 0 : i32
    %c0_i32_1 = arith.constant 0 : i32
    return %c0_i32, %c0_i32_0 : i32, i32
  }
  func.func @transform_5(%arg0: i32, %arg1: i32) -> (i32, i32) {
    %c0_i32 = arith.constant 0 : i32
    %c0_i32_0 = arith.constant 0 : i32
    %c0_i32_1 = arith.constant 0 : i32
    return %c0_i32, %c0_i32_0 : i32, i32
  }
  func.func @transform_6(%arg0: i32, %arg1: i32) -> (i32, i32) {
    %c0_i32 = arith.constant 0 : i32
    %c0_i32_0 = arith.constant 0 : i32
    %c0_i32_1 = arith.constant 0 : i32
    return %c0_i32, %c0_i32_0 : i32, i32
  }
  func.func @transform_7(%arg0: i32, %arg1: i32) -> (i32, i32) {
    %c0_i32 = arith.constant 0 : i32
    %c0_i32_0 = arith.constant 0 : i32
    %c0_i32_1 = arith.constant 0 : i32
    return %c0_i32, %c0_i32_0 : i32, i32
  }
  func.func @transform_8(%arg0: i32, %arg1: i32) -> (i32, i32) {
    %c0_i32 = arith.constant 0 : i32
    %c0_i32_0 = arith.constant 0 : i32
    %c0_i32_1 = arith.constant 0 : i32
    return %c0_i32, %c0_i32_0 : i32, i32
  }
  func.func @transform_9(%arg0: i32, %arg1: i32) -> (i32, i32) {
    %c0_i32 = arith.constant 0 : i32
    %c0_i32_0 = arith.constant 0 : i32
    %c0_i32_1 = arith.constant 0 : i32
    return %c0_i32, %c0_i32_0 : i32, i32
  }
  func.func @transform_10(%arg0: i32, %arg1: i32) -> (i32, i32) {
    %c0_i32 = arith.constant 0 : i32
    %c0_i32_0 = arith.constant 0 : i32
    %c0_i32_1 = arith.constant 0 : i32
    return %c0_i32, %c0_i32_0 : i32, i32
  }
  func.func @transform_11(%arg0: i32, %arg1: i32) -> (i32, i32) {
    %c0_i32 = arith.constant 0 : i32
    %c0_i32_0 = arith.constant 0 : i32
    %c0_i32_1 = arith.constant 0 : i32
    return %c0_i32, %c0_i32_0 : i32, i32
  }
  func.func @transform_12(%arg0: i32, %arg1: i32) -> (i32, i32) {
    %c0_i32 = arith.constant 0 : i32
    %c0_i32_0 = arith.constant 0 : i32
    %c0_i32_1 = arith.constant 0 : i32
    return %c0_i32, %c0_i32_0 : i32, i32
  }
  func.func @transform_13(%arg0: i32, %arg1: i32) -> (i32, i32) {
    %c0_i32 = arith.constant 0 : i32
    %c0_i32_0 = arith.constant 0 : i32
    %c0_i32_1 = arith.constant 0 : i32
    return %c0_i32, %c0_i32_0 : i32, i32
  }
  func.func @transform_14(%arg0: i32, %arg1: i32) -> (i32, i32) {
    %c0_i32 = arith.constant 0 : i32
    %c0_i32_0 = arith.constant 0 : i32
    %c0_i32_1 = arith.constant 0 : i32
    return %c0_i32, %c0_i32_0 : i32, i32
  }
  func.func @transform_15(%arg0: i32, %arg1: i32) -> (i32, i32) {
    %c0_i32 = arith.constant 0 : i32
    %c0_i32_0 = arith.constant 0 : i32
    %c0_i32_1 = arith.constant 0 : i32
    return %c0_i32, %c0_i32_0 : i32, i32
  }
  func.func @transform_16(%arg0: i32, %arg1: i32) -> (i32, i32) {
    %c0_i32 = arith.constant 0 : i32
    %c0_i32_0 = arith.constant 0 : i32
    %c0_i32_1 = arith.constant 0 : i32
    return %c0_i32, %c0_i32_0 : i32, i32
  }
  func.func @transform_17(%arg0: i32, %arg1: i32) -> (i32, i32) {
    %c0_i32 = arith.constant 0 : i32
    %c0_i32_0 = arith.constant 0 : i32
    %c0_i32_1 = arith.constant 0 : i32
    return %c0_i32, %c0_i32_0 : i32, i32
  }
  func.func @transform_18(%arg0: i32, %arg1: i32) -> (i32, i32, i32) {
    %c0_i32 = arith.constant 0 : i32
    %c0_i32_0 = arith.constant 0 : i32
    return %arg0, %arg1, %c0_i32 : i32, i32, i32
  }
}

</mosaic_0001>

<bundles_post_ra>
// kernel: tpu_custom_call.1
= control target key start
LH: loop header
LB: loop body
LE: loop exit
PB: predicated region body
PF: predicated region fallthrough
CT: control target
= control target key end

     0   :  { %s7713_s0 = inlined_call_operand.hbm [shape: f32[2,128,128], index: 0, kind: input, shape index: {}]   ;;  %s7714_s1 = inlined_call_operand.hbm [shape: f32[128,128], index: 1, kind: input, shape index: {}]   ;;  %s7715_s2 = inlined_call_operand.vmem [shape: f32[1,128], index: 2, kind: input, shape index: {}]   ;;  %s7716_s3 = inlined_call_operand.vmem [shape: f32[1,128], index: 3, kind: input, shape index: {}]   ;;  %s7717_s4 = inlined_call_operand.hbm [shape: bf16[128,128], index: 4, kind: input, shape index: {}]   ;;  %s7718_s5 = inlined_call_operand.vmem [shape: f32[1,128], index: 5, kind: input, shape index: {}]   ;;  %s7719_s6 = inlined_call_operand.hbm [shape: bf16[128,128], index: 6, kind: input, shape index: {}]   ;;  %s7720_s7 = inlined_call_operand.vmem [shape: f32[1,128], index: 7, kind: input, shape index: {}]   ;;  %s7721_s8 = inlined_call_operand.hbm [shape: bf16[128,128], index: 8, kind: input, shape index: {}]   ;;  %s7722_s9 = inlined_call_operand.vmem [shape: f32[1,128], index: 9, kind: input, shape index: {}]   ;;  %s7723_s10 = inlined_call_operand.hbm [shape: bf16[128,128], index: 10, kind: input, shape index: {}]   ;;  %s7724_s11 = inlined_call_operand.vmem [shape: f32[1,128], index: 11, kind: input, shape index: {}]   ;;  %s7725_s12 = inlined_call_operand.vmem [shape: f32[1,128], index: 12, kind: input, shape index: {}]   ;;  %s7726_s13 = inlined_call_operand.vmem [shape: f32[1,128], index: 13, kind: input, shape index: {}]   ;;  %s7727_s14 = inlined_call_operand.hbm [shape: bf16[128,512], index: 14, kind: input, shape index: {}]   ;;  %s7728_s15 = inlined_call_operand.vmem [shape: f32[1,512], index: 15, kind: input, shape index: {}]   ;;  %s7729_s16 = inlined_call_operand.hbm [shape: bf16[512,128], index: 16, kind: input, shape index: {}]   ;;  %s7730_s17 = inlined_call_operand.vmem [shape: f32[1,128], index: 17, kind: input, shape index: {}]   ;;  %s7731_s18 = inlined_call_operand.hbm [shape: f32[2,128,128], index: 18, kind: output, shape index: {}]  }
   0x1   :  { %7742 = sst [smem:[#allocation38_spill]] %s7713_s0 }
   0x2   :  { %7743 = sst [smem:[#allocation39_spill]] %s7714_s1 }
   0x3   :  { %7744 = sst [smem:[#allocation40_spill]] %s7715_s2 }
   0x4   :  { %7745 = sst [smem:[#allocation41_spill]] %s7716_s3 }
   0x5   :  { %7746 = sst [smem:[#allocation42_spill]] %s7717_s4 }
   0x6   :  { %7747 = sst [smem:[#allocation43_spill]] %s7718_s5 }
   0x7   :  { %7748 = sst [smem:[#allocation44_spill]] %s7719_s6 }
   0x8   :  { %7749 = sst [smem:[#allocation45_spill]] %s7720_s7 }
   0x9   :  { %7750 = sst [smem:[#allocation46_spill]] %s7721_s8 }
   0xa   :  { %7751 = sst [smem:[#allocation47_spill]] %s7722_s9 }
   0xb   :  { %7752 = sst [smem:[#allocation48_spill]] %s7723_s10 }
   0xc   :  { %7753 = sst [smem:[#allocation49_spill]] %s7724_s11 }
   0xd   :  { %7754 = sst [smem:[#allocation50_spill]] %s7725_s12 }
   0xe   :  { %7755 = sst [smem:[#allocation51_spill]] %s7726_s13 }
   0xf   :  { %7756 = sst [smem:[#allocation52_spill]] %s7727_s14 }
  0x10   :  { %7757 = sst [smem:[#allocation53_spill]] %s7728_s15 }
  0x11   :  { %7758 = sst [smem:[#allocation54_spill]] %s7729_s16 }
  0x12   :  { %7759 = sst [smem:[#allocation55_spill]] %s7730_s17 }
  0x13   :  { %7760 = sst [smem:[#allocation56_spill]] %s7731_s18 }
  0x14   :  { %23 = vsyncpa [#allocation5], 0 }
  0x15   :  { %25 = vsyncpa [#allocation5 + $0x1], 0 }
  0x16   :  { %26 = vsyncpa [#allocation8], 0 }
  0x17   :  { %28 = vsyncpa [#allocation8 + $0x1], 0 }
  0x18   :  { %29 = vsyncpa [#allocation11], 0 }
  0x19   :  { %30 = vsyncpa [#allocation14], 0 }
  0x1a   :  { %31 = vsyncpa [#allocation17], 0 }
  0x1b   :  { %32 = vsyncpa [#allocation6], 0 }
  0x1c   :  { %34 = vsyncpa [#allocation6 + $0x1], 0  ;;  %s6286_s27 = smov 0   ;;  %s6288_s28 = smov 0  }
  0x1d   :  { %s6290_s29 = smov 0   ;;  %s6292_s30 = smov 0  }
  0x1e   :  { %s6294_s0 = smov 0   ;;  %s6296_s19 = smov 0  }
  0x1f   :  { %s6298_s1 = smov 0   ;;  %s6300_s20 = smov 0  }
  0x20   :  { %s6302_s21 = smov 0   ;;  %s6304_s22 = smov 0  }
  0x21   :  { %s6306_s2 = smov 0   ;;  %s6308_s23 = smov 0  }
  0x22   :  { %s6310_s24 = smov 0   ;;  %s6312_s25 = smov 0  }
  0x23 LB: > { %7761 = sst [smem:[#allocation26_spill]] %s6152_s22  ;;  %s6357_s26 = sadd.s32 4294967295, %s6168_s25   ;;  %s6168_s25 = sphi %s6312_s25, %s40_s25   ;;  %s6164_s24 = sphi %s6310_s24, %s7832_s24   ;;  %s6160_s23 = sphi %s6308_s23, %s7844_s23   ;;  %s6156_s2 = sphi %s6306_s2, %s7830_s2   ;;  %s6152_s22 = sphi %s6304_s22, %s7843_s22   ;;  %s6148_s21 = sphi %s6302_s21, %s7842_s21   ;;  %s6144_s20 = sphi %s6300_s20, %s7841_s20   ;;  %s6140_s1 = sphi %s6298_s1, %s7840_s1   ;;  %s6136_s19 = sphi %s6296_s19, %s7839_s19   ;;  %s6132_s0 = sphi %s6294_s0, %s7838_s0   ;;  %s6128_s30 = sphi %s6292_s30, %s7837_s30   ;;  %s6124_s29 = sphi %s6290_s29, %s7836_s29   ;;  %s6120_s28 = sphi %s6288_s28, %s7835_s28   ;;  %s6116_s27 = sphi %s6286_s27, %s7834_s27  }
  0x24   : > { %7762 = sst [smem:[#allocation27_spill]] %s6156_s2  ;;  %p4359_p0 = scmp.ge.s32.totalorder %s6168_s25, 1 }
  0x25   : > { %7763 = sst [smem:[#allocation28_spill]] %s6164_s24  ;;  %p7740_p1 = scmp.eq.s32.totalorder %s6357_s26, 0 }
  0x26   : > { %p473_p2 = scmp.lt.s32.totalorder %s6168_s25, 5  ;;  %s6170_s2 = smov [#allocation9]  }
  0x27   : > { %s491_s17 = sshll.u32 %s6170_s2, 4  ;;  %s6171_s13 = smov [#allocation10]   ;;  %s492_s17 = int_to_ptr.vmem [resolvable:$true] %s491_s17 }
  0x28   : > { %p6362_p3 = pnand %p4359_p0, %p473_p2  ;;  %s507_s12 = sshll.u32 %s6171_s13, 4  ;;  %s508_s12 = int_to_ptr.vmem [resolvable:$true] %s507_s12 }
  0x29   : > { %s6172_s11 = smov [#allocation13]   ;;  %s5803_s2 = scalar_lea.vmem %s492_s17, 1024 }
  0x2a   : > { %s7764_s18 = scalar_select %p6362_p3, 1, 0 }
  0x2b   : > { %p5288_p4 = pneg %p6362_p3  ;;  %s539_s5 = sshll.u32 %s6172_s11, 4  ;;  %s540_s5 = int_to_ptr.vmem [resolvable:$true] %s539_s5 }
  0x2c   : > { %7765 = sst [smem:[#allocation29_spill]] %s7764_s18  ;;  %p5804_p7 = scmp.ne.s32.totalorder %s492_s17, %s5803_s2 }
  0x2d   : > { %p6370_p5 = pnand %p5288_p4, %p7740_p1  ;;  %p5811_p10 = scmp.lt.s32.totalorder %s492_s17, %s492_s17 }
  0x2e   : > { %p5812_p11 = scmp.lt.s32.totalorder %s5803_s2, %s5803_s2 }
  0x2f   : > { %p6376_p6 = pneg %p6370_p5 }
  0x30   : > { %p5813_p12 = por %p5812_p11, %p5811_p10 }
  0x31   : > { %p5806_p8 = pnand %p5804_p7, %p6376_p6 }
  0x33   : > { %p5807_p9 = pneg %p5806_p8 }
  0x35   : > { %p5814_p13 = pnand %p5813_p12, %p5807_p9 }
  0x37   : > { %5817 = shalt.err (!%p5814_p13)
}
  0x38   : > { %s6173_s13 = smov 64   ;;  %s6174_s11 = smov 4  }
  0x39   : > { %s7768_s4 = sld [smem:[#allocation42_spill]]  ;;  %s5829_s22 = scalar_lea.vmem %s508_s12, 1024 }
  0x3a   : > { %p5830_p0 = scmp.ne.s32.totalorder %s508_s12, %s5829_s22  ;;  %p5837_p7 = scmp.lt.s32.totalorder %s508_s12, %s508_s12 }
  0x3b   : > { %p5838_p8 = scmp.lt.s32.totalorder %s5829_s22, %s5829_s22 }
  0x3c   : > { %p5832_p2 = pnand %p5830_p0, %p6376_p6 }
  0x3d   : > { %p5839_p9 = por %p5838_p8, %p5837_p7 }
  0x3e   : > { %p5833_p4 = pneg %p5832_p2 }
  0x3f   : > { %5291 = dma.hbm_to_vmem [thread:$0]  (!%p6370_p5), %s7768_s4, 1024, %s492_s17, [#allocation8], %s6173_s13, %s6173_s13, %s6174_s11  }
  0x40   : > { %p5840_p10 = pnand %p5839_p9, %p5833_p4 }
  0x42   : > { %5843 = shalt.err (!%p5840_p10)
}
  0x43   : > { %s7769_s6 = sld [smem:[#allocation44_spill]]  ;;  %s5855_s3 = scalar_lea.vmem %s540_s5, 1024 }
  0x44   : > { %p5856_p11 = scmp.ne.s32.totalorder %s540_s5, %s5855_s3  ;;  %p5863_p0 = scmp.lt.s32.totalorder %s540_s5, %s540_s5 }
  0x45   : > { %p5864_p2 = scmp.lt.s32.totalorder %s5855_s3, %s5855_s3 }
  0x46   : > { %p5858_p12 = pnand %p5856_p11, %p6376_p6 }
  0x47   : > { %p5865_p4 = por %p5864_p2, %p5863_p0 }
  0x48   : > { %p5859_p13 = pneg %p5858_p12 }
  0x49   : > { %5294 = dma.hbm_to_vmem [thread:$0]  (!%p6370_p5), %s7769_s6, 1024, %s508_s12, [#allocation11], %s6173_s13, %s6173_s13, %s6174_s11  }
  0x4a   : > { %p5866_p7 = pnand %p5865_p4, %p5859_p13 }
  0x4c   : > { %5869 = shalt.err (!%p5866_p7)
}
  0x4d   : > { %s7770_s10 = sld [smem:[#allocation48_spill]]  ;;  %s6175_s12 = smov [#allocation12]  }
  0x4e   : > { %s523_s18 = sshll.u32 %s6175_s12, 4  ;;  %s6176_s22 = smov [#allocation15]   ;;  %s524_s18 = int_to_ptr.vmem [resolvable:$true] %s523_s18 }
  0x4f   : > { %s561_s2 = sshll.u32 %s6176_s22, 4  ;;  %s5881_s4 = scalar_lea.vmem %s524_s18, 1024  ;;  %s562_s2 = int_to_ptr.vmem [resolvable:$true] %s561_s2 }
  0x50   : > { %p5882_p8 = scmp.ne.s32.totalorder %s524_s18, %s5881_s4  ;;  %p5889_p11 = scmp.lt.s32.totalorder %s524_s18, %s524_s18 }
  0x51   : > { %p5890_p12 = scmp.lt.s32.totalorder %s5881_s4, %s5881_s4 }
  0x52   : > { %p5884_p9 = pnand %p5882_p8, %p6376_p6 }
  0x53   : > { %5300 = dma.hbm_to_vmem [thread:$0]  (!%p6370_p5), %s7770_s10, 1024, %s540_s5, [#allocation14], %s6173_s13, %s6173_s13, %s6174_s11  }
  0x54   : > { %p5885_p10 = pneg %p5884_p9  ;;  %p5891_p13 = por %p5890_p12, %p5889_p11 }
  0x56   : > { %p5892_p0 = pnand %p5891_p13, %p5885_p10 }
  0x58   : > { %5895 = shalt.err (!%p5892_p0)
}
  0x59   : > { %s7771_s8 = sld [smem:[#allocation46_spill]]  ;;  %s5907_s7 = scalar_lea.vmem %s562_s2, 4096 }
  0x5a   : > { %p5908_p2 = scmp.ne.s32.totalorder %s562_s2, %s5907_s7  ;;  %p5915_p8 = scmp.lt.s32.totalorder %s562_s2, %s562_s2 }
  0x5b   : > { %p5916_p9 = scmp.lt.s32.totalorder %s5907_s7, %s5907_s7 }
  0x5c   : > { %p5910_p4 = pnand %p5908_p2, %p6376_p6 }
  0x5d   : > { %p5917_p10 = por %p5916_p9, %p5915_p8 }
  0x5e   : > { %p5911_p7 = pneg %p5910_p4 }
  0x5f   : > { %5297 = dma.hbm_to_vmem [thread:$0]  (!%p6370_p5), %s7771_s8, 1024, %s524_s18, [#allocation11], %s6173_s13, %s6173_s13, %s6174_s11  }
  0x60   : > { %p5918_p11 = pnand %p5917_p10, %p5911_p7 }
  0x62   : > { %5921 = shalt.err (!%p5918_p11)
}
  0x63   : > { %s6177_s4 = smov 256   ;;  %s6178_s17 = smov 16  }
  0x64   : > { %s7772_s14 = sld [smem:[#allocation52_spill]]  ;;  %s6179_s18 = smov [#allocation16]  }
  0x65   : > { %s577_s5 = sshll.u32 %s6179_s18, 4  ;;  %s578_s5 = int_to_ptr.vmem [resolvable:$true] %s577_s5 }
  0x66   : > { %s5933_s3 = scalar_lea.vmem %s578_s5, 4096  ;;  %p5941_p2 = scmp.lt.s32.totalorder %s578_s5, %s578_s5 }
  0x67   : > { %p5934_p12 = scmp.ne.s32.totalorder %s578_s5, %s5933_s3  ;;  %p5942_p4 = scmp.lt.s32.totalorder %s5933_s3, %s5933_s3 }
  0x69   : > { %p5936_p13 = pnand %p5934_p12, %p6376_p6  ;;  %p5943_p7 = por %p5942_p4, %p5941_p2 }
  0x6a   : > { %5303 = dma.hbm_to_vmem [thread:$0]  (!%p6370_p5), %s7772_s14, 4096, %s562_s2, [#allocation14], %s6177_s4, %s6177_s4, %s6178_s17  }
  0x6b   : > { %p5937_p0 = pneg %p5936_p13 }
  0x6d   : > { %p5944_p8 = pnand %p5943_p7, %p5937_p0 }
  0x6f   : > { %5947 = shalt.err (!%p5944_p8)
}
  0x70   : > { %s7773_s16 = sld [smem:[#allocation54_spill]]  ;;  %p66_p6 = scmp.ne.s32.totalorder %s6148_s21, %s6144_s20 }
  0x71   : > { %p67_p9 = scmp.eq.s32.totalorder %s6168_s25, 0  ;;  %p72_p10 = scmp.ne.s32.totalorder %s6144_s20, %s6140_s1 }
  0x72   : > { %p5324_p11 = scmp.lt.s32.totalorder %s6168_s25, 4  ;;  %s594_s4 = sand.u32 1, %s6148_s21  }
  0x73   : > { %p68_p12 = por %p67_p9, %p66_p6  ;;  %p6450_p13 = por %p7740_p1, %p72_p10 }
  0x74   : > { %s4367_s12 = sshll.u32 %s594_s4, 7  ;;  %s4562_s22 = sshll.u32 %s6164_s24, 11 }
  0x75   : > { %s7775_s7 = sld [smem:[#allocation38_spill]]  ;;  %s595_s2 = scalar_lea.sflag [#allocation5], %s594_s4 }
  0x76   : > { %5306 = dma.hbm_to_vmem [thread:$0]  (!%p6370_p5), %s7773_s16, 4096, %s578_s5, [#allocation17], %s6173_s13, %s6173_s13, %s6174_s11  }
  0x77   : > { %s598_s11 = scalar_lea.vmem [#allocation4], %s4367_s12  ;;  %p6460_p5 = pnand %p5324_p11, %p68_p12 }
  0x78   : > { %s605_s5 = sshll.u32 %s598_s11, 4  ;;  %s6180_s9 = smov [#allocation4]   ;;  %s606_s5 = int_to_ptr.vmem [resolvable:$true] %s605_s5 }
  0x79   : > { %p5950_p0 = pneg %p6460_p5  ;;  %s5961_s15 = scalar_lea.vmem %s606_s5, 2048 }
  0x7a   : > { %p5962_p2 = scmp.ne.s32.totalorder %s606_s5, %s5961_s15  ;;  %s5966_s6 = sshll.u32 %s6180_s9, 4  ;;  %s5967_s6 = int_to_ptr.vmem [resolvable:$false] %s5966_s6 }
  0x7b   : > { %s604_s13 = scalar_lea.hbm %s7775_s7, %s4562_s22  ;;  %s5968_s22 = scalar_lea.vmem %s5967_s6, 4096 }
  0x7c   : > { %p5964_p4 = pnand %p5962_p2, %p5950_p0  ;;  %p5969_p8 = scmp.lt.s32.totalorder %s606_s5, %s5967_s6 }
  0x7d   : > { %p5970_p6 = scmp.lt.s32.totalorder %s5968_s22, %s5961_s15 }
  0x7e   : > { %p5965_p7 = pneg %p5964_p4 }
  0x7f   : > { %p5971_p10 = por %p5970_p6, %p5969_p8 }
  0x81   : > { %p5972_p12 = pnand %p5971_p10, %p5965_p7 }
  0x83   : > { %5975 = shalt.err (!%p5972_p12)
}
  0x84   : > { %s7735_s12 = smov 128   ;;  %s7736_s6 = smov 8  }
  0x85   : > { %5310 = dma.hbm_to_vmem [thread:$0]  (!%p6460_p5), %s604_s13, 2048, %s606_s5, %s595_s2, %s7735_s12, %s7735_s12, %s7736_s6  }
  0x86   : > { %s4358_s9 = sadd.s32 4294967294, %s6168_s25   ;;  %s49_s15 = sadd.s32 1, %s6160_s23 }
  0x87   : > { %p50_p0 = scmp.ge.s32.totalorder %s49_s15, 2  ;;  %s85_s4 = sadd.s32 1, %s6136_s19 }
  0x88   : > { %p92_p2 = scmp.ne.s32.totalorder %s6136_s19, %s6132_s0  ;;  %p98_p4 = scmp.ne.s32.totalorder %s6132_s0, %s6128_s30 }
  0x89   : > { %s7846_s15 = smov (%p50_p0, %s49_s15), 0  ;;  %s7778_s18 = sadd.s32 1, %s6164_s24 }
  0x8a   : > { %7777 = sst [smem:[#allocation30_spill]] %s7846_s15  ;;  %s7848_s18 = smov (!%p50_p0, %s7778_s18), %s6164_s24 }
  0x8b   : > { %s82_s3 = ssub.s32 %s6160_s23, %s7846_s15  ;;  %p6487_p5 = por %p92_p2, %p67_p9 }
  0x8c   : > { %p54_p7 = scmp.ge.s32.totalorder %s7848_s18, 2  ;;  %p83_p8 = scmp.eq.s32.totalorder %s82_s3, 0 }
  0x8d   : > { %p6493_p6 = por %p98_p4, %p7740_p1  ;;  %s449_s13 = sadd.s32 1, %s6124_s29 }
  0x8e   : > { %s7850_s18 = smov (%p54_p7, %s7848_s18), 0  ;;  %p459_p9 = scmp.ne.s32.totalorder %s6124_s29, %s6120_s28 }
  0x8f   : > { %7781 = sst [smem:[#allocation31_spill]] %s7850_s18  ;;  %s56_s5 = ssub.s32 %s6164_s24, %s7850_s18 }
  0x90   : > { %s6501_s11 = scalar_select %p83_p8, %s6136_s19, %s85_s4  }
  0x91   : > { %p57_p10 = scmp.eq.s32.totalorder %s56_s5, 0  ;;  %s446_s1 = sor.u32 %s82_s3, %s56_s5 }
  0x92   : > { %p447_p12 = scmp.eq.s32.totalorder %s446_s1, 0  ;;  %p460_p0 = scmp.eq.s32.totalorder %s6357_s26, 3 }
  0x93   : > { %s7782_s2 = sadd.s32 1, %s6148_s21  ;;  %p465_p4 = scmp.ne.s32.totalorder %s6120_s28, %s6116_s27 }
  0x94   : > { %s6511_s22 = scalar_select %p57_p10, %s6148_s21, %s7782_s2  }
  0x95   : > { %s6514_s12 = scalar_select %p447_p12, %s6124_s29, %s449_s13  }
  0x96   : > { %p6516_p2 = por %p460_p0, %p459_p9  ;;  %p466_p7 = scmp.eq.s32.totalorder %s4358_s9, 3 }
  0x97   : > { %s615_s4 = sand.u32 1, %s6168_s25   ;;  %s617_s8 = sand.u32 1, %s6136_s19  }
  0x98   : > { %s7783_s6 = scalar_select %p6516_p2, 1, 0 }
  0x99   : > { %p6524_p8 = por %p466_p7, %p465_p4  ;;  %s4370_s3 = sshll.u32 %s617_s8, 6 }
  0x9a   : > { %s4563_s5 = sshll.u32 %s6160_s23, 10  ;;  %s7785_s2 = sld [smem:[#allocation39_spill]] }
  0x9b   : > { %s7784_s10 = scalar_select %p6524_p8, 1, 0 }
  0x9c   : > { %s619_s13 = scalar_lea.vmem [#allocation7], %s4370_s3  ;;  %p6536_p9 = pnand %p5324_p11, %p6487_p5 }
  0x9d   : > { %s626_s18 = sshll.u32 %s619_s13, 4  ;;  %s616_s9 = scalar_lea.sflag [#allocation8], %s615_s4  ;;  %s627_s18 = int_to_ptr.vmem [resolvable:$true] %s626_s18 }
  0x9e   : > { %p5978_p10 = pneg %p6536_p9  ;;  %s5989_s24 = scalar_lea.vmem %s627_s18, 1024 }
  0x9f   : > { %p5990_p12 = scmp.ne.s32.totalorder %s627_s18, %s5989_s24  ;;  %s6183_s8 = smov [#allocation7]  }
  0xa0   : > { %s625_s16 = scalar_lea.hbm %s7785_s2, %s4563_s5  ;;  %s5994_s14 = sshll.u32 %s6183_s8, 4  ;;  %s5995_s14 = int_to_ptr.vmem [resolvable:$false] %s5994_s14 }
  0xa1   : > { %p5992_p0 = pnand %p5990_p12, %p5978_p10  ;;  %s5996_s3 = scalar_lea.vmem %s5995_s14, 2048 }
  0xa2   : > { %p5997_p7 = scmp.lt.s32.totalorder %s627_s18, %s5995_s14  ;;  %p5998_p1 = scmp.lt.s32.totalorder %s5996_s3, %s5989_s24 }
  0xa3   : > { %p5993_p4 = pneg %p5992_p0 }
  0xa4   : > { %p5999_p8 = por %p5998_p1, %p5997_p7 }
  0xa6   : > { %p6000_p2 = pnand %p5999_p8, %p5993_p4 }
  0xa8   : > { %6003 = shalt.err (!%p6000_p2)
}
  0xa9   : > { %s7787_s7 = smov 8   ;;  %s7788_s5 = smov 128  }
  0xaa   : > { %5313 = dma.hbm_to_vmem [thread:$0]  (!%p6536_p9), %s625_s16, 1024, %s627_s18, %s616_s9, %s7788_s5, %s7788_s5, %s7787_s7  }
  0xab   : > { %638 = sbr.rel (%p6362_p3) target bundleno = 4271 (0x10af), region = 92 }
  0xb0   : > { %s640_s1 = sand.u32 1, %s6144_s20  }
  0xb1   : > { %s4374_s2 = sshll.u32 %s640_s1, 7  ;;  %s641_s13 = scalar_lea.sflag [#allocation5], %s640_s1 }
  0xb2   : > { %s6550_s8 = scalar_lea.vmem [#allocation4], %s4374_s2 }
  0xb3   : > { %6087 = dma.done.wait (%p6450_p13), %s641_s13, 2048  }
  0xb4   : > { %6089 = vsyncadd (%p6450_p13), %s641_s13, 4294965248  ;;  %s649_s24 = sand.u32 1, %s6357_s26   ;;  %s651_s16 = sand.u32 1, %s6132_s0  }
  0xb5   : > { %s4375_s15 = sshll.u32 %s651_s16, 6  ;;  %s650_s18 = scalar_lea.sflag [#allocation8], %s649_s24 }
  0xb6   : > { %s6558_s9 = scalar_lea.vmem [#allocation7], %s4375_s15 }
  0xb7   : > { %6091 = dma.done.wait (%p6493_p6), %s650_s18, 1024  }
  0xb8   : > { %6093 = vsyncadd (%p6493_p6), %s650_s18, 4294966272  ;;  %p7790_p1 = scmp.eq.s32.totalorder %s6357_s26, 0 }
  0xba   : > { %6095 = dma.done.wait (%p7790_p1), [#allocation8], 1024   ;;  %p7791_p3 = pmov %p7790_p1 }
  0xbb   : > { %p7792_p11 = pmov %p7790_p1 }
  0xbc   : > { %6097 = vsyncadd (%p7791_p3), [#allocation8], 4294966272 }
  0xbd   : > { %6099 = dma.done.wait (%p7792_p11), [#allocation11], 2048   ;;  %p7793_p13 = pmov %p7790_p1 }
  0xbe   : > { %p7794_p5 = pmov %p7790_p1 }
  0xbf   : > { %6101 = vsyncadd (%p7793_p13), [#allocation11], 4294965248 }
  0xc0   : > { %6103 = dma.done.wait (%p7794_p5), [#allocation14], 5120   ;;  %p7795_p2 = pmov %p7790_p1 }
  0xc1   : > { %p7796_p6 = pmov %p7790_p1 }
  0xc2   : > { %6105 = vsyncadd (%p7795_p2), [#allocation14], 4294962176 }
  0xc3   : > { %6107 = dma.done.wait (%p7796_p6), [#allocation17], 4096   ;;  %p7797_p8 = pmov %p7790_p1 }
  0xc4   : > { %s732_s17 = sand.u32 1, %s6120_s28   ;;  %s7798_s3 = sld [smem:[#allocation26_spill]] }
  0xc5   : > { %6109 = vsyncadd (%p7797_p8), [#allocation17], 4294963200  ;;  %s4382_s30 = sshll.u32 %s732_s17, 6 }
  0xc6   : > { %s6583_s14 = scalar_lea.vmem [#allocation18], %s4382_s30 }
  0xca   : > { %p4383_p9 = scmp.ne.s32.totalorder %s7798_s3, 0 }
  0xcb   : > { %s7799_s5 = sld [smem:[#allocation40_spill]] (!%p4383_p9) }
  0xcc   : > { %741 = sbr.rel (%p4383_p9) target bundleno = 755 (0x2f3), region = 128  ;;  %s7800_s2 = sld [smem:[#allocation41_spill]] (!%p4383_p9) }
  0xcd   : > { %s7801_s16 = sld [smem:[#allocation45_spill]] (!%p4383_p9) }
  0xce   : > { %s7802_s30 = sld [smem:[#allocation47_spill]] (!%p4383_p9) }
  0xd1   : > { %v742_v0 = vld [vmem:[%s6550_s8] sm:$0xff]  ;;  %v744_v1 = vld [vmem:[%s6550_s8 + $0x10] sm:$0xff]  ;;  %v743_v2 = vld [vmem:[%s6550_s8 + $0x8] sm:$0xff] }
  0xd2   : > { %760 = vadd.xlane.f32.xlu0 %v742_v0  ;;  %764 = vadd.xlane.f32.xlu1 %v744_v1  ;;  %v745_v3 = vld [vmem:[%s6550_s8 + $0x18] sm:$0xff]  ;;  %v746_v4 = vld [vmem:[%s6550_s8 + $0x20] sm:$0xff]  ;;  %v747_v5 = vld [vmem:[%s6550_s8 + $0x28] sm:$0xff] }
  0xd3   : > { %v748_v6 = vld [vmem:[%s6550_s8 + $0x30] sm:$0xff]  ;;  %v749_v7 = vld [vmem:[%s6550_s8 + $0x38] sm:$0xff]  ;;  %v750_v8 = vld [vmem:[%s6550_s8 + $0x40] sm:$0xff] }
  0xd4   : > { %v751_v9 = vld [vmem:[%s6550_s8 + $0x48] sm:$0xff]  ;;  %v6597_v10 = vld [vmem:[%s6550_s8 + $0x50] sm:$0xff]  ;;  %v6600_v11 = vld [vmem:[%s6550_s8 + $0x58] sm:$0xff] }
  0xd5   : > { %v6605_v12 = vld [vmem:[%s6550_s8 + $0x60] sm:$0xff]  ;;  %v6608_v13 = vld [vmem:[%s6550_s8 + $0x68] sm:$0xff]  ;;  %v6613_v14 = vld [vmem:[%s6550_s8 + $0x70] sm:$0xff] }
  0xd6   : > { %762 = vadd.xlane.f32.xlu0 %v743_v2  ;;  %766 = vadd.xlane.f32.xlu1 %v745_v3  ;;  %v6616_v15 = vld [vmem:[%s6550_s8 + $0x78] sm:$0xff]  ;;  %v5464_v61 = vld [vmem:[#allocation10 + $0x30] sm:$0xff]  }
  0xd7   : > { %v5462_v51 = vld [vmem:[#allocation10 + $0x38] sm:$0xff]   ;;  %v5465_v62 = vld [vmem:[#allocation12 + $0x30] sm:$0xff]  }
  0xd8   : > { %v5463_v52 = vld [vmem:[#allocation12 + $0x38] sm:$0xff]   ;;  %4922 = vmatprep.subr.bf16.mxu0 %v5462_v51 }
  0xd9   : > { %4954 = vmatprep.subr.bf16.mxu1 %v5463_v52  ;;  %4923 = vmatpush3.bf16.msra.mxu0 %v5462_v51 }
  0xda   : > { %768 = vadd.xlane.f32.xlu0 %v746_v4  ;;  %770 = vadd.xlane.f32.xlu1 %v747_v5 }
  0xdb   : > { %4955 = vmatpush3.bf16.msra.mxu1 %v5463_v52  ;;  %4924 = vmatprep.subr.bf16.mxu0 %v5464_v61 }
  0xdc   : > { %4956 = vmatprep.subr.bf16.mxu1 %v5465_v62 }
  0xdd   : > { %4925 = vmatpush3.bf16.msra.mxu0 %v5464_v61 }
  0xde   : > { %772 = vadd.xlane.f32.xlu0 %v748_v6  ;;  %774 = vadd.xlane.f32.xlu1 %v749_v7 }
  0xdf   : > { %4957 = vmatpush3.bf16.msra.mxu1 %v5465_v62 }
  0xe2   : > { %776 = vadd.xlane.f32.xlu0 %v750_v8  ;;  %778 = vadd.xlane.f32.xlu1 %v751_v9 }
  0xe6   : > { %780 = vadd.xlane.f32.xlu0 %v6597_v10  ;;  %782 = vadd.xlane.f32.xlu1 %v6600_v11 }
  0xea   : > { %784 = vadd.xlane.f32.xlu0 %v6605_v12  ;;  %786 = vadd.xlane.f32.xlu1 %v6608_v13 }
  0xee   : > { %788 = vadd.xlane.f32.xlu0 %v6613_v14  ;;  %790 = vadd.xlane.f32.xlu1 %v6616_v15 }
 0x15b   : > { %v761_v16 = vpop.xlane.xlu0 %760  ;;  %v765_v17 = vpop.xlane.xlu1 %764 }
 0x15c   : > { %v793_v18 = vmul.f32 0.0078125, %v761_v16  ;;  %v795_v19 = vmul.f32 0.0078125, %v765_v17 }
 0x15e   : > { %v6620_v20 = vsub.f32 %v742_v0, %v793_v18  ;;  %v6622_v21 = vsub.f32 %v744_v1, %v795_v19 }
 0x15f   : > { %v763_v22 = vpop.xlane.xlu0 %762  ;;  %v767_v23 = vpop.xlane.xlu1 %766 }
 0x160   : > { %v794_v24 = vmul.f32 0.0078125, %v763_v22  ;;  %v825_v25 = vmul.f32 %v6620_v20, %v6620_v20  ;;  %v796_v26 = vmul.f32 0.0078125, %v767_v23  ;;  %v827_v29 = vmul.f32 %v6622_v21, %v6622_v21  ;;  %v5469_v23 = vld [vmem:[#allocation12 + $0x20] sm:$0xff]  }
 0x162   : > { %v6626_v27 = vsub.f32 %v743_v2, %v794_v24  ;;  %841 = vadd.xlane.f32.xlu0 %v825_v25  ;;  %v6628_v28 = vsub.f32 %v745_v3, %v796_v26 }
 0x163   : > { %v769_v30 = vpop.xlane.xlu0 %768  ;;  %v771_v31 = vpop.xlane.xlu1 %770 }
 0x164   : > { %v797_v32 = vmul.f32 0.0078125, %v769_v30  ;;  %v826_v33 = vmul.f32 %v6626_v27, %v6626_v27  ;;  %v798_v34 = vmul.f32 0.0078125, %v771_v31  ;;  %v828_v37 = vmul.f32 %v6628_v28, %v6628_v28  ;;  %v5471_v30 = vld [vmem:[#allocation12 + $0x18] sm:$0xff]   ;;  %v5473_v31 = vld [vmem:[#allocation12 + $0x10] sm:$0xff]  }
 0x166   : > { %v6634_v35 = vsub.f32 %v746_v4, %v797_v32  ;;  %845 = vadd.xlane.f32.xlu0 %v827_v29  ;;  %843 = vadd.xlane.f32.xlu1 %v826_v33  ;;  %v6636_v36 = vsub.f32 %v747_v5, %v798_v34  ;;  %v5470_v29 = vld [vmem:[#allocation10 + $0x18] sm:$0xff]   ;;  %v5474_v32 = vld [vmem:[#allocation10 + $0x8] sm:$0xff]   ;;  %v5476_v34 = vld [vmem:[#allocation10] sm:$0xff]  }
 0x167   : > { %v773_v38 = vpop.xlane.xlu0 %772  ;;  %v775_v39 = vpop.xlane.xlu1 %774  ;;  %v5475_v33 = vld [vmem:[#allocation12 + $0x8] sm:$0xff]  }
 0x168   : > { %v799_v40 = vmul.f32 0.0078125, %v773_v38  ;;  %v829_v41 = vmul.f32 %v6634_v35, %v6634_v35  ;;  %v800_v42 = vmul.f32 0.0078125, %v775_v39  ;;  %v830_v45 = vmul.f32 %v6636_v36, %v6636_v36 }
 0x16a   : > { %v6642_v43 = vsub.f32 %v748_v6, %v799_v40  ;;  %847 = vadd.xlane.f32.xlu1 %v828_v37  ;;  %849 = vadd.xlane.f32.xlu0 %v829_v41  ;;  %v6644_v44 = vsub.f32 %v749_v7, %v800_v42  ;;  %v5466_v7 = vld [vmem:[#allocation10 + $0x28] sm:$0xff]   ;;  %v5477_v37 = vld [vmem:[#allocation12] sm:$0xff]  }
 0x16b   : > { %v777_v46 = vpop.xlane.xlu0 %776  ;;  %v779_v47 = vpop.xlane.xlu1 %778  ;;  %4926 = vmatprep.subr.bf16.mxu0 %v5466_v7 }
 0x16c   : > { %v801_v48 = vmul.f32 0.0078125, %v777_v46  ;;  %v831_v49 = vmul.f32 %v6642_v43, %v6642_v43  ;;  %v802_v50 = vmul.f32 0.0078125, %v779_v47  ;;  %v832_v55 = vmul.f32 %v6644_v44, %v6644_v44  ;;  %4927 = vmatpush3.bf16.msra.mxu0 %v5466_v7 }
 0x16e   : > { %v6650_v53 = vsub.f32 %v750_v8, %v801_v48  ;;  %851 = vadd.xlane.f32.xlu1 %v830_v45  ;;  %853 = vadd.xlane.f32.xlu0 %v831_v49  ;;  %v6652_v54 = vsub.f32 %v751_v9, %v802_v50  ;;  %v5467_v8 = vld [vmem:[#allocation12 + $0x28] sm:$0xff]  }
 0x16f   : > { %v781_v56 = vpop.xlane.xlu0 %780  ;;  %v783_v57 = vpop.xlane.xlu1 %782  ;;  %4958 = vmatprep.subr.bf16.mxu1 %v5467_v8 }
 0x170   : > { %v803_v58 = vmul.f32 0.0078125, %v781_v56  ;;  %v833_v59 = vmul.f32 %v6650_v53, %v6650_v53  ;;  %v804_v60 = vmul.f32 0.0078125, %v783_v57  ;;  %v834_v1 = vmul.f32 %v6652_v54, %v6652_v54  ;;  %4959 = vmatpush3.bf16.msra.mxu1 %v5467_v8  ;;  %v6693_v8 = vld [vmem:[%s7799_s5] ss:$0 sm:$0xff] }
 0x171   : > { %4960 = vmatprep.subr.bf16.mxu1 %v5469_v23 }
 0x172   : > { %v6659_v63 = vsub.f32 %v6597_v10, %v803_v58  ;;  %855 = vadd.xlane.f32.xlu1 %v832_v55  ;;  %857 = vadd.xlane.f32.xlu0 %v833_v59  ;;  %v6662_v0 = vsub.f32 %v6600_v11, %v804_v60 }
 0x173   : > { %v785_v2 = vpop.xlane.xlu0 %784  ;;  %v787_v3 = vpop.xlane.xlu1 %786 }
 0x174   : > { %v805_v4 = vmul.f32 0.0078125, %v785_v2  ;;  %v835_v5 = vmul.f32 %v6659_v63, %v6659_v63  ;;  %v806_v6 = vmul.f32 0.0078125, %v787_v3  ;;  %v836_v11 = vmul.f32 %v6662_v0, %v6662_v0  ;;  %4961 = vmatpush3.bf16.msra.mxu1 %v5469_v23 }
 0x175   : > { %4962 = vmatprep.subr.bf16.mxu1 %v5471_v30 }
 0x176   : > { %v6669_v9 = vsub.f32 %v6605_v12, %v805_v4  ;;  %859 = vadd.xlane.f32.xlu1 %v834_v1  ;;  %861 = vadd.xlane.f32.xlu0 %v835_v5  ;;  %v6672_v10 = vsub.f32 %v6608_v13, %v806_v6  ;;  %v5468_v12 = vld [vmem:[#allocation10 + $0x20] sm:$0xff]  }
 0x177   : > { %v789_v16 = vpop.xlane.xlu0 %788  ;;  %v791_v17 = vpop.xlane.xlu1 %790  ;;  %4928 = vmatprep.subr.bf16.mxu0 %v5468_v12 }
 0x178   : > { %v807_v18 = vmul.f32 0.0078125, %v789_v16  ;;  %v837_v19 = vmul.f32 %v6669_v9, %v6669_v9  ;;  %v808_v22 = vmul.f32 0.0078125, %v791_v17  ;;  %v838_v25 = vmul.f32 %v6672_v10, %v6672_v10  ;;  %4929 = vmatpush3.bf16.msra.mxu0 %v5468_v12  ;;  %4963 = vmatpush3.bf16.msra.mxu1 %v5471_v30 }
 0x179   : > { %4930 = vmatprep.subr.bf16.mxu0 %v5470_v29  ;;  %4964 = vmatprep.subr.bf16.mxu1 %v5473_v31 }
 0x17a   : > { %v6679_v24 = vsub.f32 %v6613_v14, %v807_v18  ;;  %863 = vadd.xlane.f32.xlu1 %v836_v11  ;;  %865 = vadd.xlane.f32.xlu0 %v837_v19  ;;  %v6682_v13 = vsub.f32 %v6616_v15, %v808_v22  ;;  %v5472_v15 = vld [vmem:[#allocation10 + $0x10] sm:$0xff]  }
 0x17c   : > { %v839_v26 = vmul.f32 %v6679_v24, %v6679_v24  ;;  %v840_v14 = vmul.f32 %v6682_v13, %v6682_v13  ;;  %4931 = vmatpush3.bf16.msra.mxu0 %v5470_v29  ;;  %4965 = vmatpush3.bf16.msra.mxu1 %v5473_v31  ;;  %v6700_v29 = vld [vmem:[%s7800_s2] ss:$0 sm:$0xff] }
 0x17d   : > { %4932 = vmatprep.subr.bf16.mxu0 %v5472_v15  ;;  %4966 = vmatprep.subr.bf16.mxu1 %v5475_v33 }
 0x17e   : > { %867 = vadd.xlane.f32.xlu1 %v838_v25  ;;  %869 = vadd.xlane.f32.xlu0 %v839_v26 }
 0x180   : > { %4933 = vmatpush3.bf16.msra.mxu0 %v5472_v15  ;;  %4967 = vmatpush3.bf16.msra.mxu1 %v5475_v33 }
 0x181   : > { %4934 = vmatprep.subr.bf16.mxu0 %v5474_v32  ;;  %4968 = vmatprep.subr.bf16.mxu1 %v5477_v37 }
 0x182   : > { %871 = vadd.xlane.f32.xlu1 %v840_v14 }
 0x184   : > { %4935 = vmatpush3.bf16.msra.mxu0 %v5474_v32  ;;  %4969 = vmatpush3.bf16.msra.mxu1 %v5477_v37 }
 0x185   : > { %4936 = vmatprep.subr.bf16.mxu0 %v5476_v34 }
 0x188   : > { %4937 = vmatpush3.bf16.msra.mxu0 %v5476_v34 }
 0x1eb   : > { %v842_v38 = vpop.xlane.xlu0 %841 }
 0x1ec   : > { %v873_v39 = vmul.f32 0.0078125, %v842_v38 }
 0x1ee   : > { %v889_v40 = vadd.f32 1e-05, %v873_v39 }
 0x1ef   : > { %v844_v41 = vpop.xlane.xlu1 %843  ;;  %v846_v42 = vpop.xlane.xlu0 %845 }
 0x1f0   : > { %5478 = vrsqrt.f32 %v889_v40  ;;  %v874_v45 = vmul.f32 0.0078125, %v844_v41  ;;  %v875_v46 = vmul.f32 0.0078125, %v846_v42 }
 0x1f2   : > { %v890_v47 = vadd.f32 1e-05, %v874_v45  ;;  %v891_v48 = vadd.f32 1e-05, %v875_v46 }
 0x1f3   : > { %v848_v49 = vpop.xlane.xlu1 %847  ;;  %v850_v50 = vpop.xlane.xlu0 %849 }
 0x1f4   : > { %5480 = vrsqrt.f32 %v890_v47  ;;  %v876_v51 = vmul.f32 0.0078125, %v848_v49  ;;  %v877_v52 = vmul.f32 0.0078125, %v850_v50 }
 0x1f5   : > { %5482 = vrsqrt.f32 %v891_v48 }
 0x1f6   : > { %v892_v55 = vadd.f32 1e-05, %v876_v51  ;;  %v893_v56 = vadd.f32 1e-05, %v877_v52 }
 0x1f7   : > { %v852_v57 = vpop.xlane.xlu1 %851  ;;  %v854_v58 = vpop.xlane.xlu0 %853 }
 0x1f8   : > { %5484 = vrsqrt.f32 %v892_v55  ;;  %v878_v59 = vmul.f32 0.0078125, %v852_v57  ;;  %v879_v60 = vmul.f32 0.0078125, %v854_v58 }
 0x1f9   : > { %5486 = vrsqrt.f32 %v893_v56 }
 0x1fa   : > { %v894_v61 = vadd.f32 1e-05, %v878_v59  ;;  %v895_v62 = vadd.f32 1e-05, %v879_v60 }
 0x1fb   : > { %v856_v1 = vpop.xlane.xlu1 %855  ;;  %v858_v2 = vpop.xlane.xlu0 %857 }
 0x1fc   : > { %5488 = vrsqrt.f32 %v894_v61  ;;  %v880_v3 = vmul.f32 0.0078125, %v856_v1  ;;  %v881_v4 = vmul.f32 0.0078125, %v858_v2 }
 0x1fd   : > { %v5479_v5 = vpop.eup %5478  ;;  %5490 = vrsqrt.f32 %v895_v62 }
 0x1fe   : > { %v896_v6 = vadd.f32 1e-05, %v880_v3  ;;  %v897_v7 = vadd.f32 1e-05, %v881_v4  ;;  %v921_v11 = vmul.f32 %v5479_v5, %v6620_v20 }
 0x1ff   : > { %v860_v16 = vpop.xlane.xlu1 %859  ;;  %v862_v17 = vpop.xlane.xlu0 %861 }
 0x200   : > { %5492 = vrsqrt.f32 %v896_v6  ;;  %v882_v18 = vmul.f32 0.0078125, %v860_v16  ;;  %v883_v19 = vmul.f32 0.0078125, %v862_v17  ;;  %v943_v12 = vmul.f32 %v6693_v8, %v921_v11 }
 0x201   : > { %v5481_v22 = vpop.eup %5480  ;;  %5494 = vrsqrt.f32 %v897_v7 }
 0x202   : > { %v5483_v23 = vpop.eup %5482  ;;  %v898_v25 = vadd.f32 1e-05, %v882_v18  ;;  %v899_v26 = vadd.f32 1e-05, %v883_v19  ;;  %v922_v30 = vmul.f32 %v5481_v22, %v6626_v27  ;;  %v965_v37 = vadd.f32 %v6700_v29, %v943_v12 }
 0x203   : > { %v864_v20 = vpop.xlane.xlu1 %863  ;;  %v866_v14 = vpop.xlane.xlu0 %865  ;;  %v923_v15 = vmul.f32 %v5483_v23, %v6622_v21 }
 0x204   : > { %5496 = vrsqrt.f32 %v898_v25  ;;  %v884_v31 = vmul.f32 0.0078125, %v864_v20  ;;  %v885_v32 = vmul.f32 0.0078125, %v866_v14  ;;  %v944_v33 = vmul.f32 %v6693_v8, %v922_v30 }
 0x205   : > { %v5485_v34 = vpop.eup %5484  ;;  %5498 = vrsqrt.f32 %v899_v26  ;;  %v945_v21 = vmul.f32 %v6693_v8, %v923_v15 }
 0x206   : > { %v5487_v38 = vpop.eup %5486  ;;  %v900_v39 = vadd.f32 1e-05, %v884_v31  ;;  %v901_v40 = vadd.f32 1e-05, %v885_v32  ;;  %v966_v41 = vadd.f32 %v6700_v29, %v944_v33  ;;  %v924_v27 = vmul.f32 %v5485_v34, %v6628_v28 }
 0x207   : > { %v868_v42 = vpop.xlane.xlu1 %867  ;;  %v870_v45 = vpop.xlane.xlu0 %869  ;;  %v925_v46 = vmul.f32 %v5487_v38, %v6634_v35  ;;  %v967_v35 = vadd.f32 %v6700_v29, %v945_v21 }
 0x208   : > { %5500 = vrsqrt.f32 %v900_v39  ;;  %v886_v47 = vmul.f32 0.0078125, %v868_v42  ;;  %v887_v48 = vmul.f32 0.0078125, %v870_v45  ;;  %v981_v49 = vpack.c.bf16 %v966_v41, %v965_v37 }
 0x209   : > { %v5489_v50 = vpop.eup %5488  ;;  %5502 = vrsqrt.f32 %v901_v40  ;;  %v946_v51 = vmul.f32 %v6693_v8, %v924_v27  ;;  %v947_v57 = vmul.f32 %v6693_v8, %v925_v46 }
 0x20a   : > { %v5491_v52 = vpop.eup %5490  ;;  %v902_v55 = vadd.f32 1e-05, %v886_v47  ;;  %v903_v56 = vadd.f32 1e-05, %v887_v48  ;;  %4938 = vmatprep.mubr.bf16.mxu0 %v981_v49  ;;  %4970 = vmatprep.mubr.bf16.mxu1 %v981_v49  ;;  %v926_v28 = vmul.f32 %v5489_v50, %v6636_v36 }
 0x20b   : > { %v872_v58 = vpop.xlane.xlu1 %871  ;;  %v968_v59 = vadd.f32 %v6700_v29, %v946_v51  ;;  %v927_v60 = vmul.f32 %v5491_v52, %v6642_v43  ;;  %v969_v5 = vadd.f32 %v6700_v29, %v947_v57 }
 0x20c   : > { %5504 = vrsqrt.f32 %v902_v55  ;;  %v888_v61 = vmul.f32 0.0078125, %v872_v58  ;;  %v948_v62 = vmul.f32 %v6693_v8, %v926_v28 }
 0x20d   : > { %v5493_v1 = vpop.eup %5492  ;;  %5506 = vrsqrt.f32 %v903_v56  ;;  %v982_v2 = vpack.c.bf16 %v968_v59, %v967_v35  ;;  %v949_v3 = vmul.f32 %v6693_v8, %v927_v60 }
 0x20e   : > { %v5495_v4 = vpop.eup %5494  ;;  %v904_v36 = vadd.f32 1e-05, %v888_v61  ;;  %v970_v6 = vadd.f32 %v6700_v29, %v948_v62  ;;  %v928_v7 = vmul.f32 %v5493_v1, %v6644_v44 }
 0x20f   : > { %4939 = vmatmul.mubr.bf16.vlgmr.msra.gmra.mxu0 %v982_v2  ;;  %4971 = vmatmul.mubr.bf16.vlgmr.msra.gmra.mxu1 %v982_v2  ;;  %v929_v43 = vmul.f32 %v5495_v4, %v6650_v53  ;;  %v971_v18 = vadd.f32 %v6700_v29, %v949_v3 }
 0x210   : > { %5508 = vrsqrt.f32 %v904_v36  ;;  %v983_v11 = vpack.c.bf16 %v970_v6, %v969_v5  ;;  %v950_v16 = vmul.f32 %v6693_v8, %v928_v7 }
 0x211   : > { %v5497_v17 = vpop.eup %5496  ;;  %v951_v44 = vmul.f32 %v6693_v8, %v929_v43 }
 0x212   : > { %v5499_v19 = vpop.eup %5498  ;;  %4942 = vmatprep.mubr.bf16.mxu0 %v983_v11  ;;  %4974 = vmatprep.mubr.bf16.mxu1 %v983_v11  ;;  %v972_v22 = vadd.f32 %v6700_v29, %v950_v16  ;;  %v930_v12 = vmul.f32 %v5497_v17, %v6652_v54 }
 0x213   : > { %v931_v23 = vmul.f32 %v5499_v19, %v6659_v63  ;;  %v973_v14 = vadd.f32 %v6700_v29, %v951_v44 }
 0x214   : > { %v984_v25 = vpack.c.bf16 %v972_v22, %v971_v18  ;;  %v952_v53 = vmul.f32 %v6693_v8, %v930_v12 }
 0x215   : > { %v5501_v26 = vpop.eup %5500  ;;  %v953_v30 = vmul.f32 %v6693_v8, %v931_v23 }
 0x216   : > { %v5503_v20 = vpop.eup %5502  ;;  %v974_v15 = vadd.f32 %v6700_v29, %v952_v53  ;;  %v932_v31 = vmul.f32 %v5501_v26, %v6662_v0 }
 0x217   : > { %4943 = vmatmul.mubr.bf16.gmra.mxu0 %v984_v25  ;;  %4975 = vmatmul.mubr.bf16.gmra.mxu1 %v984_v25  ;;  %v933_v54 = vmul.f32 %v5503_v20, %v6669_v9  ;;  %v975_v34 = vadd.f32 %v6700_v29, %v953_v30 }
 0x218   : > { %v985_v32 = vpack.c.bf16 %v974_v15, %v973_v14  ;;  %v954_v63 = vmul.f32 %v6693_v8, %v932_v31 }
 0x219   : > { %v5505_v33 = vpop.eup %5504  ;;  %v955_v40 = vmul.f32 %v6693_v8, %v933_v54 }
 0x21a   : > { %v5507_v37 = vpop.eup %5506  ;;  %4946 = vmatprep.mubr.bf16.mxu0 %v985_v32  ;;  %4978 = vmatprep.mubr.bf16.mxu1 %v985_v32  ;;  %v976_v38 = vadd.f32 %v6700_v29, %v954_v63  ;;  %v934_v39 = vmul.f32 %v5505_v33, %v6672_v10 }
 0x21b   : > { %v935_v0 = vmul.f32 %v5507_v37, %v6679_v24  ;;  %v977_v42 = vadd.f32 %v6700_v29, %v955_v40 }
 0x21c   : > { %v986_v41 = vpack.c.bf16 %v976_v38, %v975_v34  ;;  %v956_v9 = vmul.f32 %v6693_v8, %v934_v39 }
 0x21d   : > { %v5509_v27 = vpop.eup %5508  ;;  %v957_v46 = vmul.f32 %v6693_v8, %v935_v0 }
 0x21e   : > { %v978_v45 = vadd.f32 %v6700_v29, %v956_v9  ;;  %v936_v21 = vmul.f32 %v5509_v27, %v6682_v13  ;;  %v6751_v13 = vld [vmem:[%s7801_s16] ss:$0 sm:$0xff] }
 0x21f   : > { %4947 = vmatmul.mubr.bf16.gmra.mxu0 %v986_v41  ;;  %4979 = vmatmul.mubr.bf16.gmra.mxu1 %v986_v41  ;;  %v979_v24 = vadd.f32 %v6700_v29, %v957_v46 }
 0x220   : > { %v987_v47 = vpack.c.bf16 %v978_v45, %v977_v42  ;;  %v958_v10 = vmul.f32 %v6693_v8, %v936_v21  ;;  %v6756_v8 = vld [vmem:[%s7802_s30] ss:$0 sm:$0xff] }
 0x222   : > { %4950 = vmatprep.mubr.bf16.mxu0 %v987_v47  ;;  %4982 = vmatprep.mubr.bf16.mxu1 %v987_v47  ;;  %v980_v48 = vadd.f32 %v6700_v29, %v958_v10 }
 0x224   : > { %v988_v49 = vpack.c.bf16 %v980_v48, %v979_v24 }
 0x227   : > { %4951 = vmatmul.mubr.bf16.gmra.mxu0 %v988_v49  ;;  %4983 = vmatmul.mubr.bf16.gmra.mxu1 %v988_v49 }
 0x2cf   : > { %v4940_v50 = vpop.f32.mrf.mxu0  ;;  %v4972_v51 = vpop.f32.mrf.mxu1 }
 0x2d0   : > { %v1103_v29 = vadd.f32 %v4940_v50, %v6751_v13  ;;  %v1351_v57 = vadd.f32 %v4972_v51, %v6756_v8 }
 0x2d1   : > { %v1094_v52 = vpop.f32.mrf.mxu0  ;;  %v1342_v55 = vpop.f32.mrf.mxu1 }
 0x2d2   : > { %v1095_v59 = vadd.f32 %v6751_v13, %v1094_v52  ;;  %v1343_v60 = vadd.f32 %v6756_v8, %v1342_v55 }
 0x2d3   : > { %v4941_v56 = vpop.f32.mrf.mxu0  ;;  %v4973_v28 = vpop.f32.mrf.mxu1 }
 0x2d4   : > { %v1106_v58 = vadd.f32 %v4941_v56, %v6751_v13  ;;  %v1354_v35 = vadd.f32 %v4973_v28, %v6756_v8 }
 0x2d5   : > { %v1097_v61 = vpop.f32.mrf.mxu0  ;;  %v1345_v62 = vpop.f32.mrf.mxu1 }
 0x2d6   : > { %v4604_v1 = vpack.c.bf16 %v1106_v58, %v1103_v29  ;;  %v4644_v2 = vpack.c.bf16 %v1354_v35, %v1351_v57  ;;  %v1098_v3 = vadd.f32 %v6751_v13, %v1097_v61  ;;  %v1346_v4 = vadd.f32 %v6756_v8, %v1345_v62 }
 0x2d7   : > { %v4944_v36 = vpop.f32.mrf.mxu0  ;;  %v4976_v5 = vpop.f32.mrf.mxu1 }
 0x2d8   : > { %4676 = vst [vmem:[#allocation2 + $0x8] sm:$0xff] %v4604_v1   ;;  %4683 = vst [vmem:[#allocation3 + $0x8] sm:$0xff] %v4644_v2   ;;  %v4599_v6 = vpack.c.bf16 %v1098_v3, %v1095_v59  ;;  %v4639_v7 = vpack.c.bf16 %v1346_v4, %v1343_v60  ;;  %v1119_v18 = vadd.f32 %v4944_v36, %v6751_v13 }
 0x2d9   : > { %v1110_v43 = vpop.f32.mrf.mxu0  ;;  %v1358_v11 = vpop.f32.mrf.mxu1  ;;  %v1367_v19 = vadd.f32 %v4976_v5, %v6756_v8 }
 0x2da   : > { %4600 = vst [vmem:[#allocation2] sm:$0xff] %v4599_v6   ;;  %4640 = vst [vmem:[#allocation3] sm:$0xff] %v4639_v7   ;;  %v1111_v44 = vadd.f32 %v6751_v13, %v1110_v43  ;;  %v1359_v23 = vadd.f32 %v6756_v8, %v1358_v11 }
 0x2db   : > { %v4945_v16 = vpop.f32.mrf.mxu0  ;;  %v4977_v17 = vpop.f32.mrf.mxu1 }
 0x2dc   : > { %v1122_v22 = vadd.f32 %v4945_v16, %v6751_v13  ;;  %v1370_v12 = vadd.f32 %v4977_v17, %v6756_v8 }
 0x2dd   : > { %v1113_v25 = vpop.f32.mrf.mxu0  ;;  %v1361_v53 = vpop.f32.mrf.mxu1 }
 0x2de   : > { %v4614_v26 = vpack.c.bf16 %v1122_v22, %v1119_v18  ;;  %v4654_v30 = vpack.c.bf16 %v1370_v12, %v1367_v19  ;;  %v1114_v20 = vadd.f32 %v6751_v13, %v1113_v25  ;;  %v1362_v14 = vadd.f32 %v6756_v8, %v1361_v53 }
 0x2df   : > { %v4948_v15 = vpop.f32.mrf.mxu0  ;;  %v4980_v31 = vpop.f32.mrf.mxu1 }
 0x2e0   : > { %4678 = vst [vmem:[#allocation2 + $0x18] sm:$0xff] %v4614_v26   ;;  %4685 = vst [vmem:[#allocation3 + $0x18] sm:$0xff] %v4654_v30   ;;  %v4609_v54 = vpack.c.bf16 %v1114_v20, %v1111_v44  ;;  %v4649_v32 = vpack.c.bf16 %v1362_v14, %v1359_v23  ;;  %v1135_v38 = vadd.f32 %v4948_v15, %v6751_v13 }
 0x2e1   : > { %v1126_v63 = vpop.f32.mrf.mxu0  ;;  %v1374_v33 = vpop.f32.mrf.mxu1  ;;  %v1383_v39 = vadd.f32 %v4980_v31, %v6756_v8 }
 0x2e2   : > { %4677 = vst [vmem:[#allocation2 + $0x10] sm:$0xff] %v4609_v54   ;;  %4684 = vst [vmem:[#allocation3 + $0x10] sm:$0xff] %v4649_v32   ;;  %v1127_v41 = vadd.f32 %v6751_v13, %v1126_v63  ;;  %v1375_v9 = vadd.f32 %v6756_v8, %v1374_v33 }
 0x2e3   : > { %v4949_v34 = vpop.f32.mrf.mxu0  ;;  %v4981_v37 = vpop.f32.mrf.mxu1 }
 0x2e4   : > { %v1138_v40 = vadd.f32 %v4949_v34, %v6751_v13  ;;  %v1386_v0 = vadd.f32 %v4981_v37, %v6756_v8 }
 0x2e5   : > { %v1129_v27 = vpop.f32.mrf.mxu0  ;;  %v1377_v42 = vpop.f32.mrf.mxu1 }
 0x2e6   : > { %v4624_v45 = vpack.c.bf16 %v1138_v40, %v1135_v38  ;;  %v4664_v21 = vpack.c.bf16 %v1386_v0, %v1383_v39  ;;  %v1130_v46 = vadd.f32 %v6751_v13, %v1129_v27  ;;  %v1378_v47 = vadd.f32 %v6756_v8, %v1377_v42 }
 0x2e7   : > { %v4952_v10 = vpop.f32.mrf.mxu0  ;;  %v4984_v24 = vpop.f32.mrf.mxu1 }
 0x2e8   : > { %4680 = vst [vmem:[#allocation2 + $0x28] sm:$0xff] %v4624_v45   ;;  %4687 = vst [vmem:[#allocation3 + $0x28] sm:$0xff] %v4664_v21   ;;  %v4619_v48 = vpack.c.bf16 %v1130_v46, %v1127_v41  ;;  %v4659_v49 = vpack.c.bf16 %v1378_v47, %v1375_v9  ;;  %v1151_v56 = vadd.f32 %v4952_v10, %v6751_v13 }
 0x2e9   : > { %v1142_v50 = vpop.f32.mrf.mxu0  ;;  %v1390_v51 = vpop.f32.mrf.mxu1  ;;  %v1399_v28 = vadd.f32 %v4984_v24, %v6756_v8 }
 0x2ea   : > { %4679 = vst [vmem:[#allocation2 + $0x20] sm:$0xff] %v4619_v48   ;;  %4686 = vst [vmem:[#allocation3 + $0x20] sm:$0xff] %v4659_v49   ;;  %v1143_v58 = vadd.f32 %v6751_v13, %v1142_v50  ;;  %v1391_v35 = vadd.f32 %v6756_v8, %v1390_v51 }
 0x2eb   : > { %v4953_v52 = vpop.f32.mrf.mxu0  ;;  %v4985_v55 = vpop.f32.mrf.mxu1 }
 0x2ec   : > { %v1154_v29 = vadd.f32 %v4953_v52, %v6751_v13  ;;  %v1402_v57 = vadd.f32 %v4985_v55, %v6756_v8 }
 0x2ed   : > { %v1145_v59 = vpop.f32.mrf.mxu0  ;;  %v1393_v60 = vpop.f32.mrf.mxu1 }
 0x2ee   : > { %v4634_v61 = vpack.c.bf16 %v1154_v29, %v1151_v56  ;;  %v4674_v62 = vpack.c.bf16 %v1402_v57, %v1399_v28  ;;  %v1146_v1 = vadd.f32 %v6751_v13, %v1145_v59  ;;  %v1394_v2 = vadd.f32 %v6756_v8, %v1393_v60 }
 0x2f0   : > { %4682 = vst [vmem:[#allocation2 + $0x38] sm:$0xff] %v4634_v61   ;;  %4689 = vst [vmem:[#allocation3 + $0x38] sm:$0xff] %v4674_v62   ;;  %v4629_v3 = vpack.c.bf16 %v1146_v1, %v1143_v58  ;;  %v4669_v4 = vpack.c.bf16 %v1394_v2, %v1391_v35 }
 0x2f2   : > { %4681 = vst [vmem:[#allocation2 + $0x30] sm:$0xff] %v4629_v3   ;;  %4688 = vst [vmem:[#allocation3 + $0x30] sm:$0xff] %v4669_v4  }
 0x2f3 PF: > { %s7803_s3 = sld [smem:[#allocation26_spill]]  ;;  %v5510_v21 = vld [vmem:[#allocation9 + $0x38] sm:$0xff]   ;;  %v5511_v47 = vld [vmem:[#allocation9 + $0x30] sm:$0xff]   ;;  %v5512_v10 = vld [vmem:[#allocation9 + $0x28] sm:$0xff]   ;;  %vm1822_vm0 = vcmask 261120   ;;  %s6184_s24 = smov 96  }
 0x2f4   : > { %4986 = vmatprep.subr.bf16.mxu0 %v5510_v21  ;;  %v5513_v24 = vld [vmem:[#allocation9 + $0x20] sm:$0xff]   ;;  %v5514_v48 = vld [vmem:[#allocation9 + $0x18] sm:$0xff]   ;;  %v5515_v49 = vld [vmem:[#allocation9 + $0x10] sm:$0xff]   ;;  %s7804_s4 = sld [smem:[#allocation40_spill]]  ;;  %s6186_s30 = smov 32   ;;  %vm3067_vm1 = vcmask 523264  }
 0x2f5   : > { %4987 = vmatpush3.bf16.msra.mxu0 %v5510_v21  ;;  %v5516_v50 = vld [vmem:[#allocation9 + $0x8] sm:$0xff]   ;;  %v5517_v51 = vld [vmem:[#allocation9] sm:$0xff]   ;;  %v6858_v59 = vld [vmem:[#allocation2 + $0x18] sm:$0xff]   ;;  %s7805_s13 = sld [smem:[#allocation41_spill]]  ;;  %vm3076_vm2 = vcmask 785408   ;;  %p7827_p12 = scmp.ne.s32.totalorder %s7783_s6, 0 }
 0x2f6   : > { %4988 = vmatprep.subr.bf16.mxu0 %v5511_v47  ;;  %v6846_v29 = vld [vmem:[#allocation2 + $0x28] sm:$0xff]   ;;  %v6852_v58 = vld [vmem:[#allocation2 + $0x20] sm:$0xff]   ;;  %v1845_v60 = vsel %vm1822_vm0, %v6858_v59, 0  ;;  %v6864_v61 = vld [vmem:[#allocation2 + $0x10] sm:$0xff]   ;;  %s7806_s18 = sld [smem:[#allocation43_spill]] }
 0x2f7   : > { %v6834_v52 = vld [vmem:[#allocation2 + $0x38] sm:$0xff]   ;;  %v1851_v57 = vsel %vm1822_vm0, %v6846_v29, 0  ;;  %v1848_v35 = vsel %vm1822_vm0, %v6852_v58, 0  ;;  %v1842_v62 = vsel %vm1822_vm0, %v6864_v61, 0  ;;  %v6870_v1 = vld [vmem:[#allocation2 + $0x8] sm:$0xff]   ;;  %s7819_s5 = sld [smem:[#allocation49_spill]] }
 0x2f8   : > { %5226 = vmatprep.subr.msk.bf16.mxu1 %vm1822_vm0, %v6834_v52  ;;  %v1857_v56 = vsel %vm1822_vm0, %v6834_v52, 0  ;;  %v1839_v2 = vsel %vm1822_vm0, %v6870_v1, 0  ;;  %s7820_s1 = sld [smem:[#allocation50_spill]] }
 0x2f9   : > { %s4436_s26 = sshll.u32 %s7803_s3, 6  ;;  %4989 = vmatpush3.bf16.msra.mxu0 %v5511_v47  ;;  %v6836_v55 = vld [vmem:[#allocation2 + $0x30] sm:$0xff]   ;;  %5011 = vmatpush3.bf16.xpose.msra.mxu1 %v1857_v56 }
 0x2fa   : > { %s6792_s7 = scalar_lea.vmem %s6550_s8, %s4436_s26 [#allocation4]  ;;  %4990 = vmatprep.subr.bf16.mxu0 %v5512_v10  ;;  %5227 = vmatprep.subr.msk.bf16.mxu1 %vm1822_vm0, %v6836_v55  ;;  %v1854_v28 = vsel %vm1822_vm0, %v6836_v55, 0  ;;  %s7823_s26 = sld [smem:[#allocation55_spill]] }
 0x2fb   : > { %v1487_v13 = vld [vmem:[%s6792_s7] sm:$0xff]  ;;  %v1489_v8 = vld [vmem:[%s6792_s7 + $0x10] sm:$0xff]  ;;  %v1488_v36 = vld [vmem:[%s6792_s7 + $0x8] sm:$0xff]  ;;  %s7824_s8 = sld [smem:[#allocation27_spill]] }
 0x2fc   : > { %1497 = vadd.xlane.f32.xlu0 %v1487_v13  ;;  %1501 = vadd.xlane.f32.xlu1 %v1489_v8  ;;  %v1490_v5 = vld [vmem:[%s6792_s7 + $0x18] sm:$0xff]  ;;  %v1491_v6 = vld [vmem:[%s6792_s7 + $0x20] sm:$0xff]  ;;  %v1492_v7 = vld [vmem:[%s6792_s7 + $0x28] sm:$0xff] }
 0x2fd   : > { %v1493_v43 = vld [vmem:[%s6792_s7 + $0x30] sm:$0xff]  ;;  %v1494_v11 = vld [vmem:[%s6792_s7 + $0x38] sm:$0xff]  ;;  %4991 = vmatpush3.bf16.msra.mxu0 %v5512_v10 }
 0x2fe   : > { %4992 = vmatprep.subr.bf16.mxu0 %v5513_v24 }
 0x300   : > { %1499 = vadd.xlane.f32.xlu0 %v1488_v36  ;;  %1503 = vadd.xlane.f32.xlu1 %v1490_v5 }
 0x301   : > { %4993 = vmatpush3.bf16.msra.mxu0 %v5513_v24  ;;  %5013 = vmatpush3.bf16.xpose.msra.mxu1 %v1854_v28 }
 0x302   : > { %4994 = vmatprep.subr.bf16.mxu0 %v5514_v48  ;;  %5228 = vmatprep.subr.msk.bf16.mxu1 %vm1822_vm0, %v6846_v29 }
 0x304   : > { %1505 = vadd.xlane.f32.xlu0 %v1491_v6  ;;  %1507 = vadd.xlane.f32.xlu1 %v1492_v7 }
 0x305   : > { %4995 = vmatpush3.bf16.msra.mxu0 %v5514_v48 }
 0x306   : > { %4996 = vmatprep.subr.bf16.mxu0 %v5515_v49 }
 0x308   : > { %1509 = vadd.xlane.f32.xlu0 %v1493_v43  ;;  %1511 = vadd.xlane.f32.xlu1 %v1494_v11 }
 0x309   : > { %4997 = vmatpush3.bf16.msra.mxu0 %v5515_v49  ;;  %5015 = vmatpush3.bf16.xpose.msra.mxu1 %v1851_v57 }
 0x30a   : > { %4998 = vmatprep.subr.bf16.mxu0 %v5516_v50  ;;  %5229 = vmatprep.subr.msk.bf16.mxu1 %vm1822_vm0, %v6852_v58 }
 0x30d   : > { %4999 = vmatpush3.bf16.msra.mxu0 %v5516_v50 }
 0x30e   : > { %5000 = vmatprep.subr.bf16.mxu0 %v5517_v51 }
 0x311   : > { %5001 = vmatpush3.bf16.msra.mxu0 %v5517_v51  ;;  %5017 = vmatpush3.bf16.xpose.msra.mxu1 %v1848_v35 }
 0x312   : > { %5230 = vmatprep.subr.msk.bf16.mxu1 %vm1822_vm0, %v6858_v59 }
 0x319   : > { %5019 = vmatpush3.bf16.xpose.msra.mxu1 %v1845_v60 }
 0x31a   : > { %5231 = vmatprep.subr.msk.bf16.mxu1 %vm1822_vm0, %v6864_v61 }
 0x321   : > { %5021 = vmatpush3.bf16.xpose.msra.mxu1 %v1842_v62 }
 0x322   : > { %5232 = vmatprep.subr.msk.bf16.mxu1 %vm1822_vm0, %v6870_v1 }
 0x329   : > { %5023 = vmatpush3.bf16.xpose.msra.mxu1 %v1839_v2 }
 0x385   : > { %v1498_v16 = vpop.xlane.xlu0 %1497  ;;  %v1502_v17 = vpop.xlane.xlu1 %1501 }
 0x386   : > { %v1514_v18 = vmul.f32 0.0078125, %v1498_v16  ;;  %v1516_v19 = vmul.f32 0.0078125, %v1502_v17 }
 0x388   : > { %v6802_v22 = vsub.f32 %v1487_v13, %v1514_v18  ;;  %v6804_v12 = vsub.f32 %v1489_v8, %v1516_v19 }
 0x389   : > { %v1500_v44 = vpop.xlane.xlu0 %1499  ;;  %v1504_v23 = vpop.xlane.xlu1 %1503 }
 0x38a   : > { %v1515_v25 = vmul.f32 0.0078125, %v1500_v44  ;;  %v1530_v53 = vmul.f32 %v6802_v22, %v6802_v22  ;;  %v1517_v26 = vmul.f32 0.0078125, %v1504_v23  ;;  %v1532_v30 = vmul.f32 %v6804_v12, %v6804_v12 }
 0x38c   : > { %1538 = vadd.xlane.f32.xlu0 %v1530_v53  ;;  %v6810_v20 = vsub.f32 %v1488_v36, %v1515_v25  ;;  %v6812_v14 = vsub.f32 %v1490_v5, %v1517_v26 }
 0x38d   : > { %v1506_v15 = vpop.xlane.xlu0 %1505  ;;  %v1508_v31 = vpop.xlane.xlu1 %1507 }
 0x38e   : > { %v1518_v54 = vmul.f32 0.0078125, %v1506_v15  ;;  %v1531_v32 = vmul.f32 %v6810_v20, %v6810_v20  ;;  %v1519_v63 = vmul.f32 0.0078125, %v1508_v31  ;;  %v1533_v33 = vmul.f32 %v6812_v14, %v6812_v14 }
 0x390   : > { %1542 = vadd.xlane.f32.xlu0 %v1532_v30  ;;  %1540 = vadd.xlane.f32.xlu1 %v1531_v32  ;;  %v6818_v34 = vsub.f32 %v1491_v6, %v1518_v54  ;;  %v6820_v37 = vsub.f32 %v1492_v7, %v1519_v63 }
 0x391   : > { %v1510_v38 = vpop.xlane.xlu0 %1509  ;;  %v1512_v39 = vpop.xlane.xlu1 %1511 }
 0x392   : > { %v1520_v40 = vmul.f32 0.0078125, %v1510_v38  ;;  %v1534_v0 = vmul.f32 %v6818_v34, %v6818_v34  ;;  %v1521_v41 = vmul.f32 0.0078125, %v1512_v39  ;;  %v1535_v9 = vmul.f32 %v6820_v37, %v6820_v37  ;;  %v4437_v38 = vld [vmem:[%s7804_s4] ss:$0 sm:$0xff] }
 0x394   : > { %1544 = vadd.xlane.f32.xlu1 %v1533_v33  ;;  %1546 = vadd.xlane.f32.xlu0 %v1534_v0  ;;  %v6826_v27 = vsub.f32 %v1493_v43, %v1520_v40  ;;  %v6828_v42 = vsub.f32 %v1494_v11, %v1521_v41 }
 0x396   : > { %v1536_v45 = vmul.f32 %v6826_v27, %v6826_v27  ;;  %v1537_v46 = vmul.f32 %v6828_v42, %v6828_v42 }
 0x398   : > { %1548 = vadd.xlane.f32.xlu1 %v1535_v9  ;;  %1550 = vadd.xlane.f32.xlu0 %v1536_v45  ;;  %v4438_v9 = vld [vmem:[%s7805_s13] ss:$0 sm:$0xff] }
 0x39c   : > { %1552 = vadd.xlane.f32.xlu1 %v1537_v46 }
 0x3ad   : > { %2157 = vrot.lane.b32.xlu1 %v6836_v55, %s6184_s24 }
 0x3b1   : > { %2155 = vrot.lane.b32.xlu1 %v6846_v29, %s6184_s24 }
 0x415   : > { %v1539_v3 = vpop.xlane.xlu0 %1538 }
 0x416   : > { %v1554_v4 = vmul.f32 0.0078125, %v1539_v3 }
 0x418   : > { %v1562_v13 = vadd.f32 1e-05, %v1554_v4 }
 0x419   : > { %v1541_v8 = vpop.xlane.xlu1 %1540  ;;  %v1543_v36 = vpop.xlane.xlu0 %1542 }
 0x41a   : > { %5622 = vrsqrt.f32 %v1562_v13  ;;  %v1555_v5 = vmul.f32 0.0078125, %v1541_v8  ;;  %v1556_v6 = vmul.f32 0.0078125, %v1543_v36 }
 0x41c   : > { %v1563_v7 = vadd.f32 1e-05, %v1555_v5  ;;  %v1564_v43 = vadd.f32 1e-05, %v1556_v6 }
 0x41d   : > { %v1545_v11 = vpop.xlane.xlu1 %1544  ;;  %v1547_v16 = vpop.xlane.xlu0 %1546 }
 0x41e   : > { %5624 = vrsqrt.f32 %v1563_v7  ;;  %v1557_v17 = vmul.f32 0.0078125, %v1545_v11  ;;  %v1558_v18 = vmul.f32 0.0078125, %v1547_v16  ;;  %v4439_v16 = vld [vmem:[%s7806_s18] ss:$0 sm:$0xff]  ;;  %s7822_s18 = sld [smem:[#allocation53_spill]] }
 0x41f   : > { %5626 = vrsqrt.f32 %v1564_v43 }
 0x420   : > { %v1565_v19 = vadd.f32 1e-05, %v1557_v17  ;;  %v1566_v44 = vadd.f32 1e-05, %v1558_v18 }
 0x421   : > { %v1549_v23 = vpop.xlane.xlu1 %1548  ;;  %v1551_v25 = vpop.xlane.xlu0 %1550 }
 0x422   : > { %5628 = vrsqrt.f32 %v1565_v19  ;;  %v1559_v53 = vmul.f32 0.0078125, %v1549_v23  ;;  %v1560_v26 = vmul.f32 0.0078125, %v1551_v25 }
 0x423   : > { %5630 = vrsqrt.f32 %v1566_v44 }
 0x424   : > { %v1567_v30 = vadd.f32 1e-05, %v1559_v53  ;;  %v1568_v15 = vadd.f32 1e-05, %v1560_v26 }
 0x425   : > { %v1553_v31 = vpop.xlane.xlu1 %1552 }
 0x426   : > { %5632 = vrsqrt.f32 %v1567_v30  ;;  %v1561_v54 = vmul.f32 0.0078125, %v1553_v31 }
 0x427   : > { %v5623_v32 = vpop.eup %5622  ;;  %5634 = vrsqrt.f32 %v1568_v15 }
 0x428   : > { %v1569_v63 = vadd.f32 1e-05, %v1561_v54  ;;  %v1578_v33 = vmul.f32 %v5623_v32, %v6802_v22 }
 0x42a   : > { %5636 = vrsqrt.f32 %v1569_v63  ;;  %v1592_v41 = vmul.f32 %v4437_v38, %v1578_v33 }
 0x42b   : > { %v5625_v39 = vpop.eup %5624 }
 0x42c   : > { %v5627_v40 = vpop.eup %5626  ;;  %v1579_v0 = vmul.f32 %v5625_v39, %v6810_v20  ;;  %v1606_v22 = vadd.f32 %v4438_v9, %v1592_v41  ;;  %v6926_v41 = vld [vmem:[#allocation3 + $0x28] sm:$0xff]  }
 0x42d   : > { %v1580_v45 = vmul.f32 %v5627_v40, %v6804_v12  ;;  %v6919_v40 = vld [vmem:[#allocation3 + $0x38] sm:$0xff]  }
 0x42e   : > { %v1593_v21 = vmul.f32 %v4437_v38, %v1579_v0  ;;  %v6921_v0 = vld [vmem:[#allocation3 + $0x30] sm:$0xff]   ;;  %5034 = vmatprep.subr.bf16.mxu0 %v6919_v40 }
 0x42f   : > { %v5629_v46 = vpop.eup %5628  ;;  %v1594_v48 = vmul.f32 %v4437_v38, %v1580_v45  ;;  %v6934_v45 = vld [vmem:[#allocation3 + $0x18] sm:$0xff]  }
 0x430   : > { %v5631_v47 = vpop.eup %5630  ;;  %v1607_v10 = vadd.f32 %v4438_v9, %v1593_v21  ;;  %v1581_v24 = vmul.f32 %v5629_v46, %v6812_v14  ;;  %v6938_v21 = vld [vmem:[#allocation3 + $0x10] sm:$0xff]  }
 0x431   : > { %v1582_v49 = vmul.f32 %v5631_v47, %v6818_v34  ;;  %v1608_v28 = vadd.f32 %v4438_v9, %v1594_v48  ;;  %v6944_v46 = vld [vmem:[%s6558_s9 + $0x10] sm:$0xff]  ;;  %v6953_v48 = vld [vmem:[%s6558_s9 + $0x18] sm:$0xff] }
 0x432   : > { %v1614_v50 = vpack.c.bf16 %v1607_v10, %v1606_v22  ;;  %v1595_v51 = vmul.f32 %v4437_v38, %v1581_v24  ;;  %v6950_v24 = vld [vmem:[%s6558_s9] sm:$0xff] }
 0x433   : > { %v5633_v20 = vpop.eup %5632  ;;  %v1596_v12 = vmul.f32 %v4437_v38, %v1582_v49 }
 0x434   : > { %v5635_v56 = vpop.eup %5634  ;;  %5002 = vmatprep.mubr.bf16.mxu0 %v1614_v50  ;;  %v1609_v57 = vadd.f32 %v4438_v9, %v1595_v51  ;;  %v1583_v35 = vmul.f32 %v5633_v20, %v6820_v37  ;;  %v6890_v37 = vld [vmem:[#allocation2] sm:$0xff]  }
 0x435   : > { %v1584_v60 = vmul.f32 %v5635_v56, %v6826_v27  ;;  %v1610_v14 = vadd.f32 %v4438_v9, %v1596_v12  ;;  %5233 = vmatprep.subr.msk.bf16.mxu1 %vm1822_vm0, %v6890_v37  ;;  %v1836_v27 = vsel %vm1822_vm0, %v6890_v37, 0  ;;  %v6959_v56 = vld [vmem:[%s6558_s9 + $0x8] sm:$0xff] }
 0x436   : > { %v1615_v62 = vpack.c.bf16 %v1609_v57, %v1608_v28  ;;  %v1597_v2 = vmul.f32 %v4437_v38, %v1583_v35  ;;  %5025 = vmatpush3.bf16.xpose.msra.mxu1 %v1836_v27  ;;  %v6962_v57 = vld [vmem:[#allocation3 + $0x8] sm:$0xff]   ;;  %v6966_v35 = vld [vmem:[#allocation3] sm:$0xff]  }
 0x437   : > { %v5637_v3 = vpop.eup %5636  ;;  %v1598_v13 = vmul.f32 %v4437_v38, %v1584_v60  ;;  %v6975_v60 = vld [vmem:[%s6558_s9 + $0x30] sm:$0xff] }
 0x438   : > { %5003 = vmatmul.mubr.bf16.vlgmr.msra.gmra.mxu0 %v1615_v62  ;;  %v1611_v4 = vadd.f32 %v4438_v9, %v1597_v2  ;;  %v1585_v34 = vmul.f32 %v5637_v3, %v6828_v42  ;;  %v6981_v3 = vld [vmem:[%s6558_s9 + $0x20] sm:$0xff] }
 0x439   : > { %v1612_v5 = vadd.f32 %v4438_v9, %v1598_v13  ;;  %5035 = vmatpush3.bf16.msra.mxu0 %v6919_v40 }
 0x43a   : > { %v1616_v8 = vpack.c.bf16 %v1611_v4, %v1610_v14  ;;  %v1599_v36 = vmul.f32 %v4437_v38, %v1585_v34  ;;  %5036 = vmatprep.subr.bf16.mxu0 %v6921_v0  ;;  %v6984_v14 = vld [vmem:[%s6558_s9 + $0x38] sm:$0xff] }
 0x43c   : > { %5006 = vmatprep.mubr.bf16.mxu0 %v1616_v8  ;;  %v1613_v6 = vadd.f32 %v4438_v9, %v1599_v36  ;;  %v6930_v9 = vld [vmem:[#allocation3 + $0x20] sm:$0xff]   ;;  %v6994_v36 = vld [vmem:[%s6558_s9 + $0x28] sm:$0xff]  ;;  %s6185_s9 = smov 64  }
 0x43d   : > { %5037 = vmatpush3.bf16.msra.mxu0 %v6921_v0 }
 0x43e   : > { %v1617_v7 = vpack.c.bf16 %v1613_v6, %v1612_v5  ;;  %5038 = vmatprep.subr.bf16.mxu0 %v6926_v41  ;;  %v2158_v6 = vpop.permute.xlu1 %2157 }
 0x440   : > { %5007 = vmatmul.mubr.bf16.gmra.mxu0 %v1617_v7 }
 0x441   : > { %5039 = vmatpush3.bf16.msra.mxu0 %v6926_v41 }
 0x442   : > { %5040 = vmatprep.subr.bf16.mxu0 %v6930_v9  ;;  %v2156_v7 = vpop.permute.xlu1 %2155 }
 0x445   : > { %5041 = vmatpush3.bf16.msra.mxu0 %v6930_v9 }
 0x446   : > { %5042 = vmatprep.subr.bf16.mxu0 %v6934_v45 }
 0x449   : > { %5043 = vmatpush3.bf16.msra.mxu0 %v6934_v45 }
 0x44a   : > { %5044 = vmatprep.subr.bf16.mxu0 %v6938_v21 }
 0x44d   : > { %5045 = vmatpush3.bf16.msra.mxu0 %v6938_v21 }
 0x44e   : > { %5046 = vmatprep.subr.bf16.mxu0 %v6962_v57 }
 0x451   : > { %5047 = vmatpush3.bf16.msra.mxu0 %v6962_v57 }
 0x452   : > { %5048 = vmatprep.subr.bf16.mxu0 %v6966_v35 }
 0x455   : > { %5049 = vmatpush3.bf16.msra.mxu0 %v6966_v35 }
 0x4f8   : > { %v5004_v42 = vpop.f32.mrf.mxu0 }
 0x4f9   : > { %v1732_v23 = vadd.f32 %v5004_v42, %v4439_v16 }
 0x4fa   : > { %v1723_v43 = vpop.f32.mrf.mxu0 }
 0x4fb   : > { %v1724_v19 = vadd.f32 %v4439_v16, %v1723_v43 }
 0x4fc   : > { %v5005_v11 = vpop.f32.mrf.mxu0 }
 0x4fd   : > { %v1735_v17 = vadd.f32 %v5005_v11, %v4439_v16 }
 0x4fe   : > { %v1726_v18 = vpop.f32.mrf.mxu0 }
 0x4ff   : > { %v1727_v44 = vadd.f32 %v4439_v16, %v1726_v18  ;;  %v6905_v26 = vpack.c.bf16 %v1735_v17, %v1732_v23 }
 0x500   : > { %v5008_v25 = vpop.f32.mrf.mxu0 }
 0x501   : > { %v6903_v53 = vpack.c.bf16 %v1727_v44, %v1724_v19  ;;  %v1748_v33 = vadd.f32 %v5008_v25, %v4439_v16 }
 0x502   : > { %v1739_v30 = vpop.f32.mrf.mxu0 }
 0x503   : > { %5026 = vmatprep.mubr.msk.bf16.mxu1 %vm1822_vm0, %v6903_v53  ;;  %v1740_v32 = vadd.f32 %v4439_v16, %v1739_v30 }
 0x504   : > { %v5009_v15 = vpop.f32.mrf.mxu0  ;;  %5027 = vmatmul.mubr.msk.bf16.vlgmr.msra.gmra.mxu1 %vm1822_vm0, %v6905_v26 }
 0x505   : > { %v1751_v31 = vadd.f32 %v5009_v15, %v4439_v16 }
 0x506   : > { %v1742_v54 = vpop.f32.mrf.mxu0 }
 0x507   : > { %v1743_v63 = vadd.f32 %v4439_v16, %v1742_v54  ;;  %v6913_v39 = vpack.c.bf16 %v1751_v31, %v1748_v33 }
 0x509   : > { %v6911_v38 = vpack.c.bf16 %v1743_v63, %v1740_v32 }
 0x50b   : > { %5030 = vmatprep.mubr.msk.bf16.mxu1 %vm1822_vm0, %v6911_v38 }
 0x50c   : > { %5031 = vmatmul.mubr.msk.bf16.gmra.mxu1 %vm1822_vm0, %v6913_v39 }
 0x5c4   : > { %v5028_v47 = vpop.f32.mrf.mxu1 }
 0x5c5   : > { %v6947_v22 = vadd.f32 %v5028_v47, %v6944_v46 }
 0x5c6   : > { %v1893_v10 = vpop.f32.mrf.mxu1 }
 0x5c7   : > { %1928 = vmax.xlane.f32.xlu0 %v6947_v22  ;;  %v1894_v50 = vadd.f32 %v1893_v10, %v6950_v24  ;;  %v2192_v10 = vsel %vm1822_vm0, %v2158_v6, 0 }
 0x5c8   : > { %v5029_v49 = vpop.f32.mrf.mxu1 }
 0x5c9   : > { %v1905_v51 = vadd.f32 %v5029_v49, %v6953_v48  ;;  %v2189_v49 = vsel %vm1822_vm0, %v2156_v7, 0 }
 0x5ca   : > { %v1896_v20 = vpop.f32.mrf.mxu1 }
 0x5cb   : > { %1930 = vmax.xlane.f32.xlu1 %v1905_v51  ;;  %1924 = vmax.xlane.f32.xlu0 %v1894_v50  ;;  %v1897_v28 = vadd.f32 %v1896_v20, %v6959_v56 }
 0x5cc   : > { %v5032_v12 = vpop.f32.mrf.mxu1 }
 0x5cd   : > { %v6978_v2 = vadd.f32 %v5032_v12, %v6975_v60 }
 0x5ce   : > { %v1909_v62 = vpop.f32.mrf.mxu1 }
 0x5cf   : > { %1926 = vmax.xlane.f32.xlu1 %v1897_v28  ;;  %v6988_v34 = vadd.f32 %v1909_v62, %v6981_v3 }
 0x5d0   : > { %v5033_v4 = vpop.f32.mrf.mxu1 }
 0x5d1   : > { %v6991_v13 = vadd.f32 %v5033_v4, %v6984_v14 }
 0x5d2   : > { %v1912_v8 = vpop.f32.mrf.mxu1 }
 0x5d3   : > { %v6999_v5 = vadd.f32 %v1912_v8, %v6994_v36 }
 0x5e0   : > { %2153 = vrot.lane.b32.xlu1 %v6852_v58, %s6184_s24 }
 0x5e1   : > { %2159 = vrot.lane.b32.xlu0 %v6834_v52, %s6184_s24 }
 0x600   : > { %1936 = vmax.xlane.f32.xlu0 %v6978_v2 }
 0x604   : > { %1938 = vmax.xlane.f32.xlu0 %v6991_v13  ;;  %1932 = vmax.xlane.f32.xlu1 %v6988_v34 }
 0x608   : > { %1934 = vmax.xlane.f32.xlu0 %v6999_v5 }
 0x615   : > { %2149 = vrot.lane.b32.xlu1 %v6864_v61, %s6184_s24 }
 0x619   : > { %2147 = vrot.lane.b32.xlu1 %v6870_v1, %s6184_s24 }
 0x61d   : > { %2145 = vrot.lane.b32.xlu1 %v6890_v37, %s6184_s24 }
 0x61e   : > { %2151 = vrot.lane.b32.xlu0 %v6858_v59, %s6184_s24 }
 0x621   : > { %2139 = vrot.lane.b32.xlu1 %v6905_v26, %s6184_s24 }
 0x622   : > { %2137 = vrot.lane.b32.xlu0 %v6903_v53, %s6184_s24 }
 0x625   : > { %2143 = vrot.lane.b32.xlu1 %v6913_v39, %s6184_s24 }
 0x626   : > { %2141 = vrot.lane.b32.xlu0 %v6911_v38, %s6184_s24 }
 0x629   : > { %2334 = vrot.lane.b32.xlu1 %v6921_v0, %s6184_s24 }
 0x62a   : > { %2336 = vrot.lane.b32.xlu0 %v6919_v40, %s6184_s24 }
 0x62d   : > { %2326 = vrot.lane.b32.xlu1 %v6938_v21, %s6184_s24 }
 0x62e   : > { %2332 = vrot.lane.b32.xlu0 %v6926_v41, %s6184_s24 }
 0x631   : > { %2322 = vrot.lane.b32.xlu1 %v6966_v35, %s6184_s24 }
 0x632   : > { %2330 = vrot.lane.b32.xlu0 %v6930_v9, %s6184_s24 }
 0x635   : > { %2451 = vrot.lane.b32.xlu1 %v6836_v55, %s6185_s9 }
 0x636   : > { %2328 = vrot.lane.b32.xlu0 %v6934_v45, %s6184_s24 }
 0x63a   : > { %2324 = vrot.lane.b32.xlu0 %v6962_v57, %s6184_s24 }
 0x63e   : > { %2453 = vrot.lane.b32.xlu0 %v6834_v52, %s6185_s9 }
 0x650   : > { %v1929_v27 = vpop.xlane.xlu0 %1928 }
 0x651   : > { %v1942_v17 = vsub.f32 %v6947_v22, %v1929_v27 }
 0x653   : > { %v1952_v30 = vmul.f32 1.442695, %v1942_v17 }
 0x654   : > { %v1931_v42 = vpop.xlane.xlu1 %1930  ;;  %v1925_v43 = vpop.xlane.xlu0 %1924 }
 0x655   : > { %v1943_v11 = vsub.f32 %v1905_v51, %v1931_v42  ;;  %v1940_v16 = vsub.f32 %v1894_v50, %v1925_v43 }
 0x657   : > { %v1954_v18 = vmul.f32 1.442695, %v1943_v11  ;;  %v1948_v19 = vmul.f32 1.442695, %v1940_v16 }
 0x658   : > { %v1927_v44 = vpop.xlane.xlu1 %1926  ;;  %v2160_v23 = vpop.permute.xlu0 %2159 }
 0x659   : > { %v1941_v25 = vsub.f32 %v1897_v28, %v1927_v44  ;;  %5234 = vmatprep.subr.msk.bf16.mxu0 %vm1822_vm0, %v2160_v23  ;;  %5638 = vpow2.f32 %v1954_v18  ;;  %v2195_v22 = vsel %vm1822_vm0, %v2160_v23, 0 }
 0x65a   : > { %5640 = vpow2.f32 %v1948_v19 }
 0x65b   : > { %v1950_v15 = vmul.f32 1.442695, %v1941_v25 }
 0x65c   : > { %v2154_v50 = vpop.permute.xlu1 %2153 }
 0x65d   : > { %5642 = vpow2.f32 %v1950_v15  ;;  %v2186_v51 = vsel %vm1822_vm0, %v2154_v50, 0 }
 0x65e   : > { %5644 = vpow2.f32 %v1952_v30 }
 0x666   : > { %v7036_v31 = vpop.eup %5638 }
 0x667   : > { %v7038_v54 = vpop.eup %5640 }
 0x66a   : > { %v7040_v32 = vpop.eup %5642 }
 0x66b   : > { %v7042_v63 = vpop.eup %5644  ;;  %v1996_v33 = vpack.c.bf16 %v7040_v32, %v7038_v54 }
 0x66c   : > { %v1997_v47 = vpack.c.bf16 %v7036_v31, %v7042_v63 }
 0x66d   : > { %5050 = vmatprep.mubr.bf16.mxu0 %v1996_v33 }
 0x66e   : > { %5051 = vmatmul.mubr.bf16.vlgmr.msra.gmra.mxu0 %v1997_v47 }
 0x66f   : > { %5059 = vmatpush3.bf16.xpose.msra.mxu0 %v2195_v22 }
 0x670   : > { %5235 = vmatprep.subr.msk.bf16.mxu0 %vm1822_vm0, %v2158_v6 }
 0x677   : > { %5061 = vmatpush3.bf16.xpose.msra.mxu0 %v2192_v10 }
 0x678   : > { %5236 = vmatprep.subr.msk.bf16.mxu0 %vm1822_vm0, %v2156_v7 }
 0x67f   : > { %5063 = vmatpush3.bf16.xpose.msra.mxu0 %v2189_v49 }
 0x680   : > { %5237 = vmatprep.subr.msk.bf16.mxu0 %vm1822_vm0, %v2154_v50 }
 0x687   : > { %5065 = vmatpush3.bf16.xpose.msra.mxu0 %v2186_v51 }
 0x689   : > { %v1937_v20 = vpop.xlane.xlu0 %1936 }
 0x68a   : > { %v1946_v8 = vsub.f32 %v6978_v2, %v1937_v20 }
 0x68c   : > { %v1960_v43 = vmul.f32 1.442695, %v1946_v8 }
 0x68d   : > { %v1933_v28 = vpop.xlane.xlu1 %1932  ;;  %v1939_v12 = vpop.xlane.xlu0 %1938 }
 0x68e   : > { %v1944_v62 = vsub.f32 %v6988_v34, %v1933_v28  ;;  %v1947_v4 = vsub.f32 %v6991_v13, %v1939_v12 }
 0x690   : > { %v1956_v6 = vmul.f32 1.442695, %v1944_v62  ;;  %v1962_v27 = vmul.f32 1.442695, %v1947_v4 }
 0x691   : > { %v1935_v42 = vpop.xlane.xlu0 %1934  ;;  %v2150_v34 = vpop.permute.xlu1 %2149 }
 0x692   : > { %v1945_v7 = vsub.f32 %v6999_v5, %v1935_v42  ;;  %5646 = vpow2.f32 %v1956_v6  ;;  %v2180_v2 = vsel %vm1822_vm0, %v2150_v34, 0 }
 0x693   : > { %5648 = vpow2.f32 %v1962_v27 }
 0x694   : > { %v1958_v11 = vmul.f32 1.442695, %v1945_v7 }
 0x695   : > { %v2152_v16 = vpop.permute.xlu0 %2151  ;;  %v2148_v13 = vpop.permute.xlu1 %2147 }
 0x696   : > { %5650 = vpow2.f32 %v1958_v11  ;;  %5238 = vmatprep.subr.msk.bf16.mxu0 %vm1822_vm0, %v2152_v16  ;;  %v2183_v17 = vsel %vm1822_vm0, %v2152_v16, 0  ;;  %v2177_v30 = vsel %vm1822_vm0, %v2148_v13, 0 }
 0x697   : > { %5652 = vpow2.f32 %v1960_v43  ;;  %5067 = vmatpush3.bf16.xpose.msra.mxu0 %v2183_v17 }
 0x698   : > { %5239 = vmatprep.subr.msk.bf16.mxu0 %vm1822_vm0, %v2150_v34 }
 0x699   : > { %v2138_v15 = vpop.permute.xlu0 %2137  ;;  %v2146_v33 = vpop.permute.xlu1 %2145 }
 0x69a   : > { %v2174_v47 = vsel %vm1822_vm0, %v2146_v33, 0 }
 0x69d   : > { %v2140_v22 = vpop.permute.xlu1 %2139  ;;  %v2142_v10 = vpop.permute.xlu0 %2141 }
 0x69f   : > { %5069 = vmatpush3.bf16.xpose.msra.mxu0 %v2180_v2  ;;  %v7064_v5 = vpop.eup %5646 }
 0x6a0   : > { %5240 = vmatprep.subr.msk.bf16.mxu0 %vm1822_vm0, %v2148_v13  ;;  %v7066_v18 = vpop.eup %5648 }
 0x6a1   : > { %v2144_v49 = vpop.permute.xlu1 %2143  ;;  %v2337_v50 = vpop.permute.xlu0 %2336 }
 0x6a2   : > { %5082 = vmatprep.subr.bf16.mxu1 %v2337_v50 }
 0x6a3   : > { %v7068_v19 = vpop.eup %5650  ;;  %5083 = vmatpush3.bf16.msra.mxu1 %v2337_v50 }
 0x6a4   : > { %v7070_v44 = vpop.eup %5652  ;;  %v1998_v23 = vpack.c.bf16 %v7068_v19, %v7064_v5 }
 0x6a5   : > { %v1999_v25 = vpack.c.bf16 %v7066_v18, %v7070_v44  ;;  %v2335_v51 = vpop.permute.xlu1 %2334  ;;  %v2333_v20 = vpop.permute.xlu0 %2332 }
 0x6a6   : > { %5054 = vmatprep.mubr.bf16.mxu0 %v1998_v23  ;;  %5084 = vmatprep.subr.bf16.mxu1 %v2335_v51 }
 0x6a7   : > { %5055 = vmatmul.mubr.bf16.gmra.mxu0 %v1999_v25  ;;  %5085 = vmatpush3.bf16.msra.mxu1 %v2335_v51 }
 0x6a8   : > { %5071 = vmatpush3.bf16.xpose.msra.mxu0 %v2177_v30  ;;  %5074 = vmatprep.mubr.msk.bf16.mxu0 %vm1822_vm0, %v2138_v15 }
 0x6a9   : > { %5241 = vmatprep.subr.msk.bf16.mxu0 %vm1822_vm0, %v2146_v33  ;;  %5086 = vmatprep.subr.bf16.mxu1 %v2333_v20  ;;  %v2331_v28 = vpop.permute.xlu0 %2330  ;;  %v2327_v62 = vpop.permute.xlu1 %2326 }
 0x6ab   : > { %5087 = vmatpush3.bf16.msra.mxu1 %v2333_v20 }
 0x6ac   : > { %5088 = vmatprep.subr.bf16.mxu1 %v2331_v28 }
 0x6ad   : > { %v2329_v12 = vpop.permute.xlu0 %2328  ;;  %v2323_v8 = vpop.permute.xlu1 %2322 }
 0x6af   : > { %5089 = vmatpush3.bf16.msra.mxu1 %v2331_v28 }
 0x6b0   : > { %5073 = vmatpush3.bf16.xpose.msra.mxu0 %v2174_v47  ;;  %5090 = vmatprep.subr.bf16.mxu1 %v2329_v12 }
 0x6b1   : > { %v2325_v4 = vpop.permute.xlu0 %2324 }
 0x6b3   : > { %5091 = vmatpush3.bf16.msra.mxu1 %v2329_v12 }
 0x6b4   : > { %5092 = vmatprep.subr.bf16.mxu1 %v2327_v62 }
 0x6b5   : > { %v7087_v6 = vpop.permute.xlu0 %2453 }
 0x6b7   : > { %5075 = vmatmul.mubr.msk.bf16.vlgmr.msra.gmra.mxu0 %vm1822_vm0, %v2140_v22  ;;  %5093 = vmatpush3.bf16.msra.mxu1 %v2327_v62  ;;  %v2452_v62 = vpop.permute.xlu1 %2451 }
 0x6b8   : > { %5078 = vmatprep.mubr.msk.bf16.mxu0 %vm1822_vm0, %v2142_v10  ;;  %5094 = vmatprep.subr.bf16.mxu1 %v2325_v4 }
 0x6bb   : > { %5095 = vmatpush3.bf16.msra.mxu1 %v2325_v4 }
 0x6bc   : > { %5096 = vmatprep.subr.bf16.mxu1 %v2323_v8 }
 0x6bf   : > { %5079 = vmatmul.mubr.msk.bf16.gmra.mxu0 %vm1822_vm0, %v2144_v49  ;;  %5097 = vmatpush3.bf16.msra.mxu1 %v2323_v8 }
 0x6c0   : > { %5242 = vmatprep.subr.msk.bf16.mxu1 %vm1822_vm0, %v7087_v6 }
 0x72e   : > { %v7091_v27 = vpop.f32.mrf.mxu0 }
 0x72f   : > { %7807 = vst [vmem:[#allocation32_spill] sm:$0xff] %v7091_v27 }
 0x730   : > { %v7093_v42 = vpop.f32.mrf.mxu0 }
 0x731   : > { %7808 = vst [vmem:[#allocation33_spill] sm:$0xff] %v7093_v42 }
 0x732   : > { %v7095_v7 = vpop.f32.mrf.mxu0 }
 0x734   : > { %v7097_v43 = vpop.f32.mrf.mxu0 }
 0x767   : > { %v7099_v11 = vpop.f32.mrf.mxu0 }
 0x768   : > { %7809 = vst [vmem:[#allocation34_spill] sm:$0xff] %v7099_v11 }
 0x769   : > { %v7101_v16 = vpop.f32.mrf.mxu0 }
 0x76a   : > { %7810 = vst [vmem:[#allocation35_spill] sm:$0xff] %v7101_v16 }
 0x76b   : > { %v7103_v17 = vpop.f32.mrf.mxu0 }
 0x76c   : > { %7811 = vst [vmem:[#allocation36_spill] sm:$0xff] %v7103_v17 }
 0x76d   : > { %v7105_v34 = vpop.f32.mrf.mxu0 }
 0x76e   : > { %7812 = vst [vmem:[#allocation37_spill] sm:$0xff] %v7105_v34 }
 0x777   : > { %v5076_v2 = vpop.f32.mrf.mxu0 }
 0x778   : > { %v2240_v13 = vadd.f32 %v5076_v2, %v6944_v46 }
 0x779   : > { %v2231_v23 = vpop.f32.mrf.mxu0 }
 0x77a   : > { %v2232_v25 = vadd.f32 %v2231_v23, %v6950_v24  ;;  %2266 = vmax.xlane.f32.xlu1 %v2240_v13 }
 0x77b   : > { %v5077_v30 = vpop.f32.mrf.mxu0 }
 0x77c   : > { %v2243_v15 = vadd.f32 %v5077_v30, %v6953_v48  ;;  %2262 = vmax.xlane.f32.xlu0 %v2232_v25 }
 0x77d   : > { %v2234_v33 = vpop.f32.mrf.mxu0 }
 0x77e   : > { %2268 = vmax.xlane.f32.xlu1 %v2243_v15  ;;  %v2235_v47 = vadd.f32 %v2234_v33, %v6959_v56 }
 0x77f   : > { %v5080_v22 = vpop.f32.mrf.mxu0 }
 0x780   : > { %v7116_v49 = vadd.f32 %v5080_v22, %v6975_v60 }
 0x781   : > { %v2247_v10 = vpop.f32.mrf.mxu0 }
 0x782   : > { %2264 = vmax.xlane.f32.xlu1 %v2235_v47  ;;  %v7123_v28 = vadd.f32 %v2247_v10, %v6981_v3 }
 0x783   : > { %v5081_v50 = vpop.f32.mrf.mxu0 }
 0x784   : > { %v7120_v51 = vadd.f32 %v5081_v50, %v6984_v14 }
 0x785   : > { %v2250_v20 = vpop.f32.mrf.mxu0 }
 0x786   : > { %v7127_v12 = vadd.f32 %v2250_v20, %v6994_v36 }
 0x792   : > { %2449 = vrot.lane.b32.xlu0 %v6846_v29, %s6185_s9 }
 0x793   : > { %2447 = vrot.lane.b32.xlu1 %v6852_v58, %s6185_s9 }
 0x7b1   : > { %2274 = vmax.xlane.f32.xlu0 %v7116_v49 }
 0x7b5   : > { %2276 = vmax.xlane.f32.xlu0 %v7120_v51 }
 0x7b7   : > { %2270 = vmax.xlane.f32.xlu1 %v7123_v28 }
 0x7b9   : > { %2272 = vmax.xlane.f32.xlu0 %v7127_v12 }
 0x7c8   : > { %2443 = vrot.lane.b32.xlu1 %v6864_v61, %s6185_s9 }
 0x7cc   : > { %2441 = vrot.lane.b32.xlu1 %v6870_v1, %s6185_s9 }
 0x7cf   : > { %2445 = vrot.lane.b32.xlu0 %v6858_v59, %s6185_s9 }
 0x7d0   : > { %2439 = vrot.lane.b32.xlu1 %v6890_v37, %s6185_s9 }
 0x7d3   : > { %2431 = vrot.lane.b32.xlu0 %v6903_v53, %s6185_s9 }
 0x7d4   : > { %2433 = vrot.lane.b32.xlu1 %v6905_v26, %s6185_s9 }
 0x7d7   : > { %2435 = vrot.lane.b32.xlu0 %v6911_v38, %s6185_s9 }
 0x7d8   : > { %2437 = vrot.lane.b32.xlu1 %v6913_v39, %s6185_s9 }
 0x7db   : > { %2630 = vrot.lane.b32.xlu0 %v6919_v40, %s6185_s9 }
 0x7dc   : > { %2628 = vrot.lane.b32.xlu1 %v6921_v0, %s6185_s9 }
 0x7df   : > { %2626 = vrot.lane.b32.xlu0 %v6926_v41, %s6185_s9 }
 0x7e0   : > { %2620 = vrot.lane.b32.xlu1 %v6938_v21, %s6185_s9 }
 0x7e3   : > { %2624 = vrot.lane.b32.xlu0 %v6930_v9, %s6185_s9 }
 0x7e4   : > { %2616 = vrot.lane.b32.xlu1 %v6966_v35, %s6185_s9 }
 0x7e7   : > { %2622 = vrot.lane.b32.xlu0 %v6934_v45, %s6185_s9 }
 0x7e8   : > { %2745 = vrot.lane.b32.xlu1 %v6836_v55, %s6186_s30 }
 0x7eb   : > { %2618 = vrot.lane.b32.xlu0 %v6962_v57, %s6185_s9 }
 0x7ef   : > { %2747 = vrot.lane.b32.xlu0 %v6834_v52, %s6186_s30 }
 0x803   : > { %v2267_v4 = vpop.xlane.xlu1 %2266 }
 0x804   : > { %v2280_v33 = vsub.f32 %v2240_v13, %v2267_v4 }
 0x805   : > { %v2263_v8 = vpop.xlane.xlu0 %2262 }
 0x806   : > { %v2278_v2 = vsub.f32 %v2232_v25, %v2263_v8  ;;  %v2290_v20 = vmul.f32 1.442695, %v2280_v33 }
 0x807   : > { %v2269_v23 = vpop.xlane.xlu1 %2268 }
 0x808   : > { %v2281_v30 = vsub.f32 %v2243_v15, %v2269_v23  ;;  %v2286_v21 = vmul.f32 1.442695, %v2278_v2 }
 0x809   : > { %v2450_v4 = vpop.permute.xlu0 %2449 }
 0x80a   : > { %v2292_v22 = vmul.f32 1.442695, %v2281_v30  ;;  %5654 = vpow2.f32 %v2286_v21  ;;  %v2483_v8 = vsel %vm1822_vm0, %v2450_v4, 0 }
 0x80b   : > { %v2265_v10 = vpop.xlane.xlu1 %2264 }
 0x80c   : > { %v2279_v50 = vsub.f32 %v2235_v47, %v2265_v10  ;;  %5656 = vpow2.f32 %v2292_v22  ;;  %v2486_v47 = vsel %vm1822_vm0, %v2452_v62, 0 }
 0x80e   : > { %v2288_v11 = vmul.f32 1.442695, %v2279_v50 }
 0x80f   : > { %v2448_v2 = vpop.permute.xlu1 %2447 }
 0x810   : > { %5658 = vpow2.f32 %v2288_v11  ;;  %v2489_v11 = vsel %vm1822_vm0, %v7087_v6, 0  ;;  %v2480_v23 = vsel %vm1822_vm0, %v2448_v2, 0 }
 0x811   : > { %5660 = vpow2.f32 %v2290_v20 }
 0x817   : > { %v7163_v45 = vpop.eup %5654 }
 0x819   : > { %v7165_v16 = vpop.eup %5656 }
 0x81d   : > { %v7167_v17 = vpop.eup %5658 }
 0x81e   : > { %v7169_v25 = vpop.eup %5660  ;;  %v2318_v13 = vpack.c.bf16 %v7167_v17, %v7163_v45 }
 0x81f   : > { %v2319_v15 = vpack.c.bf16 %v7165_v16, %v7169_v25 }
 0x820   : > { %5098 = vmatprep.mubr.bf16.mxu1 %v2318_v13 }
 0x821   : > { %5099 = vmatmul.mubr.bf16.vlgmr.msra.gmra.mxu1 %v2319_v15 }
 0x822   : > { %5107 = vmatpush3.bf16.xpose.msra.mxu1 %v2489_v11 }
 0x823   : > { %5243 = vmatprep.subr.msk.bf16.mxu1 %vm1822_vm0, %v2452_v62 }
 0x82a   : > { %5109 = vmatpush3.bf16.xpose.msra.mxu1 %v2486_v47 }
 0x82b   : > { %5244 = vmatprep.subr.msk.bf16.mxu1 %vm1822_vm0, %v2450_v4 }
 0x832   : > { %5111 = vmatpush3.bf16.xpose.msra.mxu1 %v2483_v8 }
 0x833   : > { %5245 = vmatprep.subr.msk.bf16.mxu1 %vm1822_vm0, %v2448_v2 }
 0x83a   : > { %5113 = vmatpush3.bf16.xpose.msra.mxu1 %v2480_v23  ;;  %v2275_v30 = vpop.xlane.xlu0 %2274 }
 0x83b   : > { %v2284_v21 = vsub.f32 %v7116_v49, %v2275_v30 }
 0x83d   : > { %v2298_v15 = vmul.f32 1.442695, %v2284_v21 }
 0x83e   : > { %v2277_v6 = vpop.xlane.xlu0 %2276 }
 0x83f   : > { %v2285_v33 = vsub.f32 %v7120_v51, %v2277_v6 }
 0x840   : > { %v2271_v62 = vpop.xlane.xlu1 %2270 }
 0x841   : > { %v2300_v22 = vmul.f32 1.442695, %v2285_v33  ;;  %v2282_v10 = vsub.f32 %v7123_v28, %v2271_v62 }
 0x842   : > { %v2273_v50 = vpop.xlane.xlu0 %2272 }
 0x843   : > { %v2294_v20 = vmul.f32 1.442695, %v2282_v10  ;;  %v2283_v13 = vsub.f32 %v7127_v12, %v2273_v50  ;;  %5662 = vpow2.f32 %v2300_v22 }
 0x844   : > { %v2444_v49 = vpop.permute.xlu1 %2443 }
 0x845   : > { %v2296_v11 = vmul.f32 1.442695, %v2283_v13  ;;  %5664 = vpow2.f32 %v2294_v20  ;;  %v2474_v28 = vsel %vm1822_vm0, %v2444_v49, 0 }
 0x846   : > { %v2446_v47 = vpop.permute.xlu0 %2445 }
 0x847   : > { %5666 = vpow2.f32 %v2296_v11  ;;  %5246 = vmatprep.subr.msk.bf16.mxu1 %vm1822_vm0, %v2446_v47  ;;  %v2477_v51 = vsel %vm1822_vm0, %v2446_v47, 0 }
 0x848   : > { %5668 = vpow2.f32 %v2298_v15  ;;  %5115 = vmatpush3.bf16.xpose.msra.mxu1 %v2477_v51  ;;  %v2442_v4 = vpop.permute.xlu1 %2441 }
 0x849   : > { %5247 = vmatprep.subr.msk.bf16.mxu1 %vm1822_vm0, %v2444_v49  ;;  %v2471_v33 = vsel %vm1822_vm0, %v2442_v4, 0 }
 0x84a   : > { %v2432_v21 = vpop.permute.xlu0 %2431 }
 0x84c   : > { %v2440_v62 = vpop.permute.xlu1 %2439 }
 0x84d   : > { %v2468_v22 = vsel %vm1822_vm0, %v2440_v62, 0 }
 0x84e   : > { %v2436_v50 = vpop.permute.xlu0 %2435 }
 0x850   : > { %5117 = vmatpush3.bf16.xpose.msra.mxu1 %v2474_v28  ;;  %v7192_v12 = vpop.eup %5662  ;;  %v2434_v10 = vpop.permute.xlu1 %2433 }
 0x851   : > { %5248 = vmatprep.subr.msk.bf16.mxu1 %vm1822_vm0, %v2442_v4 }
 0x852   : > { %v7194_v8 = vpop.eup %5664  ;;  %v2631_v13 = vpop.permute.xlu0 %2630 }
 0x853   : > { %5130 = vmatprep.subr.bf16.mxu0 %v2631_v13 }
 0x854   : > { %v7196_v2 = vpop.eup %5666  ;;  %v2438_v20 = vpop.permute.xlu1 %2437  ;;  %5131 = vmatpush3.bf16.msra.mxu0 %v2631_v13 }
 0x855   : > { %v7198_v23 = vpop.eup %5668  ;;  %v2320_v30 = vpack.c.bf16 %v7196_v2, %v7194_v8 }
 0x856   : > { %v2321_v6 = vpack.c.bf16 %v7192_v12, %v7198_v23  ;;  %v2627_v11 = vpop.permute.xlu0 %2626 }
 0x857   : > { %5102 = vmatprep.mubr.bf16.mxu1 %v2320_v30 }
 0x858   : > { %5103 = vmatmul.mubr.bf16.gmra.mxu1 %v2321_v6  ;;  %v2629_v15 = vpop.permute.xlu1 %2628 }
 0x859   : > { %5119 = vmatpush3.bf16.xpose.msra.mxu1 %v2471_v33  ;;  %5122 = vmatprep.mubr.msk.bf16.mxu1 %vm1822_vm0, %v2432_v21 }
 0x85a   : > { %5249 = vmatprep.subr.msk.bf16.mxu1 %vm1822_vm0, %v2440_v62  ;;  %5132 = vmatprep.subr.bf16.mxu0 %v2629_v15  ;;  %v2625_v47 = vpop.permute.xlu0 %2624 }
 0x85b   : > { %5133 = vmatpush3.bf16.msra.mxu0 %v2629_v15 }
 0x85c   : > { %5134 = vmatprep.subr.bf16.mxu0 %v2627_v11  ;;  %v2621_v51 = vpop.permute.xlu1 %2620 }
 0x85e   : > { %v2623_v55 = vpop.permute.xlu0 %2622 }
 0x85f   : > { %5135 = vmatpush3.bf16.msra.mxu0 %v2627_v11 }
 0x860   : > { %5136 = vmatprep.subr.bf16.mxu0 %v2625_v47  ;;  %v2617_v49 = vpop.permute.xlu1 %2616 }
 0x861   : > { %5121 = vmatpush3.bf16.xpose.msra.mxu1 %v2468_v22 }
 0x862   : > { %v2619_v52 = vpop.permute.xlu0 %2618 }
 0x863   : > { %5137 = vmatpush3.bf16.msra.mxu0 %v2625_v47 }
 0x864   : > { %5138 = vmatprep.subr.bf16.mxu0 %v2623_v55 }
 0x866   : > { %v7215_v28 = vpop.permute.xlu0 %2747 }
 0x867   : > { %5139 = vmatpush3.bf16.msra.mxu0 %v2623_v55 }
 0x868   : > { %5123 = vmatmul.mubr.msk.bf16.vlgmr.msra.gmra.mxu1 %vm1822_vm0, %v2434_v10  ;;  %5140 = vmatprep.subr.bf16.mxu0 %v2621_v51 }
 0x869   : > { %5126 = vmatprep.mubr.msk.bf16.mxu1 %vm1822_vm0, %v2436_v50 }
 0x86b   : > { %5141 = vmatpush3.bf16.msra.mxu0 %v2621_v51 }
 0x86c   : > { %5142 = vmatprep.subr.bf16.mxu0 %v2619_v52 }
 0x86f   : > { %5143 = vmatpush3.bf16.msra.mxu0 %v2619_v52 }
 0x870   : > { %5127 = vmatmul.mubr.msk.bf16.gmra.mxu1 %vm1822_vm0, %v2438_v20  ;;  %5144 = vmatprep.subr.bf16.mxu0 %v2617_v49 }
 0x873   : > { %5145 = vmatpush3.bf16.msra.mxu0 %v2617_v49 }
 0x874   : > { %5250 = vmatprep.subr.msk.bf16.mxu0 %vm1822_vm0, %v7215_v28 }
 0x8e1   : > { %v7219_v4 = vpop.f32.mrf.mxu1 }
 0x8e3   : > { %v7221_v30 = vpop.f32.mrf.mxu1 }
 0x8e5   : > { %v7223_v6 = vpop.f32.mrf.mxu1 }
 0x8e7   : > { %v7225_v33 = vpop.f32.mrf.mxu1 }
 0x918   : > { %v7227_v21 = vpop.f32.mrf.mxu1 }
 0x91a   : > { %v7229_v62 = vpop.f32.mrf.mxu1 }
 0x91c   : > { %v7231_v22 = vpop.f32.mrf.mxu1 }
 0x91e   : > { %v7233_v10 = vpop.f32.mrf.mxu1 }
 0x928   : > { %v5124_v50 = vpop.f32.mrf.mxu1 }
 0x929   : > { %v2534_v20 = vadd.f32 %v5124_v50, %v6944_v46 }
 0x92a   : > { %v2525_v13 = vpop.f32.mrf.mxu1 }
 0x92b   : > { %v2526_v15 = vadd.f32 %v2525_v13, %v6950_v24  ;;  %2560 = vmax.xlane.f32.xlu1 %v2534_v20 }
 0x92c   : > { %v5125_v11 = vpop.f32.mrf.mxu1 }
 0x92d   : > { %v2537_v47 = vadd.f32 %v5125_v11, %v6953_v48  ;;  %2556 = vmax.xlane.f32.xlu0 %v2526_v15 }
 0x92e   : > { %v2528_v55 = vpop.f32.mrf.mxu1 }
 0x92f   : > { %2562 = vmax.xlane.f32.xlu1 %v2537_v47  ;;  %v2529_v51 = vadd.f32 %v2528_v55, %v6959_v56 }
 0x930   : > { %v5128_v52 = vpop.f32.mrf.mxu1 }
 0x931   : > { %v7244_v50 = vadd.f32 %v5128_v52, %v6975_v60 }
 0x932   : > { %v2541_v49 = vpop.f32.mrf.mxu1 }
 0x933   : > { %2558 = vmax.xlane.f32.xlu1 %v2529_v51  ;;  %v7249_v55 = vadd.f32 %v2541_v49, %v6981_v3 }
 0x934   : > { %v5129_v13 = vpop.f32.mrf.mxu1 }
 0x935   : > { %v2553_v11 = vadd.f32 %v5129_v13, %v6984_v14 }
 0x936   : > { %v2544_v34 = vpop.f32.mrf.mxu1 }
 0x943   : > { %2743 = vrot.lane.b32.xlu0 %v6846_v29, %s6186_s30  ;;  %v7252_v29 = vadd.f32 %v2544_v34, %v6994_v36 }
 0x944   : > { %2741 = vrot.lane.b32.xlu1 %v6852_v58, %s6186_s30  ;;  %v2746_v58 = vpop.permute.xlu1 %2745 }
 0x945   : > { %v2780_v13 = vsel %vm1822_vm0, %v2746_v58, 0 }
 0x962   : > { %2568 = vmax.xlane.f32.xlu0 %v7244_v50 }
 0x966   : > { %2570 = vmax.xlane.f32.xlu0 %v2553_v11 }
 0x968   : > { %2564 = vmax.xlane.f32.xlu1 %v7249_v55 }
 0x96a   : > { %2566 = vmax.xlane.f32.xlu0 %v7252_v29 }
 0x979   : > { %2737 = vrot.lane.b32.xlu1 %v6864_v61, %s6186_s30 }
 0x97d   : > { %2735 = vrot.lane.b32.xlu1 %v6870_v1, %s6186_s30 }
 0x980   : > { %2739 = vrot.lane.b32.xlu0 %v6858_v59, %s6186_s30 }
 0x981   : > { %2733 = vrot.lane.b32.xlu1 %v6890_v37, %s6186_s30 }
 0x984   : > { %2725 = vrot.lane.b32.xlu0 %v6903_v53, %s6186_s30 }
 0x985   : > { %2727 = vrot.lane.b32.xlu1 %v6905_v26, %s6186_s30 }
 0x988   : > { %2729 = vrot.lane.b32.xlu0 %v6911_v38, %s6186_s30 }
 0x989   : > { %2731 = vrot.lane.b32.xlu1 %v6913_v39, %s6186_s30 }
 0x98c   : > { %2924 = vrot.lane.b32.xlu0 %v6919_v40, %s6186_s30 }
 0x98d   : > { %2922 = vrot.lane.b32.xlu1 %v6921_v0, %s6186_s30 }
 0x991   : > { %2920 = vrot.lane.b32.xlu1 %v6926_v41, %s6186_s30 }
 0x995   : > { %2918 = vrot.lane.b32.xlu1 %v6930_v9, %s6186_s30 }
 0x9b4   : > { %v2561_v59 = vpop.xlane.xlu1 %2560 }
 0x9b5   : > { %v2574_v26 = vsub.f32 %v2534_v20, %v2561_v59 }
 0x9b6   : > { %v2557_v61 = vpop.xlane.xlu0 %2556 }
 0x9b7   : > { %v2572_v1 = vsub.f32 %v2526_v15, %v2557_v61  ;;  %v2584_v52 = vmul.f32 1.442695, %v2574_v26 }
 0x9b8   : > { %v2563_v37 = vpop.xlane.xlu1 %2562 }
 0x9b9   : > { %v2575_v53 = vsub.f32 %v2537_v47, %v2563_v37  ;;  %v2580_v38 = vmul.f32 1.442695, %v2572_v1 }
 0x9ba   : > { %v2744_v59 = vpop.permute.xlu0 %2743 }
 0x9bb   : > { %v2586_v39 = vmul.f32 1.442695, %v2575_v53  ;;  %5670 = vpow2.f32 %v2580_v38  ;;  %v2777_v61 = vsel %vm1822_vm0, %v2744_v59, 0 }
 0x9bc   : > { %v2559_v34 = vpop.xlane.xlu1 %2558 }
 0x9bd   : > { %v2573_v40 = vsub.f32 %v2529_v51, %v2559_v34  ;;  %5672 = vpow2.f32 %v2586_v39  ;;  %v2783_v51 = vsel %vm1822_vm0, %v7215_v28, 0 }
 0x9bf   : > { %v2582_v0 = vmul.f32 1.442695, %v2573_v40 }
 0x9c0   : > { %v2742_v1 = vpop.permute.xlu1 %2741 }
 0x9c1   : > { %5674 = vpow2.f32 %v2582_v0  ;;  %v2774_v37 = vsel %vm1822_vm0, %v2742_v1, 0 }
 0x9c2   : > { %5676 = vpow2.f32 %v2584_v52 }
 0x9c8   : > { %v7280_v41 = vpop.eup %5670 }
 0x9ca   : > { %v7282_v9 = vpop.eup %5672 }
 0x9ce   : > { %v7284_v49 = vpop.eup %5674 }
 0x9cf   : > { %v7286_v15 = vpop.eup %5676  ;;  %v2612_v20 = vpack.c.bf16 %v7284_v49, %v7280_v41 }
 0x9d0   : > { %v2613_v47 = vpack.c.bf16 %v7282_v9, %v7286_v15 }
 0x9d1   : > { %5146 = vmatprep.mubr.bf16.mxu0 %v2612_v20 }
 0x9d2   : > { %5147 = vmatmul.mubr.bf16.vlgmr.msra.gmra.mxu0 %v2613_v47 }
 0x9d3   : > { %5155 = vmatpush3.bf16.xpose.msra.mxu0 %v2783_v51 }
 0x9d4   : > { %5251 = vmatprep.subr.msk.bf16.mxu0 %vm1822_vm0, %v2746_v58 }
 0x9db   : > { %5157 = vmatpush3.bf16.xpose.msra.mxu0 %v2780_v13 }
 0x9dc   : > { %5252 = vmatprep.subr.msk.bf16.mxu0 %vm1822_vm0, %v2744_v59 }
 0x9e3   : > { %5159 = vmatpush3.bf16.xpose.msra.mxu0 %v2777_v61 }
 0x9e4   : > { %5253 = vmatprep.subr.msk.bf16.mxu0 %vm1822_vm0, %v2742_v1 }
 0x9eb   : > { %5161 = vmatpush3.bf16.xpose.msra.mxu0 %v2774_v37  ;;  %v2569_v28 = vpop.xlane.xlu0 %2568 }
 0x9ec   : > { %v2578_v38 = vsub.f32 %v7244_v50, %v2569_v28 }
 0x9ee   : > { %v2592_v20 = vmul.f32 1.442695, %v2578_v38 }
 0x9ef   : > { %v2571_v53 = vpop.xlane.xlu0 %2570 }
 0x9f0   : > { %v2579_v26 = vsub.f32 %v2553_v11, %v2571_v53 }
 0x9f1   : > { %v2565_v39 = vpop.xlane.xlu1 %2564 }
 0x9f2   : > { %v2594_v58 = vmul.f32 1.442695, %v2579_v26  ;;  %v2576_v34 = vsub.f32 %v7249_v55, %v2565_v39 }
 0x9f3   : > { %v2567_v40 = vpop.xlane.xlu0 %2566 }
 0x9f4   : > { %v2588_v52 = vmul.f32 1.442695, %v2576_v34  ;;  %v2577_v0 = vsub.f32 %v7252_v29, %v2567_v40  ;;  %5678 = vpow2.f32 %v2594_v58 }
 0x9f5   : > { %v2738_v50 = vpop.permute.xlu1 %2737 }
 0x9f6   : > { %v2590_v47 = vmul.f32 1.442695, %v2577_v0  ;;  %5680 = vpow2.f32 %v2588_v52  ;;  %v2768_v11 = vsel %vm1822_vm0, %v2738_v50, 0 }
 0x9f7   : > { %v2740_v51 = vpop.permute.xlu0 %2739 }
 0x9f8   : > { %5682 = vpow2.f32 %v2590_v47  ;;  %v2771_v13 = vsel %vm1822_vm0, %v2740_v51, 0  ;;  %5254 = vmatprep.subr.msk.bf16.mxu0 %vm1822_vm0, %v2740_v51 }
 0x9f9   : > { %5684 = vpow2.f32 %v2592_v20  ;;  %5163 = vmatpush3.bf16.xpose.msra.mxu0 %v2771_v13  ;;  %v2736_v55 = vpop.permute.xlu1 %2735 }
 0x9fa   : > { %5255 = vmatprep.subr.msk.bf16.mxu0 %vm1822_vm0, %v2738_v50  ;;  %v2765_v28 = vsel %vm1822_vm0, %v2736_v55, 0 }
 0x9fb   : > { %v2726_v26 = vpop.permute.xlu0 %2725 }
 0x9fd   : > { %v2734_v38 = vpop.permute.xlu1 %2733 }
 0x9fe   : > { %v2762_v39 = vsel %vm1822_vm0, %v2734_v38, 0 }
 0x9ff   : > { %v2730_v34 = vpop.permute.xlu0 %2729 }
 0xa01   : > { %5165 = vmatpush3.bf16.xpose.msra.mxu0 %v2768_v11  ;;  %v7308_v29 = vpop.eup %5678  ;;  %v2728_v58 = vpop.permute.xlu1 %2727 }
 0xa02   : > { %5256 = vmatprep.subr.msk.bf16.mxu0 %vm1822_vm0, %v2736_v55 }
 0xa03   : > { %v7310_v59 = vpop.eup %5680  ;;  %v2925_v52 = vpop.permute.xlu0 %2924 }
 0xa04   : > { %5178 = vmatprep.subr.bf16.mxu1 %v2925_v52 }
 0xa05   : > { %v7312_v61 = vpop.eup %5682  ;;  %v2732_v40 = vpop.permute.xlu1 %2731  ;;  %5179 = vmatpush3.bf16.msra.mxu1 %v2925_v52 }
 0xa06   : > { %v7314_v1 = vpop.eup %5684  ;;  %v2614_v37 = vpack.c.bf16 %v7312_v61, %v7310_v59 }
 0xa07   : > { %v2615_v53 = vpack.c.bf16 %v7308_v29, %v7314_v1 }
 0xa08   : > { %5150 = vmatprep.mubr.bf16.mxu0 %v2614_v37 }
 0xa09   : > { %5151 = vmatmul.mubr.bf16.gmra.mxu0 %v2615_v53  ;;  %v2923_v0 = vpop.permute.xlu1 %2922 }
 0xa0a   : > { %5167 = vmatpush3.bf16.xpose.msra.mxu0 %v2765_v28  ;;  %5170 = vmatprep.mubr.msk.bf16.mxu0 %vm1822_vm0, %v2726_v26 }
 0xa0b   : > { %5257 = vmatprep.subr.msk.bf16.mxu0 %vm1822_vm0, %v2734_v38  ;;  %5180 = vmatprep.subr.bf16.mxu1 %v2923_v0 }
 0xa0c   : > { %5181 = vmatpush3.bf16.msra.mxu1 %v2923_v0 }
 0xa0d   : > { %v2921_v20 = vpop.permute.xlu1 %2920 }
 0xa0e   : > { %5182 = vmatprep.subr.bf16.mxu1 %v2921_v20 }
 0xa10   : > { %5183 = vmatpush3.bf16.msra.mxu1 %v2921_v20 }
 0xa11   : > { %v2919_v47 = vpop.permute.xlu1 %2918 }
 0xa12   : > { %5169 = vmatpush3.bf16.xpose.msra.mxu0 %v2762_v39  ;;  %5184 = vmatprep.subr.bf16.mxu1 %v2919_v47 }
 0xa14   : > { %5185 = vmatpush3.bf16.msra.mxu1 %v2919_v47 }
 0xa19   : > { %5171 = vmatmul.mubr.msk.bf16.vlgmr.msra.gmra.mxu0 %vm1822_vm0, %v2728_v58 }
 0xa1a   : > { %5174 = vmatprep.mubr.msk.bf16.mxu0 %vm1822_vm0, %v2730_v34 }
 0xa21   : > { %5175 = vmatmul.mubr.msk.bf16.gmra.mxu0 %vm1822_vm0, %v2732_v40 }
 0xa92   : > { %v7327_v51 = vpop.f32.mrf.mxu0 }
 0xa94   : > { %v7329_v13 = vpop.f32.mrf.mxu0 }
 0xa96   : > { %v7331_v50 = vpop.f32.mrf.mxu0 }
 0xa98   : > { %v7333_v11 = vpop.f32.mrf.mxu0 }
 0xac9   : > { %v7335_v55 = vpop.f32.mrf.mxu0 }
 0xacb   : > { %v7337_v37 = vpop.f32.mrf.mxu0 }
 0xacd   : > { %v7339_v28 = vpop.f32.mrf.mxu0 }
 0xacf   : > { %v7341_v53 = vpop.f32.mrf.mxu0 }
 0xad9   : > { %v5172_v26 = vpop.f32.mrf.mxu0 }
 0xada   : > { %v2828_v38 = vadd.f32 %v5172_v26, %v6944_v46 }
 0xadb   : > { %v2819_v39 = vpop.f32.mrf.mxu0 }
 0xadc   : > { %2854 = vmax.xlane.f32.xlu0 %v2828_v38  ;;  %v2820_v34 = vadd.f32 %v2819_v39, %v6950_v24  ;;  %v5782_v24 = vld [vmem:[#allocation3 + $0x10] sm:$0xff]  }
 0xadd   : > { %v5173_v58 = vpop.f32.mrf.mxu0 }
 0xade   : > { %v2831_v0 = vadd.f32 %v5173_v58, %v6953_v48  ;;  %v5783_v48 = vld [vmem:[#allocation3 + $0x18] sm:$0xff]  }
 0xadf   : > { %v2822_v40 = vpop.f32.mrf.mxu0 }
 0xae0   : > { %v2823_v52 = vadd.f32 %v2822_v40, %v6959_v56  ;;  %2850 = vmax.xlane.f32.xlu0 %v2820_v34 }
 0xae1   : > { %v5176_v20 = vpop.f32.mrf.mxu0 }
 0xae2   : > { %2852 = vmax.xlane.f32.xlu1 %v2823_v52  ;;  %v2844_v47 = vadd.f32 %v5176_v20, %v6975_v60 }
 0xae3   : > { %v2835_v42 = vpop.f32.mrf.mxu0 }
 0xae4   : > { %2856 = vmax.xlane.f32.xlu0 %v2831_v0  ;;  %v2836_v46 = vadd.f32 %v2835_v42, %v6981_v3 }
 0xae5   : > { %v5177_v26 = vpop.f32.mrf.mxu0 }
 0xae6   : > { %v7350_v27 = vadd.f32 %v5177_v26, %v6984_v14 }
 0xae7   : > { %v2838_v56 = vpop.f32.mrf.mxu0 }
 0xae8   : > { %2862 = vmax.xlane.f32.xlu0 %v2844_v47  ;;  %v7358_v60 = vadd.f32 %v2838_v56, %v6994_v36 }
 0xaec   : > { %2858 = vmax.xlane.f32.xlu0 %v2836_v46 }
 0xaf0   : > { %2864 = vmax.xlane.f32.xlu0 %v7350_v27 }
 0xaf3   : > { %2914 = vrot.lane.b32.xlu1 %v5782_v24, %s6186_s30 }
 0xaf7   : > { %2912 = vrot.lane.b32.xlu1 %v6962_v57, %s6186_s30 }
 0xb06   : > { %2916 = vrot.lane.b32.xlu0 %v5783_v48, %s6186_s30 }
 0xb1b   : > { %2860 = vmax.xlane.f32.xlu1 %v7358_v60 }
 0xb25   : > { %2302 = vadd.xlane.f32.xlu0 %v7163_v45 }
 0xb29   : > { %2306 = vadd.xlane.f32.xlu0 %v7169_v25 }
 0xb2c   : > { %2910 = vrot.lane.b32.xlu1 %v6966_v35, %s6186_s30 }
 0xb2d   : > { %2308 = vadd.xlane.f32.xlu0 %v7165_v16 }
 0xb31   : > { %2596 = vadd.xlane.f32.xlu0 %v7280_v41 }
 0xb35   : > { %2600 = vadd.xlane.f32.xlu0 %v7286_v15 }
 0xb39   : > { %2310 = vadd.xlane.f32.xlu0 %v7194_v8 }
 0xb50   : > { %2304 = vadd.xlane.f32.xlu1 %v7167_v17 }
 0xb54   : > { %2598 = vadd.xlane.f32.xlu1 %v7284_v49 }
 0xb58   : > { %2602 = vadd.xlane.f32.xlu1 %v7282_v9 }
 0xb5c   : > { %2312 = vadd.xlane.f32.xlu1 %v7196_v2 }
 0xb65   : > { %v2855_v57 = vpop.xlane.xlu0 %2854 }
 0xb66   : > { %v2868_v3 = vsub.f32 %v2828_v38, %v2855_v57 }
 0xb68   : > { %v2878_v14 = vmul.f32 1.442695, %v2868_v3 }
 0xb69   : > { %v2851_v35 = vpop.xlane.xlu0 %2850 }
 0xb6a   : > { %5686 = vpow2.f32 %v2878_v14  ;;  %v2866_v36 = vsub.f32 %v2820_v34, %v2851_v35 }
 0xb6b   : > { %v2853_v42 = vpop.xlane.xlu1 %2852 }
 0xb6c   : > { %v2874_v16 = vmul.f32 1.442695, %v2866_v36  ;;  %v2867_v45 = vsub.f32 %v2823_v52, %v2853_v42 }
 0xb6d   : > { %v2857_v25 = vpop.xlane.xlu0 %2856 }
 0xb6e   : > { %5688 = vpow2.f32 %v2874_v16  ;;  %v2876_v8 = vmul.f32 1.442695, %v2867_v45  ;;  %v2869_v41 = vsub.f32 %v2831_v0, %v2857_v25 }
 0xb6f   : > { %v2915_v20 = vpop.permute.xlu1 %2914 }
 0xb70   : > { %5690 = vpow2.f32 %v2876_v8  ;;  %v2880_v17 = vmul.f32 1.442695, %v2869_v41 }
 0xb71   : > { %v2863_v49 = vpop.xlane.xlu0 %2862 }
 0xb72   : > { %5692 = vpow2.f32 %v2880_v17  ;;  %v2872_v39 = vsub.f32 %v2844_v47, %v2863_v49 }
 0xb74   : > { %v2886_v26 = vmul.f32 1.442695, %v2872_v39 }
 0xb75   : > { %v2859_v9 = vpop.xlane.xlu0 %2858 }
 0xb76   : > { %v2870_v15 = vsub.f32 %v2836_v46, %v2859_v9  ;;  %v2913_v46 = vpop.permute.xlu1 %2912 }
 0xb77   : > { %v5687_v2 = vpop.eup %5686 }
 0xb78   : > { %2894 = vadd.xlane.f32.xlu0 %v5687_v2  ;;  %v2882_v58 = vmul.f32 1.442695, %v2870_v15 }
 0xb79   : > { %v2865_v38 = vpop.xlane.xlu0 %2864 }
 0xb7a   : > { %5694 = vpow2.f32 %v2882_v58 }
 0xb7b   : > { %v5689_v40 = vpop.eup %5688  ;;  %5696 = vpow2.f32 %v2886_v26 }
 0xb7c   : > { %2890 = vadd.xlane.f32.xlu0 %v5689_v40 }
 0xb7d   : > { %v5691_v34 = vpop.eup %5690  ;;  %v2917_v52 = vpop.permute.xlu0 %2916 }
 0xb7e   : > { %5186 = vmatprep.subr.bf16.mxu1 %v2917_v52  ;;  %v2906_v0 = vpack.c.bf16 %v5691_v34, %v5689_v40  ;;  %v5535_v40 = vld [vmem:[#allocation13 + $0x30] sm:$0xff]  }
 0xb7f   : > { %v5693_v24 = vpop.eup %5692  ;;  %5187 = vmatpush3.bf16.msra.mxu1 %v2917_v52 }
 0xb80   : > { %2314 = vadd.xlane.f32.xlu0 %v7198_v23  ;;  %5194 = vmatprep.mubr.bf16.mxu1 %v2906_v0 }
 0xb81   : > { %2896 = vadd.xlane.f32.xlu1 %v5693_v24  ;;  %5188 = vmatprep.subr.bf16.mxu1 %v2915_v20 }
 0xb83   : > { %5189 = vmatpush3.bf16.msra.mxu1 %v2915_v20 }
 0xb84   : > { %2604 = vadd.xlane.f32.xlu0 %v7310_v59  ;;  %5190 = vmatprep.subr.bf16.mxu1 %v2913_v46  ;;  %v2873_v59 = vsub.f32 %v7350_v27, %v2865_v38 }
 0xb85   : > { %2892 = vadd.xlane.f32.xlu1 %v5691_v34  ;;  %v5538_v34 = vld [vmem:[#allocation13 + $0x18] sm:$0xff]  }
 0xb87   : > { %5191 = vmatpush3.bf16.msra.mxu1 %v2913_v46  ;;  %v5695_v47 = vpop.eup %5694 }
 0xb88   : > { %2608 = vadd.xlane.f32.xlu0 %v7314_v1  ;;  %v5697_v23 = vpop.eup %5696  ;;  %v2888_v1 = vmul.f32 1.442695, %v2873_v59 }
 0xb89   : > { %2316 = vadd.xlane.f32.xlu1 %v7192_v12 }
 0xb8a   : > { %5698 = vpow2.f32 %v2888_v1 }
 0xb8c   : > { %2898 = vadd.xlane.f32.xlu0 %v5695_v47 }
 0xb8d   : > { %2606 = vadd.xlane.f32.xlu1 %v7312_v61 }
 0xb90   : > { %2902 = vadd.xlane.f32.xlu0 %v5697_v23 }
 0xb91   : > { %2610 = vadd.xlane.f32.xlu1 %v7308_v29  ;;  %v2907_v29 = vpack.c.bf16 %v5693_v24, %v5687_v2 }
 0xb94   : > { %1964 = vadd.xlane.f32.xlu0 %v7038_v54 }
 0xb97   : > { %v5699_v54 = vpop.eup %5698 }
 0xb98   : > { %1968 = vadd.xlane.f32.xlu0 %v7042_v63  ;;  %v2909_v27 = vpack.c.bf16 %v5699_v54, %v5697_v23 }
 0xb9c   : > { %1972 = vadd.xlane.f32.xlu0 %v7064_v5 }
 0xba0   : > { %1976 = vadd.xlane.f32.xlu0 %v7070_v44 }
 0xba4   : > { %v2861_v12 = vpop.xlane.xlu1 %2860 }
 0xba5   : > { %v2871_v48 = vsub.f32 %v7358_v60, %v2861_v12 }
 0xba7   : > { %v2884_v56 = vmul.f32 1.442695, %v2871_v48 }
 0xba8   : > { %v2911_v61 = vpop.permute.xlu1 %2910 }
 0xba9   : > { %5700 = vpow2.f32 %v2884_v56  ;;  %5192 = vmatprep.subr.bf16.mxu1 %v2911_v61 }
 0xbaa   : > { %5193 = vmatpush3.bf16.msra.mxu1 %v2911_v61 }
 0xbad   : > { %5195 = vmatmul.mubr.bf16.vlgmr.msra.gmra.mxu1 %v2907_v29  ;;  %v5541_v29 = vld [vmem:[#allocation13] sm:$0xff]  }
 0xbae   : > { %v2303_v57 = vpop.xlane.xlu0 %2302 }
 0xbb2   : > { %v2307_v44 = vpop.xlane.xlu0 %2306 }
 0xbb6   : > { %v5701_v63 = vpop.eup %5700  ;;  %v2309_v60 = vpop.xlane.xlu0 %2308 }
 0xbb7   : > { %2900 = vadd.xlane.f32.xlu1 %v5701_v63  ;;  %v2908_v5 = vpack.c.bf16 %v5701_v63, %v5695_v47  ;;  %5702 = vrcp.f32 %v2309_v60 }
 0xbb8   : > { %5704 = vrcp.f32 %v2307_v44 }
 0xbb9   : > { %5198 = vmatprep.mubr.bf16.mxu1 %v2908_v5  ;;  %5706 = vrcp.f32 %v2303_v57 }
 0xbba   : > { %5199 = vmatmul.mubr.bf16.gmra.mxu1 %v2909_v27  ;;  %v2597_v36 = vpop.xlane.xlu0 %2596 }
 0xbbb   : > { %2904 = vadd.xlane.f32.xlu1 %v5699_v54 }
 0xbbf   : > { %1966 = vadd.xlane.f32.xlu1 %v7040_v32 }
 0xbc3   : > { %1970 = vadd.xlane.f32.xlu1 %v7036_v31  ;;  %v2601_v31 = vpop.xlane.xlu0 %2600 }
 0xbc4   : > { %v5703_v3 = vpop.eup %5702 }
 0xbc5   : > { %v5705_v14 = vpop.eup %5704  ;;  %v2422_v35 = vmul.f32 %v5703_v3, %v7223_v6 }
 0xbc6   : > { %v2421_v42 = vmul.f32 %v5705_v14, %v7219_v4 }
 0xbc7   : > { %1974 = vadd.xlane.f32.xlu1 %v7068_v19  ;;  %v2311_v20 = vpop.xlane.xlu0 %2310 }
 0xbc8   : > { %v2428_v32 = vpack.c.bf16 %v2422_v35, %v2421_v42 }
 0xbcb   : > { %1978 = vadd.xlane.f32.xlu1 %v7066_v18  ;;  %v5707_v18 = vpop.eup %5706 }
 0xbcc   : > { %v2419_v6 = vmul.f32 %v5707_v18, %v7221_v30 }
 0xbd9   : > { %v2305_v16 = vpop.xlane.xlu1 %2304 }
 0xbda   : > { %5708 = vrcp.f32 %v2305_v16 }
 0xbdb   : > { %5710 = vrcp.f32 %v2597_v36 }
 0xbdc   : > { %3025 = vrot.lane.b32.xlu1 %v2428_v32, %s6186_s30 }
 0xbdd   : > { %v2599_v45 = vpop.xlane.xlu1 %2598 }
 0xbde   : > { %5712 = vrcp.f32 %v2599_v45 }
 0xbdf   : > { %5714 = vrcp.f32 %v2601_v31 }
 0xbe1   : > { %v2603_v19 = vpop.xlane.xlu1 %2602 }
 0xbe2   : > { %5716 = vrcp.f32 %v2603_v19 }
 0xbe5   : > { %v2313_v52 = vpop.xlane.xlu1 %2312 }
 0xbe6   : > { %5718 = vrcp.f32 %v2313_v52 }
 0xbe7   : > { %v5709_v25 = vpop.eup %5708 }
 0xbe8   : > { %v2420_v8 = vmul.f32 %v5709_v25, %v7225_v33  ;;  %v5711_v41 = vpop.eup %5710  ;;  %v5534_v33 = vld [vmem:[#allocation13 + $0x38] sm:$0xff]  }
 0xbe9   : > { %v2713_v49 = vmul.f32 %v5711_v41, %v7329_v13  ;;  %5202 = vmatprep.subr.bf16.mxu1 %v5534_v33  ;;  %v5536_v13 = vld [vmem:[#allocation13 + $0x28] sm:$0xff]  }
 0xbea   : > { %v2427_v4 = vpack.c.bf16 %v2420_v8, %v2419_v6  ;;  %5203 = vmatpush3.bf16.msra.mxu1 %v5534_v33 }
 0xbeb   : > { %v5713_v17 = vpop.eup %5712  ;;  %5204 = vmatprep.subr.bf16.mxu1 %v5535_v40 }
 0xbec   : > { %3023 = vrot.lane.b32.xlu0 %v2427_v4, %s6186_s30  ;;  %v2714_v9 = vmul.f32 %v5713_v17, %v7333_v11  ;;  %v5715_v15 = vpop.eup %5714  ;;  %v5537_v11 = vld [vmem:[#allocation13 + $0x20] sm:$0xff]  }
 0xbed   : > { %v2715_v39 = vmul.f32 %v5715_v15, %v7327_v51  ;;  %v5539_v51 = vld [vmem:[#allocation13 + $0x10] sm:$0xff]  }
 0xbee   : > { %v2721_v2 = vpack.c.bf16 %v2714_v9, %v2713_v49  ;;  %5205 = vmatpush3.bf16.msra.mxu1 %v5535_v40 }
 0xbef   : > { %v5717_v38 = vpop.eup %5716  ;;  %5206 = vmatprep.subr.bf16.mxu1 %v5536_v13 }
 0xbf0   : > { %3035 = vrot.lane.b32.xlu1 %v2721_v2, %s6185_s9  ;;  %v2716_v30 = vmul.f32 %v5717_v38, %v7331_v50  ;;  %v5540_v50 = vld [vmem:[#allocation13 + $0x8] sm:$0xff]  }
 0xbf2   : > { %v2722_v58 = vpack.c.bf16 %v2716_v30, %v2715_v39  ;;  %5207 = vmatpush3.bf16.msra.mxu1 %v5536_v13 }
 0xbf3   : > { %5208 = vmatprep.subr.bf16.mxu1 %v5537_v11  ;;  %v5719_v54 = vpop.eup %5718 }
 0xbf4   : > { %3037 = vrot.lane.b32.xlu1 %v2722_v58, %s6185_s9  ;;  %v2424_v49 = vmul.f32 %v5719_v54, %v7233_v10 }
 0xbf6   : > { %5209 = vmatpush3.bf16.msra.mxu1 %v5537_v11 }
 0xbf7   : > { %5210 = vmatprep.subr.bf16.mxu1 %v5538_v34 }
 0xbfa   : > { %5211 = vmatpush3.bf16.msra.mxu1 %v5538_v34 }
 0xbfb   : > { %5212 = vmatprep.subr.bf16.mxu1 %v5539_v51 }
 0xbfe   : > { %5213 = vmatpush3.bf16.msra.mxu1 %v5539_v51 }
 0xbff   : > { %5214 = vmatprep.subr.bf16.mxu1 %v5540_v50 }
 0xc01   : > { %v2895_v26 = vpop.xlane.xlu0 %2894 }
 0xc02   : > { %5215 = vmatpush3.bf16.msra.mxu1 %v5540_v50  ;;  %5720 = vrcp.f32 %v2895_v26 }
 0xc03   : > { %5216 = vmatprep.subr.bf16.mxu1 %v5541_v29 }
 0xc05   : > { %v2891_v24 = vpop.xlane.xlu0 %2890 }
 0xc06   : > { %5722 = vrcp.f32 %v2891_v24  ;;  %5217 = vmatpush3.bf16.msra.mxu1 %v5541_v29 }
 0xc09   : > { %v2315_v47 = vpop.xlane.xlu0 %2314 }
 0xc0a   : > { %v2897_v0 = vpop.xlane.xlu1 %2896 }
 0xc0b   : > { %5724 = vrcp.f32 %v2897_v0 }
 0xc0d   : > { %v2605_v59 = vpop.xlane.xlu0 %2604 }
 0xc0e   : > { %v2893_v46 = vpop.xlane.xlu1 %2892 }
 0xc0f   : > { %v5721_v5 = vpop.eup %5720 }
 0xc11   : > { %v2609_v12 = vpop.xlane.xlu0 %2608 }
 0xc12   : > { %v2317_v23 = vpop.xlane.xlu1 %2316 }
 0xc13   : > { %5726 = vrcp.f32 %v2317_v23  ;;  %v5723_v44 = vpop.eup %5722 }
 0xc14   : > { %5728 = vrcp.f32 %v2315_v47 }
 0xc15   : > { %5730 = vrcp.f32 %v2893_v46  ;;  %v2899_v56 = vpop.xlane.xlu0 %2898 }
 0xc16   : > { %v2607_v1 = vpop.xlane.xlu1 %2606  ;;  %5732 = vrcp.f32 %v2311_v20 }
 0xc18   : > { %v5725_v3 = vpop.eup %5724 }
 0xc19   : > { %v2903_v63 = vpop.xlane.xlu0 %2902 }
 0xc1a   : > { %v2611_v48 = vpop.xlane.xlu1 %2610 }
 0xc1b   : > { %5734 = vrcp.f32 %v2611_v48 }
 0xc1c   : > { %5736 = vrcp.f32 %v2609_v12 }
 0xc1d   : > { %5738 = vrcp.f32 %v2607_v1  ;;  %v1965_v46 = vpop.xlane.xlu0 %1964 }
 0xc1e   : > { %5740 = vrcp.f32 %v2605_v59 }
 0xc1f   : > { %5742 = vrcp.f32 %v2903_v63 }
 0xc20   : > { %v5727_v14 = vpop.eup %5726 }
 0xc21   : > { %v5729_v36 = vpop.eup %5728  ;;  %v2426_v6 = vmul.f32 %v5727_v14, %v7231_v22  ;;  %v1969_v23 = vpop.xlane.xlu0 %1968 }
 0xc22   : > { %v5731_v32 = vpop.eup %5730  ;;  %v2425_v17 = vmul.f32 %v5729_v36, %v7227_v21 }
 0xc23   : > { %v5733_v45 = vpop.eup %5732 }
 0xc24   : > { %v2430_v15 = vpack.c.bf16 %v2426_v6, %v2425_v17  ;;  %v2423_v2 = vmul.f32 %v5733_v45, %v7229_v62 }
 0xc25   : > { %v1973_v1 = vpop.xlane.xlu0 %1972 }
 0xc26   : > { %v2429_v22 = vpack.c.bf16 %v2424_v49, %v2423_v2  ;;  %v7815_v49 = vld [vmem:[#allocation37_spill] sm:$0xff]  ;;  %v7816_v2 = vld [vmem:[#allocation36_spill] sm:$0xff] }
 0xc28   : > { %v5735_v8 = vpop.eup %5734 }
 0xc29   : > { %v5737_v41 = vpop.eup %5736  ;;  %v2720_v38 = vmul.f32 %v5735_v8, %v7339_v28  ;;  %v1977_v29 = vpop.xlane.xlu0 %1976 }
 0xc2a   : > { %v5739_v9 = vpop.eup %5738  ;;  %v2719_v58 = vmul.f32 %v5737_v41, %v7335_v55 }
 0xc2b   : > { %v5741_v39 = vpop.eup %5740  ;;  %v2718_v33 = vmul.f32 %v5739_v9, %v7341_v53 }
 0xc2c   : > { %v2724_v10 = vpack.c.bf16 %v2720_v38, %v2719_v58  ;;  %v2717_v40 = vmul.f32 %v5741_v39, %v7337_v37  ;;  %v5743_v13 = vpop.eup %5742  ;;  %v7817_v39 = vld [vmem:[#allocation35_spill] sm:$0xff]  ;;  %v7818_v58 = vld [vmem:[#allocation34_spill] sm:$0xff] }
 0xc2e   : > { %v2723_v28 = vpack.c.bf16 %v2718_v33, %v2717_v40 }
 0xc40   : > { %v2901_v61 = vpop.xlane.xlu1 %2900 }
 0xc44   : > { %v2905_v27 = vpop.xlane.xlu1 %2904 }
 0xc45   : > { %5744 = vrcp.f32 %v2905_v27  ;;  %v7813_v27 = vld [vmem:[#allocation32_spill] sm:$0xff] }
 0xc46   : > { %5746 = vrcp.f32 %v2899_v56 }
 0xc47   : > { %5748 = vrcp.f32 %v2901_v61 }
 0xc48   : > { %v1967_v37 = vpop.xlane.xlu1 %1966 }
 0xc4c   : > { %v1971_v24 = vpop.xlane.xlu1 %1970 }
 0xc4d   : > { %5750 = vrcp.f32 %v1971_v24 }
 0xc4e   : > { %5752 = vrcp.f32 %v1967_v37  ;;  %v5784_v37 = vld [vmem:[%s6792_s7] sm:$0xff] }
 0xc4f   : > { %5754 = vrcp.f32 %v1969_v23  ;;  %v5785_v23 = vld [vmem:[%s6792_s7 + $0x10] sm:$0xff] }
 0xc50   : > { %v1975_v47 = vpop.xlane.xlu1 %1974  ;;  %5756 = vrcp.f32 %v1965_v46 }
 0xc51   : > { %5758 = vrcp.f32 %v1975_v47 }
 0xc52   : > { %v5745_v11 = vpop.eup %5744 }
 0xc53   : > { %v5747_v34 = vpop.eup %5746 }
 0xc54   : > { %v5749_v20 = vpop.eup %5748  ;;  %v1979_v59 = vpop.xlane.xlu1 %1978 }
 0xc55   : > { %5760 = vrcp.f32 %v1979_v59 }
 0xc56   : > { %5762 = vrcp.f32 %v1973_v1 }
 0xc57   : > { %5764 = vrcp.f32 %v1977_v29 }
 0xc58   : > { %v3026_v12 = vpop.permute.xlu1 %3025 }
 0xc5a   : > { %v5751_v56 = vpop.eup %5750 }
 0xc5b   : > { %v5753_v61 = vpop.eup %5752 }
 0xc5c   : > { %v5755_v54 = vpop.eup %5754 }
 0xc5d   : > { %v5757_v63 = vpop.eup %5756 }
 0xc5e   : > { %v3024_v36 = vpop.permute.xlu0 %3023  ;;  %v5759_v6 = vpop.eup %5758 }
 0xc5f   : > { %v2126_v9 = vmul.f32 %v5759_v6, %v7815_v49 }
 0xc62   : > { %v3036_v48 = vpop.permute.xlu1 %3035  ;;  %v5761_v8 = vpop.eup %5760 }
 0xc63   : > { %v2128_v38 = vmul.f32 %v5761_v8, %v7816_v2 }
 0xc6d   : > { %v5196_v57 = vpop.f32.mrf.mxu1 }
 0xc6e   : > { %v3009_v42 = vmul.f32 %v5721_v5, %v5196_v57  ;;  %v2124_v57 = vmul.f32 %v5751_v56, %v7095_v7  ;;  %v2122_v5 = vmul.f32 %v5753_v61, %v7097_v43  ;;  %v5787_v56 = vld [vmem:[%s6792_s7 + $0x18] sm:$0xff] }
 0xc6f   : > { %v2968_v60 = vpop.f32.mrf.mxu1 }
 0xc70   : > { %v3007_v19 = vmul.f32 %v5723_v44, %v2968_v60  ;;  %v2123_v44 = vmul.f32 %v5755_v54, %v7813_v27  ;;  %v3038_v60 = vpop.permute.xlu1 %3037  ;;  %v5788_v27 = vld [vmem:[%s6792_s7 + $0x20] sm:$0xff] }
 0xc71   : > { %v5197_v35 = vpop.f32.mrf.mxu1 }
 0xc72   : > { %v3010_v16 = vmul.f32 %v5725_v3, %v5197_v35  ;;  %v7814_v3 = vld [vmem:[#allocation33_spill] sm:$0xff]  ;;  %v2130_v35 = vpack.c.bf16 %v2124_v57, %v2123_v44 }
 0xc73   : > { %v2971_v31 = vpop.f32.mrf.mxu1  ;;  %v2121_v14 = vmul.f32 %v5757_v63, %v7814_v3 }
 0xc74   : > { %v3016_v18 = vpack.c.bf16 %v3010_v16, %v3009_v42  ;;  %v3008_v25 = vmul.f32 %v5731_v32, %v2971_v31  ;;  %v3060_v31 = vsel %vm1822_vm0, %v2130_v35, %v3026_v12  ;;  %v5786_v12 = vld [vmem:[%s6792_s7 + $0x8] sm:$0xff] }
 0xc75   : > { %v2129_v42 = vpack.c.bf16 %v2122_v5, %v2121_v14  ;;  %v3071_v43 = vsel %vm3067_vm1, %v3060_v31, %v3038_v60  ;;  %v5789_v14 = vld [vmem:[%s6792_s7 + $0x30] sm:$0xff] }
 0xc76   : > { %v3015_v4 = vpack.c.bf16 %v3008_v25, %v3007_v19  ;;  %3049 = vrot.lane.b32.xlu1 %v3016_v18, %s6184_s24 }
 0xc77   : > { %v3057_v32 = vsel %vm1822_vm0, %v2129_v42, %v3024_v36  ;;  %v5790_v42 = vld [vmem:[%s6792_s7 + $0x28] sm:$0xff] }
 0xc78   : > { %3047 = vrot.lane.b32.xlu0 %v3015_v4, %s6184_s24  ;;  %v3069_v7 = vsel %vm3067_vm1, %v3057_v32, %v3036_v48  ;;  %v5763_v4 = vpop.eup %5762  ;;  %v5791_v32 = vld [vmem:[%s6792_s7 + $0x38] sm:$0xff]  ;;  %s4558_s7 = sshll.u32 %s7824_s8, 4 }
 0xc79   : > { %v5765_v17 = vpop.eup %5764 }
 0xc7a   : > { %v5200_v30 = vpop.f32.mrf.mxu1  ;;  %3029 = vrot.lane.b32.xlu1 %v2430_v15, %s6186_s30  ;;  %v2127_v33 = vmul.f32 %v5765_v17, %v7818_v58 }
 0xc7b   : > { %v3013_v51 = vmul.f32 %v5743_v13, %v5200_v30  ;;  %v2125_v30 = vmul.f32 %v5763_v4, %v7817_v39 }
 0xc7c   : > { %v2984_v21 = vpop.f32.mrf.mxu1  ;;  %3027 = vrot.lane.b32.xlu0 %v2429_v22, %s6186_s30  ;;  %s6188_s30 = smov [#allocation18]  }
 0xc7d   : > { %v3011_v55 = vmul.f32 %v5747_v34, %v2984_v21  ;;  %v2131_v21 = vpack.c.bf16 %v2126_v9, %v2125_v30 }
 0xc7e   : > { %v5201_v62 = vpop.f32.mrf.mxu1  ;;  %3041 = vrot.lane.b32.xlu1 %v2724_v10, %s6185_s9  ;;  %v2132_v10 = vpack.c.bf16 %v2128_v38, %v2127_v33 }
 0xc7f   : > { %v3014_v50 = vmul.f32 %v5745_v11, %v5201_v62 }
 0xc80   : > { %v2987_v52 = vpop.f32.mrf.mxu1  ;;  %3039 = vrot.lane.b32.xlu0 %v2723_v28, %s6185_s9 }
 0xc81   : > { %v3018_v53 = vpack.c.bf16 %v3014_v50, %v3013_v51  ;;  %v3012_v26 = vmul.f32 %v5749_v20, %v2987_v52  ;;  %v4480_v52 = vld [vmem:[%s7819_s5] ss:$0 sm:$0xff]  ;;  %s4557_s5 = sshll.u32 %s7803_s3, 3 }
 0xc82   : > { %s4185_s4 = sadd.s32 %s4558_s7, %s4557_s5 }
 0xc83   : > { %v3017_v0 = vpack.c.bf16 %v3012_v26, %v3011_v55  ;;  %3053 = vrot.lane.b32.xlu1 %v3018_v53, %s6184_s24  ;;  %s4559_s3 = sshll.u32 %s4185_s4, 7 }
 0xc85   : > { %3051 = vrot.lane.b32.xlu0 %v3017_v0, %s6184_s24  ;;  %s7821_s24 = sld [smem:[#allocation51_spill]] }
 0xce8   : > { %v3050_v16 = vpop.permute.xlu1 %3049 }
 0xce9   : > { %v3081_v18 = vsel %vm3076_vm2, %v3071_v43, %v3050_v16  ;;  %v5545_v43 = vld [vmem:[#allocation15 + $0xe8] ss:$16 sps:$4 sm:$0xff]  }
 0xcea   : > { %v3048_v45 = vpop.permute.xlu0 %3047 }
 0xceb   : > { %v3078_v19 = vsel %vm3076_vm2, %v3069_v7, %v3048_v45  ;;  %v5542_v7 = vld [vmem:[#allocation15 + $0xe0] ss:$16 sps:$4 sm:$0xff]   ;;  %v5544_v45 = vld [vmem:[#allocation15 + $0xe4] ss:$16 sps:$4 sm:$0xff]  }
 0xcec   : > { %v3030_v25 = vpop.permute.xlu1 %3029  ;;  %5218 = vmatprep.mubr.bf16.mxu1 %v3078_v19  ;;  %v5547_v19 = vld [vmem:[#allocation15 + $0xec] ss:$16 sps:$4 sm:$0xff]   ;;  %3569 = vmatprep.subr.bf16.mxu0 %v5544_v45 }
 0xced   : > { %5219 = vmatmul.mubr.bf16.vlgmr.msra.gmra.mxu1 %v3081_v18  ;;  %v3066_v11 = vsel %vm1822_vm0, %v2132_v10, %v3030_v25  ;;  %3642 = vmatprep.subr.bf16.mxu1 %v5547_v19  ;;  %v5583_v45 = vld [vmem:[#allocation15 + $0x2c] ss:$16 sps:$4 sm:$0xff]   ;;  %v5581_v19 = vld [vmem:[#allocation15 + $0x28] ss:$16 sps:$4 sm:$0xff]  }
 0xcee   : > { %v3028_v41 = vpop.permute.xlu0 %3027  ;;  %3570 = vmatpush1.bf16.msra.mxu0 %v5542_v7  ;;  %3643 = vmatpush1.bf16.msra.mxu1 %v5545_v43  ;;  %v5580_v7 = vld [vmem:[#allocation15 + $0x24] ss:$16 sps:$4 sm:$0xff]   ;;  %v5578_v43 = vld [vmem:[#allocation15 + $0x20] ss:$16 sps:$4 sm:$0xff]  }
 0xcef   : > { %v3063_v40 = vsel %vm1822_vm0, %v2131_v21, %v3028_v41 }
 0xcf0   : > { %v3042_v15 = vpop.permute.xlu1 %3041 }
 0xcf1   : > { %v3075_v34 = vsel %vm3067_vm1, %v3066_v11, %v3042_v15 }
 0xcf2   : > { %v3040_v22 = vpop.permute.xlu0 %3039 }
 0xcf3   : > { %v3073_v62 = vsel %vm3067_vm1, %v3063_v40, %v3040_v22 }
 0xcf5   : > { %v3054_v13 = vpop.permute.xlu1 %3053 }
 0xcf6   : > { %v3087_v50 = vsel %vm3076_vm2, %v3075_v34, %v3054_v13  ;;  %v5550_v34 = vld [vmem:[#allocation15 + $0xc4] ss:$16 sps:$4 sm:$0xff]  }
 0xcf7   : > { %v3052_v28 = vpop.permute.xlu0 %3051  ;;  %3571 = vmatprep.subr.bf16.mxu0 %v5550_v34 }
 0xcf8   : > { %v3084_v51 = vsel %vm3076_vm2, %v3073_v62, %v3052_v28 }
 0xcf9   : > { %5222 = vmatprep.mubr.bf16.mxu1 %v3084_v51  ;;  %v5553_v51 = vld [vmem:[#allocation15 + $0xcc] ss:$16 sps:$4 sm:$0xff]  }
 0xcfa   : > { %5223 = vmatmul.mubr.bf16.gmra.mxu1 %v3087_v50  ;;  %v5548_v50 = vld [vmem:[#allocation15 + $0xc0] ss:$16 sps:$4 sm:$0xff]   ;;  %3644 = vmatprep.subr.bf16.mxu1 %v5553_v51 }
 0xcfb   : > { %3572 = vmatpush1.bf16.msra.mxu0 %v5548_v50 }
 0xdad   : > { %v5220_v20 = vpop.f32.mrf.mxu1 }
 0xdae   : > { %v3203_v0 = vadd.f32 %v5220_v20, %v4480_v52  ;;  %v5551_v20 = vld [vmem:[#allocation15 + $0xc8] ss:$16 sps:$4 sm:$0xff]  }
 0xdaf   : > { %v3194_v55 = vpop.f32.mrf.mxu1  ;;  %3645 = vmatpush1.bf16.msra.mxu1 %v5551_v20 }
 0xdb0   : > { %v3195_v53 = vadd.f32 %v4480_v52, %v3194_v55  ;;  %v7445_v59 = vadd.f32 %v5785_v23, %v3203_v0  ;;  %v5554_v23 = vld [vmem:[#allocation15 + $0xa0] ss:$16 sps:$4 sm:$0xff]  }
 0xdb1   : > { %v5221_v26 = vpop.f32.mrf.mxu1 }
 0xdb2   : > { %v7441_v24 = vadd.f32 %v5784_v37, %v3195_v53  ;;  %v3206_v1 = vadd.f32 %v5221_v26, %v4480_v52 }
 0xdb3   : > { %v3197_v46 = vpop.f32.mrf.mxu1 }
 0xdb4   : > { %v3198_v47 = vadd.f32 %v4480_v52, %v3197_v46  ;;  %3235 = vadd.xlane.f32.xlu0 %v7441_v24  ;;  %v7453_v61 = vadd.f32 %v5787_v56, %v3206_v1  ;;  %v5556_v46 = vld [vmem:[#allocation15 + $0xa4] ss:$16 sps:$4 sm:$0xff]   ;;  %v5557_v1 = vld [vmem:[#allocation15 + $0xa8] ss:$16 sps:$4 sm:$0xff]  }
 0xdb5   : > { %3573 = vmatprep.subr.bf16.mxu0 %v5556_v46 }
 0xdb6   : > { %v7448_v48 = vadd.f32 %v5786_v12, %v3198_v47  ;;  %v5559_v47 = vld [vmem:[#allocation15 + $0xac] ss:$16 sps:$4 sm:$0xff]   ;;  %3574 = vmatpush1.bf16.msra.mxu0 %v5554_v23  ;;  %v7518_v23 = vld [vmem:[%s7820_s1] ss:$0 sm:$0xff]  ;;  %s4188_s1 = sshll.u32 %s6583_s14, 4  ;;  %s7632_s1 = int_to_ptr.vmem [resolvable:$true] %s4188_s1 }
 0xdb7   : > { %3646 = vmatprep.subr.bf16.mxu1 %v5559_v47  ;;  %s6004_s9 = scalar_lea.vmem %s7632_s1, 1024 }
 0xdb8   : > { %3237 = vadd.xlane.f32.xlu1 %v7448_v48  ;;  %3239 = vadd.xlane.f32.xlu0 %v7445_v59  ;;  %p6005_p10 = scmp.ne.s32.totalorder %s7632_s1, %s6004_s9 }
 0xdb9   : > { %3647 = vmatpush1.bf16.msra.mxu1 %v5557_v1 }
 0xdba   : > { %v5224_v29 = vpop.f32.mrf.mxu1  ;;  %p6006_p0 = pnand %p6005_p10, %p7827_p12 }
 0xdbb   : > { %v3219_v5 = vadd.f32 %v5224_v29, %v4480_v52  ;;  %v5562_v29 = vld [vmem:[#allocation15 + $0x84] ss:$16 sps:$4 sm:$0xff]  }
 0xdbc   : > { %3241 = vadd.xlane.f32.xlu0 %v7453_v61  ;;  %v3210_v54 = vpop.f32.mrf.mxu1  ;;  %3575 = vmatprep.subr.bf16.mxu0 %v5562_v29  ;;  %p6007_p4 = pneg %p6006_p0 }
 0xdbd   : > { %v3211_v63 = vadd.f32 %v4480_v52, %v3210_v54  ;;  %v7461_v35 = vadd.f32 %v5789_v14, %v3219_v5  ;;  %v5565_v54 = vld [vmem:[#allocation15 + $0x8c] ss:$16 sps:$4 sm:$0xff]   ;;  %v5568_v5 = vld [vmem:[#allocation15 + $0x64] ss:$16 sps:$4 sm:$0xff]  }
 0xdbe   : > { %v5225_v57 = vpop.f32.mrf.mxu1  ;;  %3648 = vmatprep.subr.bf16.mxu1 %v5565_v54  ;;  %v5574_v14 = vld [vmem:[#allocation15 + $0x44] ss:$16 sps:$4 sm:$0xff]  }
 0xdbf   : > { %v7457_v44 = vadd.f32 %v5788_v27, %v3211_v63  ;;  %v3222_v36 = vadd.f32 %v5225_v57, %v4480_v52  ;;  %v5560_v63 = vld [vmem:[#allocation15 + $0x80] ss:$16 sps:$4 sm:$0xff]   ;;  %v5563_v57 = vld [vmem:[#allocation15 + $0x88] ss:$16 sps:$4 sm:$0xff]   ;;  %v5571_v27 = vld [vmem:[#allocation15 + $0x6c] ss:$16 sps:$4 sm:$0xff]  }
 0xdc0   : > { %v3213_v60 = vpop.f32.mrf.mxu1  ;;  %3576 = vmatpush1.bf16.msra.mxu0 %v5560_v63  ;;  %3649 = vmatpush1.bf16.msra.mxu1 %v5563_v57 }
 0xdc1   : > { %v3214_v3 = vadd.f32 %v4480_v52, %v3213_v60  ;;  %3243 = vadd.xlane.f32.xlu0 %v7457_v44  ;;  %v7469_v31 = vadd.f32 %v5791_v32, %v3222_v36  ;;  %v5566_v60 = vld [vmem:[#allocation15 + $0x60] ss:$16 sps:$4 sm:$0xff]   ;;  %3577 = vmatprep.subr.bf16.mxu0 %v5568_v5  ;;  %v5577_v36 = vld [vmem:[#allocation15 + $0x4c] ss:$16 sps:$4 sm:$0xff]   ;;  %v5575_v32 = vld [vmem:[#allocation15 + $0x48] ss:$16 sps:$4 sm:$0xff]  }
 0xdc2   : > { %3650 = vmatprep.subr.bf16.mxu1 %v5571_v27 }
 0xdc3   : > { %v7464_v16 = vadd.f32 %v5790_v42, %v3214_v3  ;;  %v5569_v3 = vld [vmem:[#allocation15 + $0x68] ss:$16 sps:$4 sm:$0xff]   ;;  %v5572_v42 = vld [vmem:[#allocation15 + $0x40] ss:$16 sps:$4 sm:$0xff]  }
 0xdc4   : > { %3578 = vmatpush1.bf16.msra.mxu0 %v5566_v60  ;;  %3651 = vmatpush1.bf16.msra.mxu1 %v5569_v3 }
 0xdc5   : > { %3245 = vadd.xlane.f32.xlu1 %v7464_v16  ;;  %3247 = vadd.xlane.f32.xlu0 %v7461_v35 }
 0xdc6   : > { %3579 = vmatprep.subr.bf16.mxu0 %v5574_v14  ;;  %3652 = vmatprep.subr.bf16.mxu1 %v5577_v36 }
 0xdc8   : > { %3580 = vmatpush1.bf16.msra.mxu0 %v5572_v42  ;;  %3653 = vmatpush1.bf16.msra.mxu1 %v5575_v32 }
 0xdc9   : > { %3249 = vadd.xlane.f32.xlu1 %v7469_v31  ;;  %3581 = vmatprep.subr.bf16.mxu0 %v5580_v7 }
 0xdca   : > { %3654 = vmatprep.subr.bf16.mxu1 %v5583_v45  ;;  %v5591_v45 = vld [vmem:[#allocation16 + $0x38] sm:$0xff]  }
 0xdcc   : > { %3582 = vmatpush1.bf16.msra.mxu0 %v5578_v43  ;;  %3655 = vmatpush1.bf16.msra.mxu1 %v5581_v19  ;;  %v5593_v43 = vld [vmem:[#allocation16 + $0xb8] sm:$0xff]   ;;  %v5594_v19 = vld [vmem:[#allocation16 + $0x70] sm:$0xff]  }
 0xe3d   : > { %v3236_v18 = vpop.xlane.xlu0 %3235 }
 0xe3e   : > { %v3251_v25 = vmul.f32 0.0078125, %v3236_v18  ;;  %v5584_v18 = vld [vmem:[#allocation15] ss:$16 sps:$4 sm:$0xff]  }
 0xe40   : > { %v7473_v6 = vsub.f32 %v7441_v24, %v3251_v25  ;;  %v5586_v25 = vld [vmem:[#allocation15 + $0x4] ss:$16 sps:$4 sm:$0xff]  }
 0xe41   : > { %v3238_v8 = vpop.xlane.xlu1 %3237  ;;  %v3240_v41 = vpop.xlane.xlu0 %3239  ;;  %3583 = vmatprep.subr.bf16.mxu0 %v5586_v25 }
 0xe42   : > { %v3252_v4 = vmul.f32 0.0078125, %v3238_v8  ;;  %v3253_v17 = vmul.f32 0.0078125, %v3240_v41  ;;  %v3267_v49 = vmul.f32 %v7473_v6, %v7473_v6  ;;  %v5587_v8 = vld [vmem:[#allocation15 + $0x8] ss:$16 sps:$4 sm:$0xff]   ;;  %v5589_v41 = vld [vmem:[#allocation15 + $0xc] ss:$16 sps:$4 sm:$0xff]   ;;  %3584 = vmatpush1.bf16.msra.mxu0 %v5584_v18 }
 0xe43   : > { %3656 = vmatprep.subr.bf16.mxu1 %v5589_v41  ;;  %v5596_v18 = vld [vmem:[#allocation16 + $0xf0] sm:$0xff]  }
 0xe44   : > { %v7478_v9 = vsub.f32 %v7448_v48, %v3252_v4  ;;  %v7481_v15 = vsub.f32 %v7445_v59, %v3253_v17  ;;  %3275 = vadd.xlane.f32.xlu0 %v3267_v49  ;;  %v6187_v4 = vmov 0   ;;  %3657 = vmatpush1.bf16.msra.mxu1 %v5587_v8  ;;  %v5590_v17 = vld [vmem:[#allocation16 + $0x78] sm:$0xff]   ;;  %v5597_v41 = vld [vmem:[#allocation16 + $0xb0] sm:$0xff]  }
 0xe45   : > { %v3242_v2 = vpop.xlane.xlu0 %3241  ;;  %3601 = vmatprep.mubr.bf16.mxu0 %v6187_v4  ;;  %3674 = vmatprep.mubr.bf16.mxu1 %v6187_v4  ;;  %v5592_v49 = vld [vmem:[#allocation16 + $0xf8] sm:$0xff]  }
 0xe46   : > { %v3254_v38 = vmul.f32 0.0078125, %v3242_v2  ;;  %v3268_v39 = vmul.f32 %v7478_v9, %v7478_v9  ;;  %v3269_v30 = vmul.f32 %v7481_v15, %v7481_v15  ;;  %4842 = vmatprep.subr.bf16.mxu0 %v5590_v17  ;;  %4882 = vmatprep.subr.bf16.mxu1 %v5592_v49  ;;  %v5598_v17 = vld [vmem:[#allocation16 + $0x68] sm:$0xff]  }
 0xe47   : > { %v5600_v49 = vld [vmem:[#allocation16 + $0xe8] sm:$0xff]  }
 0xe48   : > { %v7488_v22 = vsub.f32 %v7453_v61, %v3254_v38  ;;  %3277 = vadd.xlane.f32.xlu1 %v3268_v39  ;;  %3279 = vadd.xlane.f32.xlu0 %v3269_v30 }
 0xe4a   : > { %v3244_v58 = vpop.xlane.xlu0 %3243  ;;  %v3270_v33 = vmul.f32 %v7488_v22, %v7488_v22 }
 0xe4b   : > { %v3255_v21 = vmul.f32 0.0078125, %v3244_v58 }
 0xe4c   : > { %3281 = vadd.xlane.f32.xlu1 %v3270_v33 }
 0xe4d   : > { %v7493_v10 = vsub.f32 %v7457_v44, %v3255_v21 }
 0xe4e   : > { %v3246_v40 = vpop.xlane.xlu1 %3245  ;;  %v3248_v13 = vpop.xlane.xlu0 %3247 }
 0xe4f   : > { %v3256_v11 = vmul.f32 0.0078125, %v3246_v40  ;;  %v3257_v62 = vmul.f32 0.0078125, %v3248_v13  ;;  %v3271_v28 = vmul.f32 %v7493_v10, %v7493_v10 }
 0xe51   : > { %v7498_v52 = vsub.f32 %v7464_v16, %v3256_v11  ;;  %v7501_v55 = vsub.f32 %v7461_v35, %v3257_v62  ;;  %3283 = vadd.xlane.f32.xlu0 %v3271_v28 }
 0xe52   : > { %v3250_v53 = vpop.xlane.xlu1 %3249 }
 0xe53   : > { %v3258_v26 = vmul.f32 0.0078125, %v3250_v53  ;;  %v3272_v0 = vmul.f32 %v7498_v52, %v7498_v52  ;;  %v3273_v37 = vmul.f32 %v7501_v55, %v7501_v55 }
 0xe55   : > { %v7508_v12 = vsub.f32 %v7469_v31, %v3258_v26  ;;  %3285 = vadd.xlane.f32.xlu1 %v3272_v0  ;;  %3287 = vadd.xlane.f32.xlu0 %v3273_v37 }
 0xe57   : > { %v3274_v56 = vmul.f32 %v7508_v12, %v7508_v12 }
 0xe59   : > { %3289 = vadd.xlane.f32.xlu1 %v3274_v56 }
 0xecd   : > { %v3276_v2 = vpop.xlane.xlu0 %3275 }
 0xece   : > { %v3291_v38 = vmul.f32 0.0078125, %v3276_v2 }
 0xed0   : > { %v3299_v39 = vadd.f32 1e-05, %v3291_v38 }
 0xed1   : > { %v3278_v30 = vpop.xlane.xlu1 %3277  ;;  %v3280_v58 = vpop.xlane.xlu0 %3279 }
 0xed2   : > { %5766 = vrsqrt.f32 %v3299_v39  ;;  %v3292_v33 = vmul.f32 0.0078125, %v3278_v30  ;;  %v3293_v21 = vmul.f32 0.0078125, %v3280_v58 }
 0xed4   : > { %v3300_v40 = vadd.f32 1e-05, %v3292_v33  ;;  %v3301_v13 = vadd.f32 1e-05, %v3293_v21  ;;  %v5599_v33 = vld [vmem:[#allocation16 + $0x28] sm:$0xff]  }
 0xed5   : > { %v3282_v11 = vpop.xlane.xlu1 %3281  ;;  %v5601_v21 = vld [vmem:[#allocation16 + $0xa8] sm:$0xff]  }
 0xed6   : > { %5768 = vrsqrt.f32 %v3300_v40  ;;  %v3294_v62 = vmul.f32 0.0078125, %v3282_v11  ;;  %v5602_v11 = vld [vmem:[#allocation16 + $0x60] sm:$0xff]  }
 0xed7   : > { %5770 = vrsqrt.f32 %v3301_v13 }
 0xed8   : > { %v3302_v28 = vadd.f32 1e-05, %v3294_v62  ;;  %v5604_v62 = vld [vmem:[#allocation16 + $0xe0] sm:$0xff]  }
 0xeda   : > { %5772 = vrsqrt.f32 %v3302_v28  ;;  %v3284_v34 = vpop.xlane.xlu0 %3283 }
 0xedb   : > { %v3295_v51 = vmul.f32 0.0078125, %v3284_v34 }
 0xedd   : > { %v3303_v50 = vadd.f32 1e-05, %v3295_v51  ;;  %v5603_v51 = vld [vmem:[#allocation16 + $0x20] sm:$0xff]  }
 0xede   : > { %v3286_v20 = vpop.xlane.xlu1 %3285  ;;  %v3288_v53 = vpop.xlane.xlu0 %3287 }
 0xedf   : > { %v5767_v26 = vpop.eup %5766  ;;  %v3296_v0 = vmul.f32 0.0078125, %v3286_v20  ;;  %v3297_v37 = vmul.f32 0.0078125, %v3288_v53  ;;  %5774 = vrsqrt.f32 %v3303_v50  ;;  %v5605_v50 = vld [vmem:[#allocation16 + $0xa0] sm:$0xff]   ;;  %v5606_v20 = vld [vmem:[#allocation16 + $0x58] sm:$0xff]  }
 0xee0   : > { %v3315_v46 = vmul.f32 %v5767_v26, %v7473_v6  ;;  %v7525_v6 = vld [vmem:[%s7821_s24] ss:$0 sm:$0xff]  ;;  %v5608_v53 = vld [vmem:[#allocation16 + $0xd8] sm:$0xff]   ;;  %s7825_s24 = sld [smem:[#allocation56_spill]] }
 0xee1   : > { %v3304_v47 = vadd.f32 1e-05, %v3296_v0  ;;  %v3305_v1 = vadd.f32 1e-05, %v3297_v37 }
 0xee2   : > { %v3290_v56 = vpop.xlane.xlu1 %3289  ;;  %v3329_v57 = vmul.f32 %v7518_v23, %v3315_v46 }
 0xee3   : > { %v5769_v29 = vpop.eup %5768  ;;  %5776 = vrsqrt.f32 %v3304_v47  ;;  %v3298_v54 = vmul.f32 0.0078125, %v3290_v56  ;;  %v5607_v47 = vld [vmem:[#allocation16 + $0x18] sm:$0xff]  }
 0xee4   : > { %v3316_v63 = vmul.f32 %v5769_v29, %v7478_v9  ;;  %v5771_v5 = vpop.eup %5770  ;;  %5778 = vrsqrt.f32 %v3305_v1  ;;  %v3343_v14 = vadd.f32 %v7525_v6, %v3329_v57  ;;  %v5609_v1 = vld [vmem:[#allocation16 + $0x98] sm:$0xff]   ;;  %v5611_v57 = vld [vmem:[#allocation16 + $0x10] sm:$0xff]  }
 0xee5   : > { %v3306_v27 = vadd.f32 1e-05, %v3298_v54  ;;  %v3317_v9 = vmul.f32 %v5771_v5, %v7481_v15  ;;  %v5610_v54 = vld [vmem:[#allocation16 + $0x50] sm:$0xff]  }
 0xee6   : > { %v3330_v60 = vmul.f32 %v7518_v23, %v3316_v63  ;;  %v5612_v63 = vld [vmem:[#allocation16 + $0xd0] sm:$0xff]   ;;  %s7826_s16 = smov %s7825_s24  ;;  %s7630_s15 = scalar_lea.hbm %s7825_s24, %s4559_s3 }
 0xee7   : > { %v5773_v3 = vpop.eup %5772  ;;  %5780 = vrsqrt.f32 %v3306_v27  ;;  %v3331_v25 = vmul.f32 %v7518_v23, %v3317_v9  ;;  %v5613_v5 = vld [vmem:[#allocation16 + $0x90] sm:$0xff]   ;;  %v5616_v27 = vld [vmem:[#allocation16 + $0xc8] sm:$0xff]   ;;  %v3389_v9 = vlaneseq }
 0xee8   : > { %v3344_v36 = vadd.f32 %v7525_v6, %v3330_v60  ;;  %v3318_v42 = vmul.f32 %v5773_v3, %v7488_v22  ;;  %v5595_v22 = vld [vmem:[#allocation16 + $0x30] sm:$0xff]   ;;  %v5617_v60 = vld [vmem:[#allocation16 + $0x88] sm:$0xff]   ;;  %v5620_v3 = vld [vmem:[#allocation16 + $0xc0] sm:$0xff]  }
 0xee9   : > { %v3345_v38 = vadd.f32 %v7525_v6, %v3331_v25 }
 0xeea   : > { %v3351_v32 = vpack.c.bf16 %v3344_v36, %v3343_v14  ;;  %v3332_v7 = vmul.f32 %v7518_v23, %v3318_v42  ;;  %v5619_v14 = vld [vmem:[#allocation16] sm:$0xff]   ;;  %v3390_v42 = vshrl.u32 %v3389_v9, 7 }
 0xeeb   : > { %v5621_v36 = vld [vmem:[#allocation16 + $0x80] sm:$0xff]  }
 0xeec   : > { %3602 = vmatmul.mubr.bf16.vlgmr.msra.gmra.mxu0 %v3351_v32  ;;  %3675 = vmatmul.mubr.bf16.vlgmr.msra.gmra.mxu1 %v3351_v32  ;;  %v5775_v8 = vpop.eup %5774  ;;  %v3346_v15 = vadd.f32 %v7525_v6, %v3332_v7  ;;  %v3395_v32 = vsub.s32 1, %v3390_v42  ;;  %v3403_v7 = vsub.s32 3, %v3390_v42 }
 0xeed   : > { %3611 = vmatprep.mubr.bf16.mxu0 %v6187_v4  ;;  %3684 = vmatprep.mubr.bf16.mxu1 %v6187_v4  ;;  %v3319_v39 = vmul.f32 %v5775_v8, %v7493_v10 }
 0xeee   : > { %4843 = vmatpush3.bf16.msra.mxu0 %v5591_v45  ;;  %4883 = vmatpush3.bf16.msra.mxu1 %v5593_v43  ;;  %v3352_v58 = vpack.c.bf16 %v3346_v15, %v3345_v38  ;;  %v3391_v45 = vsub.s32 0, %v3390_v42  ;;  %v3399_v43 = vsub.s32 2, %v3390_v42 }
 0xeef   : > { %4844 = vmatprep.subr.bf16.mxu0 %v5594_v19  ;;  %4884 = vmatprep.subr.bf16.mxu1 %v5596_v18  ;;  %v3333_v34 = vmul.f32 %v7518_v23, %v3319_v39  ;;  %v3387_v19 = vld [vmem:[%s7822_s18] sm:$0xf]  ;;  %s7638_s18 = scalar_lea.sflag [#allocation6], %s732_s17 }
 0xef0   : > { %v5777_v2 = vpop.eup %5776  ;;  %v7557_v8 = vrot.slane %v3387_v19, %v3395_v32  ;;  %v7559_v15 = vrot.slane %v3387_v19, %v3403_v7 }
 0xef1   : > { %v3320_v30 = vmul.f32 %v5777_v2, %v7498_v52  ;;  %v5779_v40 = vpop.eup %5778  ;;  %v3347_v26 = vadd.f32 %v7525_v6, %v3333_v34 }
 0xef2   : > { %4845 = vmatpush3.bf16.msra.mxu0 %v5595_v22  ;;  %4885 = vmatpush3.bf16.msra.mxu1 %v5597_v41  ;;  %v3321_v0 = vmul.f32 %v5779_v40, %v7501_v55  ;;  %v7561_v22 = vrot.slane %v3387_v19, %v3391_v45  ;;  %v7563_v41 = vrot.slane %v3387_v19, %v3399_v43 }
 0xef3   : > { %v3334_v13 = vmul.f32 %v7518_v23, %v3320_v30  ;;  %4846 = vmatprep.subr.bf16.mxu0 %v5598_v17  ;;  %4886 = vmatprep.subr.bf16.mxu1 %v5600_v49 }
 0xef4   : > { %v5781_v28 = vpop.eup %5780  ;;  %3612 = vmatmul.mubr.bf16.gmra.mxu0 %v3352_v58  ;;  %3685 = vmatmul.mubr.bf16.gmra.mxu1 %v3352_v58 }
 0xef5   : > { %3621 = vmatprep.mubr.bf16.mxu0 %v6187_v4  ;;  %3694 = vmatprep.mubr.bf16.mxu1 %v6187_v4  ;;  %v3348_v10 = vadd.f32 %v7525_v6, %v3334_v13  ;;  %v3322_v52 = vmul.f32 %v5781_v28, %v7508_v12  ;;  %v3335_v12 = vmul.f32 %v7518_v23, %v3321_v0 }
 0xef6   : > { %4847 = vmatpush3.bf16.msra.mxu0 %v5599_v33  ;;  %4887 = vmatpush3.bf16.msra.mxu1 %v5601_v21 }
 0xef7   : > { %4848 = vmatprep.subr.bf16.mxu0 %v5602_v11  ;;  %4888 = vmatprep.subr.bf16.mxu1 %v5604_v62  ;;  %v3353_v37 = vpack.c.bf16 %v3348_v10, %v3347_v26  ;;  %v3336_v46 = vmul.f32 %v7518_v23, %v3322_v52  ;;  %v3349_v55 = vadd.f32 %v7525_v6, %v3335_v12  ;;  %v5614_v23 = vld [vmem:[#allocation16 + $0x48] sm:$0xff]  }
 0xef9   : > { %v3350_v56 = vadd.f32 %v7525_v6, %v3336_v46  ;;  %v5618_v6 = vld [vmem:[#allocation16 + $0x40] sm:$0xff]  }
 0xefa   : > { %4849 = vmatpush3.bf16.msra.mxu0 %v5603_v51  ;;  %4889 = vmatpush3.bf16.msra.mxu1 %v5605_v50 }
 0xefb   : > { %4850 = vmatprep.subr.bf16.mxu0 %v5606_v20  ;;  %4890 = vmatprep.subr.bf16.mxu1 %v5608_v53  ;;  %v3354_v29 = vpack.c.bf16 %v3350_v56, %v3349_v55 }
 0xefc   : > { %3622 = vmatmul.mubr.bf16.gmra.mxu0 %v3353_v37  ;;  %3695 = vmatmul.mubr.bf16.gmra.mxu1 %v3353_v37 }
 0xefd   : > { %3631 = vmatprep.mubr.bf16.mxu0 %v6187_v4  ;;  %3704 = vmatprep.mubr.bf16.mxu1 %v6187_v4  ;;  %v5615_v4 = vld [vmem:[#allocation16 + $0x8] sm:$0xff]  }
 0xefe   : > { %4851 = vmatpush3.bf16.msra.mxu0 %v5607_v47  ;;  %4891 = vmatpush3.bf16.msra.mxu1 %v5609_v1 }
 0xeff   : > { %4852 = vmatprep.subr.bf16.mxu0 %v5610_v54  ;;  %4892 = vmatprep.subr.bf16.mxu1 %v5612_v63 }
 0xf02   : > { %4853 = vmatpush3.bf16.msra.mxu0 %v5611_v57  ;;  %4893 = vmatpush3.bf16.msra.mxu1 %v5613_v5 }
 0xf03   : > { %4854 = vmatprep.subr.bf16.mxu0 %v5614_v23  ;;  %4894 = vmatprep.subr.bf16.mxu1 %v5616_v27 }
 0xf04   : > { %3632 = vmatmul.mubr.bf16.gmra.mxu0 %v3354_v29  ;;  %3705 = vmatmul.mubr.bf16.gmra.mxu1 %v3354_v29 }
 0xf06   : > { %4855 = vmatpush3.bf16.msra.mxu0 %v5615_v4  ;;  %4895 = vmatpush3.bf16.msra.mxu1 %v5617_v60 }
 0xf07   : > { %4856 = vmatprep.subr.bf16.mxu0 %v5618_v6  ;;  %4896 = vmatprep.subr.bf16.mxu1 %v5620_v3 }
 0xf0a   : > { %4857 = vmatpush3.bf16.msra.mxu0 %v5619_v14  ;;  %4897 = vmatpush3.bf16.msra.mxu1 %v5621_v36 }
 0xfac   : > { %v3603_v18 = vpop.f32.mrf.mxu0  ;;  %v3676_v25 = vpop.f32.mrf.mxu1 }
 0xfad   : > { %v3604_v21 = vadd.f32 %v3603_v18, %v7561_v22  ;;  %v3677_v40 = vadd.f32 %v3676_v25, %v7563_v41 }
 0xfae   : > { %v3605_v17 = vpop.f32.mrf.mxu0  ;;  %v3678_v49 = vpop.f32.mrf.mxu1 }
 0xfaf   : > { %v3606_v39 = vadd.f32 %v3605_v17, %v7557_v8  ;;  %v3679_v30 = vadd.f32 %v3678_v49, %v7559_v15  ;;  %v3715_v0 = vmax.f32 %v3604_v21, 0.0  ;;  %v3717_v37 = vmax.f32 %v3677_v40, 0.0 }
 0xfb0   : > { %v3607_v2 = vpop.f32.mrf.mxu0  ;;  %v3680_v38 = vpop.f32.mrf.mxu1 }
 0xfb1   : > { %v3608_v58 = vadd.f32 %v3607_v2, %v7561_v22  ;;  %v3681_v33 = vadd.f32 %v3680_v38, %v7563_v41  ;;  %v3716_v50 = vmax.f32 %v3606_v39, 0.0  ;;  %v3718_v20 = vmax.f32 %v3679_v30, 0.0 }
 0xfb2   : > { %v3609_v13 = vpop.f32.mrf.mxu0  ;;  %v3682_v11 = vpop.f32.mrf.mxu1 }
 0xfb3   : > { %v3610_v62 = vadd.f32 %v3609_v13, %v7557_v8  ;;  %v3683_v28 = vadd.f32 %v3682_v11, %v7559_v15  ;;  %v3719_v34 = vmax.f32 %v3608_v58, 0.0  ;;  %v3721_v10 = vmax.f32 %v3681_v33, 0.0 }
 0xfb4   : > { %v3613_v52 = vpop.f32.mrf.mxu0  ;;  %v3686_v51 = vpop.f32.mrf.mxu1 }
 0xfb5   : > { %v3720_v53 = vmax.f32 %v3610_v62, 0.0  ;;  %v3722_v26 = vmax.f32 %v3683_v28, 0.0  ;;  %v3747_v56 = vpack.c.bf16 %v3719_v34, %v3715_v0  ;;  %v3749_v55 = vpack.c.bf16 %v3721_v10, %v3717_v37 }
 0xfb6   : > { %v3615_v46 = vpop.f32.mrf.mxu0  ;;  %v3688_v47 = vpop.f32.mrf.mxu1  ;;  %v3614_v27 = vadd.f32 %v3613_v52, %v7561_v22  ;;  %v3687_v4 = vadd.f32 %v3686_v51, %v7563_v41 }
 0xfb7   : > { %v3748_v1 = vpack.c.bf16 %v3720_v53, %v3716_v50  ;;  %v3750_v12 = vpack.c.bf16 %v3722_v26, %v3718_v20  ;;  %v3616_v29 = vadd.f32 %v3615_v46, %v7557_v8  ;;  %v3689_v57 = vadd.f32 %v3688_v47, %v7559_v15 }
 0xfb8   : > { %v3617_v54 = vpop.f32.mrf.mxu0  ;;  %v3690_v63 = vpop.f32.mrf.mxu1  ;;  %v3723_v18 = vmax.f32 %v3614_v27, 0.0  ;;  %v3725_v25 = vmax.f32 %v3687_v4, 0.0 }
 0xfb9   : > { %v3618_v5 = vadd.f32 %v3617_v54, %v7561_v22  ;;  %v3691_v23 = vadd.f32 %v3690_v63, %v7563_v41  ;;  %4058 = vmatprep.mubr.bf16.mxu0 %v3748_v1  ;;  %4123 = vmatprep.mubr.bf16.mxu1 %v3750_v12  ;;  %v3724_v7 = vmax.f32 %v3616_v29, 0.0  ;;  %v3726_v45 = vmax.f32 %v3689_v57, 0.0 }
 0xfba   : > { %v3619_v60 = vpop.f32.mrf.mxu0  ;;  %v3692_v6 = vpop.f32.mrf.mxu1  ;;  %4059 = vmatmul.mubr.bf16.vlgmr.msra.gmra.mxu0 %v3747_v56  ;;  %4124 = vmatmul.mubr.bf16.vlgmr.msra.gmra.mxu1 %v3749_v55 }
 0xfbb   : > { %v3620_v3 = vadd.f32 %v3619_v60, %v7557_v8  ;;  %v3693_v14 = vadd.f32 %v3692_v6, %v7559_v15  ;;  %v3727_v36 = vmax.f32 %v3618_v5, 0.0  ;;  %v3729_v9 = vmax.f32 %v3691_v23, 0.0 }
 0xfbc   : > { %v3623_v42 = vpop.f32.mrf.mxu0  ;;  %v3696_v32 = vpop.f32.mrf.mxu1 }
 0xfbd   : > { %v3728_v43 = vmax.f32 %v3620_v3, 0.0  ;;  %v3730_v19 = vmax.f32 %v3693_v14, 0.0  ;;  %v3751_v39 = vpack.c.bf16 %v3727_v36, %v3723_v18  ;;  %v3753_v30 = vpack.c.bf16 %v3729_v9, %v3725_v25 }
 0xfbe   : > { %v3625_v17 = vpop.f32.mrf.mxu0  ;;  %v3698_v49 = vpop.f32.mrf.mxu1  ;;  %v3624_v62 = vadd.f32 %v3623_v42, %v7561_v22  ;;  %v3697_v28 = vadd.f32 %v3696_v32, %v7563_v41 }
 0xfbf   : > { %v3752_v2 = vpack.c.bf16 %v3728_v43, %v3724_v7  ;;  %v3754_v38 = vpack.c.bf16 %v3730_v19, %v3726_v45  ;;  %v3626_v58 = vadd.f32 %v3625_v17, %v7557_v8  ;;  %v3699_v40 = vadd.f32 %v3698_v49, %v7559_v15 }
 0xfc0   : > { %v3627_v33 = vpop.f32.mrf.mxu0  ;;  %v3700_v21 = vpop.f32.mrf.mxu1  ;;  %v3731_v1 = vmax.f32 %v3624_v62, 0.0  ;;  %v3733_v12 = vmax.f32 %v3697_v28, 0.0 }
 0xfc1   : > { %v3628_v13 = vadd.f32 %v3627_v33, %v7561_v22  ;;  %v3701_v11 = vadd.f32 %v3700_v21, %v7563_v41  ;;  %4066 = vmatprep.mubr.bf16.mxu0 %v3752_v2  ;;  %4131 = vmatprep.mubr.bf16.mxu1 %v3754_v38  ;;  %v3732_v0 = vmax.f32 %v3626_v58, 0.0  ;;  %v3734_v37 = vmax.f32 %v3699_v40, 0.0 }
 0xfc2   : > { %v3629_v34 = vpop.f32.mrf.mxu0  ;;  %v3702_v10 = vpop.f32.mrf.mxu1  ;;  %4067 = vmatmul.mubr.bf16.gmra.mxu0 %v3751_v39  ;;  %4132 = vmatmul.mubr.bf16.gmra.mxu1 %v3753_v30 }
 0xfc3   : > { %v3630_v52 = vadd.f32 %v3629_v34, %v7557_v8  ;;  %v3703_v51 = vadd.f32 %v3702_v10, %v7559_v15  ;;  %v3735_v50 = vmax.f32 %v3628_v13, 0.0  ;;  %v3737_v20 = vmax.f32 %v3701_v11, 0.0 }
 0xfc4   : > { %v3633_v53 = vpop.f32.mrf.mxu0  ;;  %v3706_v26 = vpop.f32.mrf.mxu1 }
 0xfc5   : > { %v3736_v46 = vmax.f32 %v3630_v52, 0.0  ;;  %v3738_v47 = vmax.f32 %v3703_v51, 0.0  ;;  %v3755_v63 = vpack.c.bf16 %v3735_v50, %v3731_v1  ;;  %v3757_v57 = vpack.c.bf16 %v3737_v20, %v3733_v12 }
 0xfc6   : > { %v3635_v56 = vpop.f32.mrf.mxu0  ;;  %v3708_v55 = vpop.f32.mrf.mxu1  ;;  %v3634_v3 = vadd.f32 %v3633_v53, %v7561_v22  ;;  %v3707_v14 = vadd.f32 %v3706_v26, %v7563_v41 }
 0xfc7   : > { %v3756_v29 = vpack.c.bf16 %v3736_v46, %v3732_v0  ;;  %v3758_v54 = vpack.c.bf16 %v3738_v47, %v3734_v37  ;;  %v3636_v5 = vadd.f32 %v3635_v56, %v7557_v8  ;;  %v3709_v4 = vadd.f32 %v3708_v55, %v7559_v15 }
 0xfc8   : > { %v3637_v23 = vpop.f32.mrf.mxu0  ;;  %v3710_v27 = vpop.f32.mrf.mxu1  ;;  %v3739_v17 = vmax.f32 %v3634_v3, 0.0  ;;  %v3741_v49 = vmax.f32 %v3707_v14, 0.0 }
 0xfc9   : > { %v3638_v60 = vadd.f32 %v3637_v23, %v7561_v22  ;;  %v3711_v6 = vadd.f32 %v3710_v27, %v7563_v41  ;;  %4074 = vmatprep.mubr.bf16.mxu0 %v3756_v29  ;;  %4139 = vmatprep.mubr.bf16.mxu1 %v3758_v54  ;;  %v3740_v43 = vmax.f32 %v3636_v5, 0.0  ;;  %v3742_v19 = vmax.f32 %v3709_v4, 0.0 }
 0xfca   : > { %v3639_v36 = vpop.f32.mrf.mxu0  ;;  %v3712_v9 = vpop.f32.mrf.mxu1  ;;  %4075 = vmatmul.mubr.bf16.gmra.mxu0 %v3755_v63  ;;  %4140 = vmatmul.mubr.bf16.gmra.mxu1 %v3757_v57 }
 0xfcb   : > { %v3640_v42 = vadd.f32 %v3639_v36, %v7557_v8  ;;  %v3713_v32 = vadd.f32 %v3712_v9, %v7559_v15  ;;  %v3743_v7 = vmax.f32 %v3638_v60, 0.0  ;;  %v3745_v45 = vmax.f32 %v3711_v6, 0.0  ;;  %v7600_v15 = vld [vmem:[%s7823_s26] ss:$0 sm:$0xff]  ;;  %s6008_s26 = sshll.u32 %s6188_s30, 4  ;;  %s6009_s26 = int_to_ptr.vmem [resolvable:$false] %s6008_s26 }
 0xfcc   : > { %s6010_s8 = scalar_lea.vmem %s6009_s26, 2048  ;;  %p6011_p7 = scmp.lt.s32.totalorder %s7632_s1, %s6009_s26 }
 0xfcd   : > { %v3744_v18 = vmax.f32 %v3640_v42, 0.0  ;;  %v3746_v25 = vmax.f32 %v3713_v32, 0.0  ;;  %v3759_v38 = vpack.c.bf16 %v3743_v7, %v3739_v17  ;;  %v3761_v41 = vpack.c.bf16 %v3745_v45, %v3741_v49  ;;  %p6012_p1 = scmp.lt.s32.totalorder %s6010_s8, %s6004_s9 }
 0xfcf   : > { %v3760_v2 = vpack.c.bf16 %v3744_v18, %v3740_v43  ;;  %v3762_v22 = vpack.c.bf16 %v3746_v25, %v3742_v19  ;;  %p6013_p3 = por %p6012_p1, %p6011_p7 }
 0xfd1   : > { %4082 = vmatprep.mubr.bf16.mxu0 %v3760_v2  ;;  %4147 = vmatprep.mubr.bf16.mxu1 %v3762_v22  ;;  %p6014_p11 = pnand %p6013_p3, %p6007_p4 }
 0xfd2   : > { %4083 = vmatmul.mubr.bf16.gmra.mxu0 %v3759_v38  ;;  %4148 = vmatmul.mubr.bf16.gmra.mxu1 %v3761_v41 }
0x107a   : > { %v4858_v39 = vpop.f32.mrf.mxu0  ;;  %v4898_v8 = vpop.f32.mrf.mxu1 }
0x107c   : > { %v4859_v30 = vpop.f32.mrf.mxu0  ;;  %v4899_v58 = vpop.f32.mrf.mxu1 }
0x107d   : > { %v4860_v33 = vadd.f32 %v4859_v30, %v4858_v39  ;;  %v4900_v11 = vadd.f32 %v4899_v58, %v4898_v8 }
0x107e   : > { %v4861_v21 = vpop.f32.mrf.mxu0  ;;  %v4901_v40 = vpop.f32.mrf.mxu1 }
0x107f   : > { %v4061_v13 = vadd.f32 %v4860_v33, %v7600_v15 }
0x1080   : > { %v4862_v62 = vpop.f32.mrf.mxu0  ;;  %v4902_v28 = vpop.f32.mrf.mxu1 }
0x1081   : > { %v4126_v34 = vadd.f32 %v4900_v11, %v4061_v13  ;;  %v4863_v10 = vadd.f32 %v4862_v62, %v4861_v21  ;;  %v4903_v53 = vadd.f32 %v4902_v28, %v4901_v40 }
0x1082   : > { %v4864_v52 = vpop.f32.mrf.mxu0  ;;  %v4904_v51 = vpop.f32.mrf.mxu1 }
0x1083   : > { %v4156_v50 = vadd.f32 %v4126_v34, %v7441_v24  ;;  %v4064_v20 = vadd.f32 %v4863_v10, %v7600_v15 }
0x1084   : > { %v4865_v26 = vpop.f32.mrf.mxu0  ;;  %v4905_v0 = vpop.f32.mrf.mxu1 }
0x1085   : > { %4164 = vst [vmem:[%s6583_s14] sm:$0xff] %v4156_v50  ;;  %v4129_v37 = vadd.f32 %v4903_v53, %v4064_v20  ;;  %v4866_v46 = vadd.f32 %v4865_v26, %v4864_v52  ;;  %v4906_v55 = vadd.f32 %v4905_v0, %v4904_v51 }
0x1086   : > { %v4867_v47 = vpop.f32.mrf.mxu0  ;;  %v4907_v1 = vpop.f32.mrf.mxu1 }
0x1087   : > { %v4157_v12 = vadd.f32 %v4129_v37, %v7448_v48  ;;  %v4069_v56 = vadd.f32 %v4866_v46, %v7600_v15 }
0x1088   : > { %v4868_v29 = vpop.f32.mrf.mxu0  ;;  %v4908_v54 = vpop.f32.mrf.mxu1 }
0x1089   : > { %4165 = vst [vmem:[%s6583_s14 + $0x8] sm:$0xff] %v4157_v12  ;;  %v4134_v24 = vadd.f32 %v4906_v55, %v4069_v56  ;;  %v4869_v63 = vadd.f32 %v4868_v29, %v4867_v47  ;;  %v4909_v4 = vadd.f32 %v4908_v54, %v4907_v1 }
0x108a   : > { %v4870_v57 = vpop.f32.mrf.mxu0  ;;  %v4910_v5 = vpop.f32.mrf.mxu1 }
0x108b   : > { %v4158_v23 = vadd.f32 %v4134_v24, %v7445_v59  ;;  %v4072_v27 = vadd.f32 %v4869_v63, %v7600_v15 }
0x108c   : > { %v4871_v60 = vpop.f32.mrf.mxu0  ;;  %v4911_v6 = vpop.f32.mrf.mxu1 }
0x108d   : > { %4166 = vst [vmem:[%s6583_s14 + $0x10] sm:$0xff] %v4158_v23  ;;  %v4137_v48 = vadd.f32 %v4909_v4, %v4072_v27  ;;  %v4872_v3 = vadd.f32 %v4871_v60, %v4870_v57  ;;  %v4912_v32 = vadd.f32 %v4911_v6, %v4910_v5 }
0x108e   : > { %v4873_v14 = vpop.f32.mrf.mxu0  ;;  %v4913_v36 = vpop.f32.mrf.mxu1 }
0x108f   : > { %v4159_v9 = vadd.f32 %v4137_v48, %v7453_v61  ;;  %v4077_v42 = vadd.f32 %v4872_v3, %v7600_v15 }
0x1090   : > { %v4874_v7 = vpop.f32.mrf.mxu0  ;;  %v4914_v59 = vpop.f32.mrf.mxu1 }
0x1091   : > { %4167 = vst [vmem:[%s6583_s14 + $0x18] sm:$0xff] %v4159_v9  ;;  %v4142_v45 = vadd.f32 %v4912_v32, %v4077_v42  ;;  %v4875_v43 = vadd.f32 %v4874_v7, %v4873_v14  ;;  %v4915_v49 = vadd.f32 %v4914_v59, %v4913_v36 }
0x1092   : > { %v4876_v19 = vpop.f32.mrf.mxu0  ;;  %v4916_v18 = vpop.f32.mrf.mxu1 }
0x1093   : > { %v4160_v25 = vadd.f32 %v4142_v45, %v7457_v44  ;;  %v4080_v17 = vadd.f32 %v4875_v43, %v7600_v15 }
0x1094   : > { %v4877_v2 = vpop.f32.mrf.mxu0  ;;  %v4917_v61 = vpop.f32.mrf.mxu1 }
0x1095   : > { %4168 = vst [vmem:[%s6583_s14 + $0x20] sm:$0xff] %v4160_v25  ;;  %v4145_v22 = vadd.f32 %v4915_v49, %v4080_v17  ;;  %v4878_v38 = vadd.f32 %v4877_v2, %v4876_v19  ;;  %v4918_v44 = vadd.f32 %v4917_v61, %v4916_v18 }
0x1096   : > { %v4879_v41 = vpop.f32.mrf.mxu0  ;;  %v4919_v39 = vpop.f32.mrf.mxu1 }
0x1097   : > { %v4161_v8 = vadd.f32 %v4145_v22, %v7464_v16  ;;  %v4085_v30 = vadd.f32 %v4878_v38, %v7600_v15 }
0x1098   : > { %v4880_v58 = vpop.f32.mrf.mxu0  ;;  %v4920_v33 = vpop.f32.mrf.mxu1 }
0x1099   : > { %4169 = vst [vmem:[%s6583_s14 + $0x28] sm:$0xff] %v4161_v8  ;;  %v4150_v21 = vadd.f32 %v4918_v44, %v4085_v30  ;;  %v4881_v40 = vadd.f32 %v4880_v58, %v4879_v41  ;;  %v4921_v62 = vadd.f32 %v4920_v33, %v4919_v39 }
0x109b   : > { %v4162_v13 = vadd.f32 %v4150_v21, %v7461_v35  ;;  %v4088_v11 = vadd.f32 %v4881_v40, %v7600_v15 }
0x109d   : > { %4170 = vst [vmem:[%s6583_s14 + $0x30] sm:$0xff] %v4162_v13  ;;  %v4153_v16 = vadd.f32 %v4921_v62, %v4088_v11 }
0x109f   : > { %v4163_v28 = vadd.f32 %v4153_v16, %v7469_v31 }
0x10a1   : > { %4171 = vst [vmem:[%s6583_s14 + $0x38] sm:$0xff] %v4163_v28 }
0x10a2   : > { %6017 = shalt.err (!%p6014_p11)
}
0x10a3   : > { %s6018_s17 = scalar_lea.hbm %s7630_s15, 1024  ;;  %s6022_s7 = scalar_lea.hbm %s7826_s16, 4096 }
0x10a4   : > { %p6019_p13 = scmp.ne.s32.totalorder %s7630_s15, %s6018_s17  ;;  %p6023_p6 = scmp.lt.s32.totalorder %s7630_s15, %s7826_s16 }
0x10a5   : > { %p6024_p8 = scmp.lt.s32.totalorder %s6022_s7, %s6018_s17 }
0x10a6   : > { %p6020_p5 = pnand %p6019_p13, %p7827_p12 }
0x10a7   : > { %p6025_p9 = por %p6024_p8, %p6023_p6 }
0x10a8   : > { %p6021_p2 = pneg %p6020_p5 }
0x10aa   : > { %p6026_p10 = pnand %p6025_p9, %p6021_p2 }
0x10ac   : > { %6029 = shalt.err (!%p6026_p10)
}
0x10ad   : > { %s6189_s2 = smov 128   ;;  %s6190_s13 = smov 8  }
0x10ae   : > { %5286 = dma.vmem_to_hbm [thread:$0]  (%p7827_p12), %s7632_s1, 1024, %s7630_s15, %s7638_s18, %s6189_s2, %s6189_s2, %s6190_s13  }
0x10af PF: > { %p5331_p0 = scmp.ge.s32.totalorder %s6168_s25, 2  ;;  %s4203_s24 = sand.u32 1, %s6116_s27  }
0x10b0   : > { %p7828_p4 = scmp.ne.s32.totalorder %s7784_s10, 0  ;;  %s4204_s9 = scalar_lea.sflag [#allocation6], %s4203_s24 }
0x10b2   : > { %p5315_p7 = pnand %p5331_p0, %p7828_p4 }
0x10b4   : > { %p5316_p1 = pneg %p5315_p7 }
0x10b6   : > { %6111 = dma.done.wait (%p5316_p1), %s4204_s9, 1024  }
0x10b7   : > { %6113 = vsyncadd (%p5316_p1), %s4204_s9, 4294966272  ;;  %s40_s25 = sadd.s32 1, %s6168_s25   ;;  %s7830_s2 = sld [smem:[#allocation28_spill]] }
0x10b8   : > { %p7666_p3 = scmp.ge.s32.totalorder %s40_s25, 6   ;;  %s7831_s10 = sld [smem:[#allocation30_spill]] }
0x10b9   : > { %s7832_s24 = sld [smem:[#allocation31_spill]]  ;;  %s7834_s27 = smov %s6120_s28 }
0x10ba   : > { %s7835_s28 = smov %s6124_s29  ;;  %s7836_s29 = smov %s6514_s12 }
0x10bb   : > { %s7837_s30 = smov %s6132_s0  ;;  %s7838_s0 = smov %s6136_s19 }
0x10bc   : > { %s7839_s19 = smov %s6501_s11  ;;  %s7840_s1 = smov %s6144_s20 }
0x10bd   : > { %s7841_s20 = smov %s6148_s21  ;;  %s7842_s21 = smov %s6511_s22 }
0x10be   : > { %s7843_s22 = smov %s6160_s23  ;;  %s7844_s23 = smov %s7831_s10 }
0x10bf   :  { %39 = sbr.rel (!%p7666_p3) target bundleno = 35 (0x23), region = 179 }
0x10c4   :  { %4209 = vsyncpa [#allocation5], 1 }
0x10c5   :  { %4211 = vsyncpa [#allocation5 + $0x1], 1 }
0x10c6   :  { %4212 = vsyncpa [#allocation8], 1 }
0x10c7   :  { %4214 = vsyncpa [#allocation8 + $0x1], 1 }
0x10c8   :  { %4215 = vsyncpa [#allocation11], 1 }
0x10c9   :  { %4216 = vsyncpa [#allocation14], 1 }
0x10ca   :  { %4217 = vsyncpa [#allocation17], 1 }
0x10cb   :  { %4218 = vsyncpa [#allocation6], 1 }
0x10cc   :  { %4220 = vsyncpa [#allocation6 + $0x1], 1 }

</bundles_post_ra>
